<compile_context>
chip_gen: v5e
topology: v5e:2x2
jax: 0.10.0
libtpu: 0.0.40
codegen_flags: <defaults>
</compile_context>

<pallas_src>
import jax
import jax.numpy as jnp
from jax.experimental import pallas as pl
from jax.experimental.pallas import tpu as pltpu


LANE = 128   # lane width
SUB = 16     # bf16 sublane packing -> batch tiles kept a multiple of 16


def _round_up(v, m):
    return ((v + m - 1) // m) * m


def _cdiv(a, b):
    return -(-a // b)


def _has_two_tensorcores():
    """True on chips where dimension_semantics=('parallel',) can shard the grid
    across 2 TensorCores (v4/v5p megacore, v7x)."""
    try:
        kind = jax.devices()[0].device_kind.lower()
        return ("v7" in kind) or ("v4" in kind) or ("v5p" in kind)
    except Exception:
        return False


def _mlp_kernel(x_ref,
                w1_ref, b1_ref,
                w2_ref, b2_ref,
                w3_ref, b3_ref,
                w4_ref, b4_ref,
                o_ref):
    bf16 = jnp.bfloat16

    # Layer 1: Linear(input_dim, 1024) + ReLU   (Dropout(0.5) == identity in eval)
    # x arrives f32; cast to bf16 at the dot input (free VPU work, no HBM copy).
    h = jnp.dot(x_ref[...].astype(bf16), w1_ref[...], preferred_element_type=jnp.float32)
    h = jnp.maximum(h + b1_ref[...], 0.0)

    # Layer 2: Linear(1024, 512) + ReLU         (Dropout(0.3) == identity in eval)
    h = jnp.dot(h.astype(bf16), w2_ref[...], preferred_element_type=jnp.float32)
    h = jnp.maximum(h + b2_ref[...], 0.0)

    # Layer 3: Linear(512, 256) + ReLU
    h = jnp.dot(h.astype(bf16), w3_ref[...], preferred_element_type=jnp.float32)
    h = jnp.maximum(h + b3_ref[...], 0.0)

    # Layer 4: Linear(256, num_classes_padded)
    o = jnp.dot(h.astype(bf16), w4_ref[...], preferred_element_type=jnp.float32)
    o_ref[...] = (o + b4_ref[...]).astype(o_ref.dtype)


def prepare_params(params):
    """One-time weight preparation (hoisted out of the per-call wrapper).

    Input params: w{1..4} as (in_features, out_features) f32, b{1..4} as (1, out) f32.
    Returns bf16 weights (W4/b4 zero-padded to a lane-dense class dim) + f32 biases."""
    input_dim = params["w1"].shape[0]
    num_classes = params["w4"].shape[1]
    c_pad = _round_up(num_classes, LANE)

    w4 = jnp.zeros((256, c_pad), jnp.bfloat16).at[:, :num_classes].set(
        params["w4"].astype(jnp.bfloat16))
    b4 = jnp.zeros((1, c_pad), jnp.float32).at[:, :num_classes].set(
        params["b4"].astype(jnp.float32))

    return {
        "w1": params["w1"].astype(jnp.bfloat16),
        "b1": params["b1"].astype(jnp.float32),
        "w2": params["w2"].astype(jnp.bfloat16),
        "b2": params["b2"].astype(jnp.float32),
        "w3": params["w3"].astype(jnp.bfloat16),
        "b3": params["b3"].astype(jnp.float32),
        "w4": w4,
        "b4": b4,
        "input_dim": int(input_dim),
        "num_classes": int(num_classes),
        "c_pad": int(c_pad),
    }


def mlp_classifier_forward(x, prepared, *, tile_m=1024):
    """Fused 4-layer MLP forward. x: (B, input_dim) float32; prepared = prepare_params(...)."""
    B, input_dim = x.shape
    assert input_dim == prepared["input_dim"], "input_dim mismatch with prepared params"
    num_classes = prepared["num_classes"]
    c_pad = prepared["c_pad"]

    # ---- balanced batch tiling ----
    if B <= tile_m:
        # Single tile, unless the chip has 2 TensorCores and the batch is big enough
        # to be worth splitting for megacore parallelism.
        num_tiles = 2 if (_has_two_tensorcores() and B >= 2 * SUB) else 1
    else:
        num_tiles = _cdiv(B, tile_m)

    if num_tiles == 1:
        tm = B                      # block == full array dim: no (8,128) issue, no padding
        B_pad = B
    else:
        tm = _round_up(_cdiv(B, num_tiles), SUB)
        B_pad = num_tiles * tm

    xb = x if B_pad == B else jnp.pad(x, ((0, B_pad - B), (0, 0)))

    weights = (prepared["w1"], prepared["b1"],
               prepared["w2"], prepared["b2"],
               prepared["w3"], prepared["b3"],
               prepared["w4"], prepared["b4"])

    def build_call(single_buffer_weights):
        def resident_spec(arr):
            # Whole-array block, same block index every grid step -> stays resident in VMEM.
            n = arr.ndim
            idx = lambda i, _n=n: (0,) * _n
            if single_buffer_weights:
                return pl.BlockSpec(arr.shape, idx, pipeline_mode=pl.Buffered(1))
            return pl.BlockSpec(arr.shape, idx)

        in_specs = [pl.BlockSpec((tm, input_dim), lambda i: (i, 0))]   # x tile (f32)
        in_specs += [resident_spec(a) for a in weights]
        out_specs = pl.BlockSpec((tm, c_pad), lambda i: (i, 0))        # lane-dense output

        return pl.pallas_call(
            _mlp_kernel,
            out_shape=jax.ShapeDtypeStruct((B_pad, c_pad), jnp.float32),
            grid_spec=pltpu.PrefetchScalarGridSpec(
                num_scalar_prefetch=0,
                grid=(B_pad // tm,),
                in_specs=in_specs,
                out_specs=out_specs,
            ),
            compiler_params=pltpu.CompilerParams(
                dimension_semantics=("parallel",),
            ),
        )

    args = (xb,) + weights
    try:
        out = build_call(True)(*args)
    except Exception:
        # Fallback: installed JAX does not accept pipeline_mode / Buffered(1) on these
        # BlockSpecs -> use default (double) buffering; correctness is unaffected.
        out = build_call(False)(*args)

    return out[:B, :num_classes]


def init_params(key, input_dim, num_classes):
    """Deterministic init mirroring nn.Linear defaults.
    Weights stored as (in_features, out_features); biases as (1, out)."""
    dims = [(input_dim, 1024), (1024, 512), (512, 256), (256, num_classes)]
    params = {}
    for idx, (fan_in, fan_out) in enumerate(dims, start=1):
        key, kw, kb = jax.random.split(key, 3)
        bound = 1.0 / jnp.sqrt(fan_in)
        params[f"w{idx}"] = jax.random.uniform(
            kw, (fan_in, fan_out), jnp.float32, -bound, bound)
        params[f"b{idx}"] = jax.random.uniform(
            kb, (1, fan_out), jnp.float32, -bound, bound)
    return params


def mlp_reference_f32(x, params):
    """Pure float32 reference (PyTorch eval-mode semantics)."""
    h = jnp.maximum(x @ params["w1"] + params["b1"], 0.0)
    h = jnp.maximum(h @ params["w2"] + params["b2"], 0.0)
    h = jnp.maximum(h @ params["w3"] + params["b3"], 0.0)
    return h @ params["w4"] + params["b4"]


def mlp_reference_bf16(x, params):
    """Reference mirroring the kernel numerics: bf16 matmul operands, f32 accumulation."""
    bf16 = jnp.bfloat16
    h = x.astype(bf16)
    for i in range(1, 5):
        w = params[f"w{i}"].astype(bf16)
        h = jnp.dot(h, w, preferred_element_type=jnp.float32) + params[f"b{i}"]
        if i < 4:
            h = jnp.maximum(h, 0.0).astype(bf16)
    return h


if __name__ == "__main__":
    input_dim = 64
    num_classes = 16
    batch = 2

    key = jax.random.PRNGKey(0)
    key, kx = jax.random.split(key)
    x = jax.random.normal(kx, (batch, input_dim), jnp.float32)
    params = init_params(key, input_dim, num_classes)

    prepared = prepare_params(params)          # one-time weight cast / pad (hoisted)
    out = mlp_classifier_forward(x, prepared)
    out = jax.block_until_ready(out)
    assert out.shape == (batch, num_classes)

    # Exact-numerics check (same bf16 operands / f32 accumulation as the kernel).
    ref_bf16 = mlp_reference_bf16(x, params)
    assert jnp.allclose(out, ref_bf16, atol=2e-3, rtol=2e-3), \
        float(jnp.max(jnp.abs(out - ref_bf16)))

    # Loose sanity check vs the full-precision PyTorch-equivalent forward.
    ref_f32 = mlp_reference_f32(x, params)
    assert jnp.allclose(out, ref_f32, atol=3e-2, rtol=3e-2), \
        float(jnp.max(jnp.abs(out - ref_f32)))

    print("KERNEL_OK")
</pallas_src>

<mosaic_0001>
module attributes {stable_mosaic.version = 11 : i64} {
  func.func @_mlp_kernel(%arg0: i32, %arg1: memref<2x64xf32, #tpu.memory_space<vmem>>, %arg2: memref<64x1024xbf16, #tpu.memory_space<vmem>>, %arg3: memref<1x1024xf32, #tpu.memory_space<vmem>>, %arg4: memref<1024x512xbf16, #tpu.memory_space<vmem>>, %arg5: memref<1x512xf32, #tpu.memory_space<vmem>>, %arg6: memref<512x256xbf16, #tpu.memory_space<vmem>>, %arg7: memref<1x256xf32, #tpu.memory_space<vmem>>, %arg8: memref<256x128xbf16, #tpu.memory_space<vmem>>, %arg9: memref<1x128xf32, #tpu.memory_space<vmem>>, %arg10: memref<2x128xf32, #tpu.memory_space<vmem>>) attributes {dimension_semantics = [#tpu.dimension_semantics<parallel>], iteration_bounds = array<i64: 1>, scalar_prefetch = 0 : i64, scratch_operands = 0 : i64, tpu.core_type = #tpu.core_type<tc>, window_params = [{transform_indices = @transform_0, window_bounds = array<i64: 2, 64>}, {pipeline_mode = #tpu.pipeline_mode<synchronous>, transform_indices = @transform_1, window_bounds = array<i64: 64, 1024>}, {pipeline_mode = #tpu.pipeline_mode<synchronous>, transform_indices = @transform_2, window_bounds = array<i64: 1, 1024>}, {pipeline_mode = #tpu.pipeline_mode<synchronous>, transform_indices = @transform_3, window_bounds = array<i64: 1024, 512>}, {pipeline_mode = #tpu.pipeline_mode<synchronous>, transform_indices = @transform_4, window_bounds = array<i64: 1, 512>}, {pipeline_mode = #tpu.pipeline_mode<synchronous>, transform_indices = @transform_5, window_bounds = array<i64: 512, 256>}, {pipeline_mode = #tpu.pipeline_mode<synchronous>, transform_indices = @transform_6, window_bounds = array<i64: 1, 256>}, {pipeline_mode = #tpu.pipeline_mode<synchronous>, transform_indices = @transform_7, window_bounds = array<i64: 256, 128>}, {pipeline_mode = #tpu.pipeline_mode<synchronous>, transform_indices = @transform_8, window_bounds = array<i64: 1, 128>}, {transform_indices = @transform_9, window_bounds = array<i64: 2, 128>}]} {
    %c0 = arith.constant 0 : index
    %c0_0 = arith.constant 0 : index
    %0 = vector.load %arg1[%c0, %c0_0] : memref<2x64xf32, #tpu.memory_space<vmem>>, vector<2x64xf32>
    %1 = arith.truncf %0 : vector<2x64xf32> to vector<2x64xbf16>
    %c0_1 = arith.constant 0 : index
    %c0_2 = arith.constant 0 : index
    %2 = vector.load %arg2[%c0_1, %c0_2] : memref<64x1024xbf16, #tpu.memory_space<vmem>>, vector<64x1024xbf16>
    %cst = arith.constant dense<0.000000e+00> : vector<2x1024xf32>
    %3 = tpu.matmul %1, %2, %cst {dimension_numbers = #tpu.dot_dimension_numbers<[1], [0], [0], [1], [0, 0, 1, 1], [], []>} : vector<2x64xbf16>, vector<64x1024xbf16>, vector<2x1024xf32> -> vector<2x1024xf32>
    %c0_3 = arith.constant 0 : index
    %c0_4 = arith.constant 0 : index
    %4 = vector.load %arg3[%c0_3, %c0_4] : memref<1x1024xf32, #tpu.memory_space<vmem>>, vector<1x1024xf32>
    %5 = vector.broadcast %4 : vector<1x1024xf32> to vector<2x1024xf32>
    %6 = arith.addf %3, %5 : vector<2x1024xf32>
    %cst_5 = arith.constant 0.000000e+00 : f32
    %7 = vector.broadcast %cst_5 : f32 to vector<2x1024xf32>
    %8 = arith.maximumf %6, %7 : vector<2x1024xf32>
    %9 = arith.truncf %8 : vector<2x1024xf32> to vector<2x1024xbf16>
    %c0_6 = arith.constant 0 : index
    %c0_7 = arith.constant 0 : index
    %10 = vector.load %arg4[%c0_6, %c0_7] : memref<1024x512xbf16, #tpu.memory_space<vmem>>, vector<1024x512xbf16>
    %cst_8 = arith.constant dense<0.000000e+00> : vector<2x512xf32>
    %11 = tpu.matmul %9, %10, %cst_8 {dimension_numbers = #tpu.dot_dimension_numbers<[1], [0], [0], [1], [0, 0, 1, 1], [], []>} : vector<2x1024xbf16>, vector<1024x512xbf16>, vector<2x512xf32> -> vector<2x512xf32>
    %c0_9 = arith.constant 0 : index
    %c0_10 = arith.constant 0 : index
    %12 = vector.load %arg5[%c0_9, %c0_10] : memref<1x512xf32, #tpu.memory_space<vmem>>, vector<1x512xf32>
    %13 = vector.broadcast %12 : vector<1x512xf32> to vector<2x512xf32>
    %14 = arith.addf %11, %13 : vector<2x512xf32>
    %cst_11 = arith.constant 0.000000e+00 : f32
    %15 = vector.broadcast %cst_11 : f32 to vector<2x512xf32>
    %16 = arith.maximumf %14, %15 : vector<2x512xf32>
    %17 = arith.truncf %16 : vector<2x512xf32> to vector<2x512xbf16>
    %c0_12 = arith.constant 0 : index
    %c0_13 = arith.constant 0 : index
    %18 = vector.load %arg6[%c0_12, %c0_13] : memref<512x256xbf16, #tpu.memory_space<vmem>>, vector<512x256xbf16>
    %cst_14 = arith.constant dense<0.000000e+00> : vector<2x256xf32>
    %19 = tpu.matmul %17, %18, %cst_14 {dimension_numbers = #tpu.dot_dimension_numbers<[1], [0], [0], [1], [0, 0, 1, 1], [], []>} : vector<2x512xbf16>, vector<512x256xbf16>, vector<2x256xf32> -> vector<2x256xf32>
    %c0_15 = arith.constant 0 : index
    %c0_16 = arith.constant 0 : index
    %20 = vector.load %arg7[%c0_15, %c0_16] : memref<1x256xf32, #tpu.memory_space<vmem>>, vector<1x256xf32>
    %21 = vector.broadcast %20 : vector<1x256xf32> to vector<2x256xf32>
    %22 = arith.addf %19, %21 : vector<2x256xf32>
    %cst_17 = arith.constant 0.000000e+00 : f32
    %23 = vector.broadcast %cst_17 : f32 to vector<2x256xf32>
    %24 = arith.maximumf %22, %23 : vector<2x256xf32>
    %25 = arith.truncf %24 : vector<2x256xf32> to vector<2x256xbf16>
    %c0_18 = arith.constant 0 : index
    %c0_19 = arith.constant 0 : index
    %26 = vector.load %arg8[%c0_18, %c0_19] : memref<256x128xbf16, #tpu.memory_space<vmem>>, vector<256x128xbf16>
    %cst_20 = arith.constant dense<0.000000e+00> : vector<2x128xf32>
    %27 = tpu.matmul %25, %26, %cst_20 {dimension_numbers = #tpu.dot_dimension_numbers<[1], [0], [0], [1], [0, 0, 1, 1], [], []>} : vector<2x256xbf16>, vector<256x128xbf16>, vector<2x128xf32> -> vector<2x128xf32>
    %c0_21 = arith.constant 0 : index
    %c0_22 = arith.constant 0 : index
    %28 = vector.load %arg9[%c0_21, %c0_22] : memref<1x128xf32, #tpu.memory_space<vmem>>, vector<1x128xf32>
    %29 = vector.broadcast %28 : vector<1x128xf32> to vector<2x128xf32>
    %30 = arith.addf %27, %29 : vector<2x128xf32>
    %c0_23 = arith.constant 0 : index
    %c0_24 = arith.constant 0 : index
    %31 = vector.load %arg10[%c0_23, %c0_24] : memref<2x128xf32, #tpu.memory_space<vmem>>, vector<2x128xf32>
    tpu.vector_store %arg10[%c0_23, %c0_24], %30 {strides = array<i32>} : memref<2x128xf32, #tpu.memory_space<vmem>>, vector<2x128xf32>,
    return
  }
  func.func @transform_0(%arg0: i32) -> (i32, i32) {
    %c0_i32 = arith.constant 0 : i32
    %c0_i32_0 = arith.constant 0 : i32
    return %arg0, %c0_i32 : i32, i32
  }
  func.func @transform_1(%arg0: i32) -> (i32, i32) {
    %c0_i32 = arith.constant 0 : i32
    %c0_i32_0 = arith.constant 0 : i32
    %c0_i32_1 = arith.constant 0 : i32
    return %c0_i32, %c0_i32_0 : i32, i32
  }
  func.func @transform_2(%arg0: i32) -> (i32, i32) {
    %c0_i32 = arith.constant 0 : i32
    %c0_i32_0 = arith.constant 0 : i32
    %c0_i32_1 = arith.constant 0 : i32
    return %c0_i32, %c0_i32_0 : i32, i32
  }
  func.func @transform_3(%arg0: i32) -> (i32, i32) {
    %c0_i32 = arith.constant 0 : i32
    %c0_i32_0 = arith.constant 0 : i32
    %c0_i32_1 = arith.constant 0 : i32
    return %c0_i32, %c0_i32_0 : i32, i32
  }
  func.func @transform_4(%arg0: i32) -> (i32, i32) {
    %c0_i32 = arith.constant 0 : i32
    %c0_i32_0 = arith.constant 0 : i32
    %c0_i32_1 = arith.constant 0 : i32
    return %c0_i32, %c0_i32_0 : i32, i32
  }
  func.func @transform_5(%arg0: i32) -> (i32, i32) {
    %c0_i32 = arith.constant 0 : i32
    %c0_i32_0 = arith.constant 0 : i32
    %c0_i32_1 = arith.constant 0 : i32
    return %c0_i32, %c0_i32_0 : i32, i32
  }
  func.func @transform_6(%arg0: i32) -> (i32, i32) {
    %c0_i32 = arith.constant 0 : i32
    %c0_i32_0 = arith.constant 0 : i32
    %c0_i32_1 = arith.constant 0 : i32
    return %c0_i32, %c0_i32_0 : i32, i32
  }
  func.func @transform_7(%arg0: i32) -> (i32, i32) {
    %c0_i32 = arith.constant 0 : i32
    %c0_i32_0 = arith.constant 0 : i32
    %c0_i32_1 = arith.constant 0 : i32
    return %c0_i32, %c0_i32_0 : i32, i32
  }
  func.func @transform_8(%arg0: i32) -> (i32, i32) {
    %c0_i32 = arith.constant 0 : i32
    %c0_i32_0 = arith.constant 0 : i32
    %c0_i32_1 = arith.constant 0 : i32
    return %c0_i32, %c0_i32_0 : i32, i32
  }
  func.func @transform_9(%arg0: i32) -> (i32, i32) {
    %c0_i32 = arith.constant 0 : i32
    %c0_i32_0 = arith.constant 0 : i32
    return %arg0, %c0_i32 : i32, i32
  }
}

module attributes {stable_mosaic.version = 11 : i64} {
  func.func @_mlp_kernel(%arg0: i32, %arg1: memref<2x64xf32, #tpu.memory_space<vmem>>, %arg2: memref<64x1024xbf16, #tpu.memory_space<vmem>>, %arg3: memref<1x1024xf32, #tpu.memory_space<vmem>>, %arg4: memref<1024x512xbf16, #tpu.memory_space<vmem>>, %arg5: memref<1x512xf32, #tpu.memory_space<vmem>>, %arg6: memref<512x256xbf16, #tpu.memory_space<vmem>>, %arg7: memref<1x256xf32, #tpu.memory_space<vmem>>, %arg8: memref<256x128xbf16, #tpu.memory_space<vmem>>, %arg9: memref<1x128xf32, #tpu.memory_space<vmem>>, %arg10: memref<2x128xf32, #tpu.memory_space<vmem>>) attributes {dimension_semantics = [#tpu.dimension_semantics<parallel>], iteration_bounds = array<i64: 1>, scalar_prefetch = 0 : i64, scratch_operands = 0 : i64, tpu.core_type = #tpu.core_type<tc>, window_params = [{transform_indices = @transform_0, window_bounds = array<i64: 2, 64>}, {pipeline_mode = #tpu.pipeline_mode<synchronous>, transform_indices = @transform_1, window_bounds = array<i64: 64, 1024>}, {pipeline_mode = #tpu.pipeline_mode<synchronous>, transform_indices = @transform_2, window_bounds = array<i64: 1, 1024>}, {pipeline_mode = #tpu.pipeline_mode<synchronous>, transform_indices = @transform_3, window_bounds = array<i64: 1024, 512>}, {pipeline_mode = #tpu.pipeline_mode<synchronous>, transform_indices = @transform_4, window_bounds = array<i64: 1, 512>}, {pipeline_mode = #tpu.pipeline_mode<synchronous>, transform_indices = @transform_5, window_bounds = array<i64: 512, 256>}, {pipeline_mode = #tpu.pipeline_mode<synchronous>, transform_indices = @transform_6, window_bounds = array<i64: 1, 256>}, {pipeline_mode = #tpu.pipeline_mode<synchronous>, transform_indices = @transform_7, window_bounds = array<i64: 256, 128>}, {pipeline_mode = #tpu.pipeline_mode<synchronous>, transform_indices = @transform_8, window_bounds = array<i64: 1, 128>}, {transform_indices = @transform_9, window_bounds = array<i64: 2, 128>}]} {
    %c0 = arith.constant 0 : index
    %c0_0 = arith.constant 0 : index
    %0 = vector.load %arg1[%c0, %c0_0] : memref<2x64xf32, #tpu.memory_space<vmem>>, vector<2x64xf32>
    %1 = arith.truncf %0 : vector<2x64xf32> to vector<2x64xbf16>
    %c0_1 = arith.constant 0 : index
    %c0_2 = arith.constant 0 : index
    %2 = vector.load %arg2[%c0_1, %c0_2] : memref<64x1024xbf16, #tpu.memory_space<vmem>>, vector<64x1024xbf16>
    %cst = arith.constant dense<0.000000e+00> : vector<2x1024xf32>
    %3 = tpu.matmul %1, %2, %cst {dimension_numbers = #tpu.dot_dimension_numbers<[1], [0], [0], [1], [0, 0, 1, 1], [], []>} : vector<2x64xbf16>, vector<64x1024xbf16>, vector<2x1024xf32> -> vector<2x1024xf32>
    %c0_3 = arith.constant 0 : index
    %c0_4 = arith.constant 0 : index
    %4 = vector.load %arg3[%c0_3, %c0_4] : memref<1x1024xf32, #tpu.memory_space<vmem>>, vector<1x1024xf32>
    %5 = vector.broadcast %4 : vector<1x1024xf32> to vector<2x1024xf32>
    %6 = arith.addf %3, %5 : vector<2x1024xf32>
    %cst_5 = arith.constant 0.000000e+00 : f32
    %7 = vector.broadcast %cst_5 : f32 to vector<2x1024xf32>
    %8 = arith.maximumf %6, %7 : vector<2x1024xf32>
    %9 = arith.truncf %8 : vector<2x1024xf32> to vector<2x1024xbf16>
    %c0_6 = arith.constant 0 : index
    %c0_7 = arith.constant 0 : index
    %10 = vector.load %arg4[%c0_6, %c0_7] : memref<1024x512xbf16, #tpu.memory_space<vmem>>, vector<1024x512xbf16>
    %cst_8 = arith.constant dense<0.000000e+00> : vector<2x512xf32>
    %11 = tpu.matmul %9, %10, %cst_8 {dimension_numbers = #tpu.dot_dimension_numbers<[1], [0], [0], [1], [0, 0, 1, 1], [], []>} : vector<2x1024xbf16>, vector<1024x512xbf16>, vector<2x512xf32> -> vector<2x512xf32>
    %c0_9 = arith.constant 0 : index
    %c0_10 = arith.constant 0 : index
    %12 = vector.load %arg5[%c0_9, %c0_10] : memref<1x512xf32, #tpu.memory_space<vmem>>, vector<1x512xf32>
    %13 = vector.broadcast %12 : vector<1x512xf32> to vector<2x512xf32>
    %14 = arith.addf %11, %13 : vector<2x512xf32>
    %cst_11 = arith.constant 0.000000e+00 : f32
    %15 = vector.broadcast %cst_11 : f32 to vector<2x512xf32>
    %16 = arith.maximumf %14, %15 : vector<2x512xf32>
    %17 = arith.truncf %16 : vector<2x512xf32> to vector<2x512xbf16>
    %c0_12 = arith.constant 0 : index
    %c0_13 = arith.constant 0 : index
    %18 = vector.load %arg6[%c0_12, %c0_13] : memref<512x256xbf16, #tpu.memory_space<vmem>>, vector<512x256xbf16>
    %cst_14 = arith.constant dense<0.000000e+00> : vector<2x256xf32>
    %19 = tpu.matmul %17, %18, %cst_14 {dimension_numbers = #tpu.dot_dimension_numbers<[1], [0], [0], [1], [0, 0, 1, 1], [], []>} : vector<2x512xbf16>, vector<512x256xbf16>, vector<2x256xf32> -> vector<2x256xf32>
    %c0_15 = arith.constant 0 : index
    %c0_16 = arith.constant 0 : index
    %20 = vector.load %arg7[%c0_15, %c0_16] : memref<1x256xf32, #tpu.memory_space<vmem>>, vector<1x256xf32>
    %21 = vector.broadcast %20 : vector<1x256xf32> to vector<2x256xf32>
    %22 = arith.addf %19, %21 : vector<2x256xf32>
    %cst_17 = arith.constant 0.000000e+00 : f32
    %23 = vector.broadcast %cst_17 : f32 to vector<2x256xf32>
    %24 = arith.maximumf %22, %23 : vector<2x256xf32>
    %25 = arith.truncf %24 : vector<2x256xf32> to vector<2x256xbf16>
    %c0_18 = arith.constant 0 : index
    %c0_19 = arith.constant 0 : index
    %26 = vector.load %arg8[%c0_18, %c0_19] : memref<256x128xbf16, #tpu.memory_space<vmem>>, vector<256x128xbf16>
    %cst_20 = arith.constant dense<0.000000e+00> : vector<2x128xf32>
    %27 = tpu.matmul %25, %26, %cst_20 {dimension_numbers = #tpu.dot_dimension_numbers<[1], [0], [0], [1], [0, 0, 1, 1], [], []>} : vector<2x256xbf16>, vector<256x128xbf16>, vector<2x128xf32> -> vector<2x128xf32>
    %c0_21 = arith.constant 0 : index
    %c0_22 = arith.constant 0 : index
    %28 = vector.load %arg9[%c0_21, %c0_22] : memref<1x128xf32, #tpu.memory_space<vmem>>, vector<1x128xf32>
    %29 = vector.broadcast %28 : vector<1x128xf32> to vector<2x128xf32>
    %30 = arith.addf %27, %29 : vector<2x128xf32>
    %c0_23 = arith.constant 0 : index
    %c0_24 = arith.constant 0 : index
    %31 = vector.load %arg10[%c0_23, %c0_24] : memref<2x128xf32, #tpu.memory_space<vmem>>, vector<2x128xf32>
    tpu.vector_store %arg10[%c0_23, %c0_24], %30 {strides = array<i32>} : memref<2x128xf32, #tpu.memory_space<vmem>>, vector<2x128xf32>,
    return
  }
  func.func @transform_0(%arg0: i32) -> (i32, i32) {
    %c0_i32 = arith.constant 0 : i32
    %c0_i32_0 = arith.constant 0 : i32
    return %arg0, %c0_i32 : i32, i32
  }
  func.func @transform_1(%arg0: i32) -> (i32, i32) {
    %c0_i32 = arith.constant 0 : i32
    %c0_i32_0 = arith.constant 0 : i32
    %c0_i32_1 = arith.constant 0 : i32
    return %c0_i32, %c0_i32_0 : i32, i32
  }
  func.func @transform_2(%arg0: i32) -> (i32, i32) {
    %c0_i32 = arith.constant 0 : i32
    %c0_i32_0 = arith.constant 0 : i32
    %c0_i32_1 = arith.constant 0 : i32
    return %c0_i32, %c0_i32_0 : i32, i32
  }
  func.func @transform_3(%arg0: i32) -> (i32, i32) {
    %c0_i32 = arith.constant 0 : i32
    %c0_i32_0 = arith.constant 0 : i32
    %c0_i32_1 = arith.constant 0 : i32
    return %c0_i32, %c0_i32_0 : i32, i32
  }
  func.func @transform_4(%arg0: i32) -> (i32, i32) {
    %c0_i32 = arith.constant 0 : i32
    %c0_i32_0 = arith.constant 0 : i32
    %c0_i32_1 = arith.constant 0 : i32
    return %c0_i32, %c0_i32_0 : i32, i32
  }
  func.func @transform_5(%arg0: i32) -> (i32, i32) {
    %c0_i32 = arith.constant 0 : i32
    %c0_i32_0 = arith.constant 0 : i32
    %c0_i32_1 = arith.constant 0 : i32
    return %c0_i32, %c0_i32_0 : i32, i32
  }
  func.func @transform_6(%arg0: i32) -> (i32, i32) {
    %c0_i32 = arith.constant 0 : i32
    %c0_i32_0 = arith.constant 0 : i32
    %c0_i32_1 = arith.constant 0 : i32
    return %c0_i32, %c0_i32_0 : i32, i32
  }
  func.func @transform_7(%arg0: i32) -> (i32, i32) {
    %c0_i32 = arith.constant 0 : i32
    %c0_i32_0 = arith.constant 0 : i32
    %c0_i32_1 = arith.constant 0 : i32
    return %c0_i32, %c0_i32_0 : i32, i32
  }
  func.func @transform_8(%arg0: i32) -> (i32, i32) {
    %c0_i32 = arith.constant 0 : i32
    %c0_i32_0 = arith.constant 0 : i32
    %c0_i32_1 = arith.constant 0 : i32
    return %c0_i32, %c0_i32_0 : i32, i32
  }
  func.func @transform_9(%arg0: i32) -> (i32, i32) {
    %c0_i32 = arith.constant 0 : i32
    %c0_i32_0 = arith.constant 0 : i32
    return %arg0, %c0_i32 : i32, i32
  }
}

</mosaic_0001>

<bundles_post_ra>
// kernel: tpu_custom_call.1
= control target key start
LH: loop header
LB: loop body
LE: loop exit
PB: predicated region body
PF: predicated region fallthrough
CT: control target
= control target key end

     0   :  { %14 = vsyncpa [#allocation3], 0  ;;  %s5421_s0 = inlined_call_operand.hbm [shape: f32[2,64], index: 0, kind: input, shape index: {}]   ;;  %s5422_s1 = inlined_call_operand.hbm [shape: bf16[64,1024], index: 1, kind: input, shape index: {}]   ;;  %s5423_s2 = inlined_call_operand.hbm [shape: f32[1,1024], index: 2, kind: input, shape index: {}]   ;;  %s5424_s3 = inlined_call_operand.hbm [shape: bf16[1024,512], index: 3, kind: input, shape index: {}]   ;;  %s5425_s4 = inlined_call_operand.hbm [shape: f32[1,512], index: 4, kind: input, shape index: {}]   ;;  %s5426_s5 = inlined_call_operand.hbm [shape: bf16[512,256], index: 5, kind: input, shape index: {}]   ;;  %s5427_s6 = inlined_call_operand.vmem [shape: f32[1,256], index: 6, kind: input, shape index: {}]   ;;  %s5428_s7 = inlined_call_operand.hbm [shape: bf16[256,128], index: 7, kind: input, shape index: {}]   ;;  %s5429_s8 = inlined_call_operand.vmem [shape: f32[1,128], index: 8, kind: input, shape index: {}]   ;;  %s5430_s9 = inlined_call_operand.hbm [shape: f32[2,128], index: 9, kind: output, shape index: {}]  }
   0x1   :  { %15 = vsyncpa [#allocation6], 0 }
   0x2   :  { %16 = vsyncpa [#allocation9], 0 }
   0x3   :  { %17 = vsyncpa [#allocation12], 0  ;;  %s34_s11 = sshll.u32 %s5422_s1, 4  ;;  %s35_s11 = int_to_ptr.hbm [resolvable:$true] %s34_s11 }
   0x4   :  { %18 = vsyncpa [#allocation4], 0  ;;  %s5188_s12 = smov [#allocation5]   ;;  %s58_s16 = sshll.u32 %s5424_s3, 4  ;;  %s59_s16 = int_to_ptr.hbm [resolvable:$true] %s58_s16 }
   0x5   :  { %s36_s13 = sshll.u32 %s5188_s12, 4  ;;  %s5189_s17 = smov 512   ;;  %s37_s13 = int_to_ptr.vmem [resolvable:$true] %s36_s13 }
   0x6   :  { %s5190_s18 = smov 32   ;;  %s5191_s19 = smov [#allocation8]  }
   0x7   :  { %42 = dma.hbm_to_vmem [thread:$0]  %s35_s11, 4096, %s37_s13, [#allocation6], %s5189_s17, %s5189_s17, %s5190_s18  }
   0x8   :  { %s60_s20 = sshll.u32 %s5191_s19, 4  ;;  %s5192_s21 = smov 256   ;;  %s61_s20 = int_to_ptr.vmem [resolvable:$true] %s60_s20 }
   0x9   :  { %s5193_s22 = smov 16   ;;  %s82_s24 = sshll.u32 %s5426_s5, 4  ;;  %s83_s24 = int_to_ptr.hbm [resolvable:$true] %s82_s24 }
   0xa   :  { %66 = dma.hbm_to_vmem [thread:$0]  %s59_s16, 32768, %s61_s20, [#allocation9], %s5192_s21, %s5192_s21, %s5193_s22  }
   0xb   :  { %s5194_s25 = smov [#allocation11]   ;;  %s24_s28 = sshll.u32 %s5421_s0, 4  ;;  %s25_s28 = int_to_ptr.hbm [resolvable:$true] %s24_s28 }
   0xc   :  { %s84_s26 = sshll.u32 %s5194_s25, 4  ;;  %s5195_s29 = smov 128   ;;  %s85_s26 = int_to_ptr.vmem [resolvable:$true] %s84_s26 }
   0xd   :  { %s5196_s30 = smov 8   ;;  %s5197_s10 = smov [#allocation2]  }
   0xe   :  { %90 = dma.hbm_to_vmem [thread:$0]  %s83_s24, 8192, %s85_s26, [#allocation12], %s5195_s29, %s5195_s29, %s5196_s30  }
   0xf   :  { %s26_s11 = sshll.u32 %s5197_s10, 4  ;;  %s48_s14 = sshll.u32 %s5423_s2, 4  ;;  %s27_s11 = int_to_ptr.vmem [resolvable:$true] %s26_s11  ;;  %s49_s14 = int_to_ptr.hbm [resolvable:$true] %s48_s14 }
  0x10   :  { %29 = dma.hbm_to_vmem [thread:$0]  %s25_s28, 32, %s27_s11, [#allocation3]  }
  0x11   :  { %s72_s16 = sshll.u32 %s5425_s4, 4  ;;  %s5198_s17 = smov [#allocation7]   ;;  %s73_s16 = int_to_ptr.hbm [resolvable:$true] %s72_s16 }
  0x12   :  { %s50_s18 = sshll.u32 %s5198_s17, 4  ;;  %s5199_s0 = smov [#allocation10]   ;;  %s51_s18 = int_to_ptr.vmem [resolvable:$true] %s50_s18 }
  0x13   :  { %53 = dma.hbm_to_vmem [thread:$0]  %s49_s14, 128, %s51_s18, [#allocation6]  }
  0x14   :  { %s74_s19 = sshll.u32 %s5199_s0, 4  ;;  %s97_s22 = sshll.u32 %s5428_s7, 4  ;;  %s75_s19 = int_to_ptr.vmem [resolvable:$true] %s74_s19  ;;  %s98_s22 = int_to_ptr.hbm [resolvable:$true] %s97_s22 }
  0x15   :  { %77 = dma.hbm_to_vmem [thread:$0]  %s73_s16, 64, %s75_s19, [#allocation9]  }
  0x16   :  { %s5200_s2 = smov [#allocation13]   ;;  %s5201_s23 = smov 64  }
  0x17   :  { %s99_s1 = sshll.u32 %s5200_s2, 4  ;;  %s5202_s24 = smov 4   ;;  %s100_s1 = int_to_ptr.vmem [resolvable:$true] %s99_s1 }
  0x18   :  { %105 = dma.hbm_to_vmem [thread:$0]  %s98_s22, 2048, %s100_s1, [#allocation12], %s5201_s23, %s5201_s23, %s5202_s24  }
  0x19   :  { %5178 = dma.done.wait [#allocation3], 32  }
  0x1a   :  { %5179 = vsyncadd [#allocation3], 4294967264 }
  0x1b   :  { %5180 = dma.done.wait [#allocation6], 4224  }
  0x1c   :  { %5181 = vsyncadd [#allocation6], 4294963072 }
  0x1d   :  { %5182 = dma.done.wait [#allocation9], 32832  }
  0x1e   :  { %5183 = vsyncadd [#allocation9], 4294934464 }
  0x1f   :  { %5184 = dma.done.wait [#allocation12], 10240  }
  0x20   :  { %5185 = vsyncadd [#allocation12], 4294957056  ;;  %v3218_v0 = vld [vmem:[#allocation5 + $0xc0] sm:$0xf]  ;;  %v4624_v2 = vld [vmem:[#allocation5 + $0xc4] sm:$0xf] }
  0x21   :  { %v4628_v1 = vld [vmem:[#allocation5 + $0xdc] sm:$0xf0]  ;;  %v3220_v4 = vld [vmem:[#allocation5 + $0xe0] sm:$0xf0]  ;;  %v3226_v22 = vld [vmem:[#allocation5 + $0xc8] sm:$0xf] }
  0x22   :  { %v3219_v3 = vor.u32 %v4628_v1, %v3218_v0  ;;  %v3186_v5 = vld [vmem:[#allocation5 + $0x80] sm:$0xf]  ;;  %v3223_v7 = vor.u32 %v4624_v2, %v3220_v4  ;;  %v4616_v8 = vld [vmem:[#allocation5 + $0x84] sm:$0xf]  ;;  %v3234_v23 = vld [vmem:[#allocation5 + $0xd0] sm:$0xf] }
  0x23   :  { %v4620_v6 = vld [vmem:[#allocation5 + $0x9c] sm:$0xf0]  ;;  %v3188_v9 = vld [vmem:[#allocation5 + $0xa0] sm:$0xf0]  ;;  %v4630_v24 = vld [vmem:[#allocation5 + $0xec] sm:$0xf0] }
  0x24   :  { %357 = vmatpush.bf16.msra.mxu2 %v3219_v3  ;;  %v3187_v10 = vor.u32 %v4620_v6, %v3186_v5  ;;  %370 = vmatpush.bf16.msra.mxu3 %v3223_v7  ;;  %v3191_v11 = vor.u32 %v4616_v8, %v3188_v9  ;;  %v3154_v12 = vld [vmem:[#allocation5 + $0x40] sm:$0xf]  ;;  %v4608_v14 = vld [vmem:[#allocation5 + $0x44] sm:$0xf]  ;;  %v4629_v25 = vld [vmem:[#allocation5 + $0xe4] sm:$0xf0]  ;;  %v3235_v26 = vor.u32 %v4630_v24, %v3234_v23 }
  0x25   :  { %v4612_v13 = vld [vmem:[#allocation5 + $0x5c] sm:$0xf0]  ;;  %v3156_v15 = vld [vmem:[#allocation5 + $0x60] sm:$0xf0]  ;;  %v4626_v27 = vld [vmem:[#allocation5 + $0xd4] sm:$0xf]  ;;  %v3227_v38 = vor.u32 %v4629_v25, %v3226_v22 }
  0x26   :  { %v3122_v16 = vld [vmem:[#allocation5] sm:$0xf]  ;;  %v3155_v17 = vor.u32 %v4612_v13, %v3154_v12  ;;  %v4600_v19 = vld [vmem:[#allocation5 + $0x4] sm:$0xf]  ;;  %v3159_v21 = vor.u32 %v4608_v14, %v3156_v15  ;;  %v3236_v28 = vld [vmem:[#allocation5 + $0xf0] sm:$0xf0]  ;;  %409 = vmatpush.bf16.msra.mxu0 %v3235_v26 }
  0x27   :  { %v4604_v18 = vld [vmem:[#allocation5 + $0x1c] sm:$0xf0]  ;;  %v3124_v20 = vld [vmem:[#allocation5 + $0x20] sm:$0xf0]  ;;  %v137_v29 = vld [vmem:[#allocation2] sm:$0x3]  ;;  %v3239_v32 = vor.u32 %v4626_v27, %v3236_v28 }
  0x28   :  { %358 = vmatpush.bf16.msra.mxu2 %v3187_v10  ;;  %371 = vmatpush.bf16.msra.mxu3 %v3191_v11  ;;  %v4625_v30 = vld [vmem:[#allocation5 + $0xcc] sm:$0xf]  ;;  %v3123_v33 = vor.u32 %v4604_v18, %v3122_v16  ;;  %v3202_v34 = vld [vmem:[#allocation5 + $0x90] sm:$0xf]  ;;  %v4618_v36 = vld [vmem:[#allocation5 + $0x94] sm:$0xf]  ;;  %v3127_v37 = vor.u32 %v4600_v19, %v3124_v20  ;;  %v5275_v48 = vpack.c.bf16 %v137_v29, %v137_v29 }
  0x29   :  { %v3228_v31 = vld [vmem:[#allocation5 + $0xe8] sm:$0xf0]  ;;  %v4622_v35 = vld [vmem:[#allocation5 + $0xac] sm:$0xf0]  ;;  %v3194_v39 = vld [vmem:[#allocation5 + $0x88] sm:$0xf]  ;;  %422 = vmatpush.bf16.msra.mxu1 %v3239_v32 }
  0x2a   :  { %v4621_v40 = vld [vmem:[#allocation5 + $0xa4] sm:$0xf0]  ;;  %v3203_v41 = vor.u32 %v4622_v35, %v3202_v34  ;;  %v3204_v42 = vld [vmem:[#allocation5 + $0xb0] sm:$0xf0]  ;;  %v3231_v43 = vor.u32 %v4625_v30, %v3228_v31  ;;  %v4617_v44 = vld [vmem:[#allocation5 + $0x8c] sm:$0xf] }
  0x2b   :  { %v3196_v45 = vld [vmem:[#allocation5 + $0xa8] sm:$0xf0]  ;;  %v3207_v46 = vor.u32 %v4618_v36, %v3204_v42  ;;  %v3170_v47 = vld [vmem:[#allocation5 + $0x50] sm:$0xf]  ;;  %v4610_v50 = vld [vmem:[#allocation5 + $0x54] sm:$0xf]  ;;  %v3195_v53 = vor.u32 %v4621_v40, %v3194_v39 }
  0x2c   :  { %359 = vmatpush.bf16.msra.mxu2 %v3155_v17  ;;  %372 = vmatpush.bf16.msra.mxu3 %v3159_v21  ;;  %v4614_v49 = vld [vmem:[#allocation5 + $0x6c] sm:$0xf0]  ;;  %v3172_v51 = vld [vmem:[#allocation5 + $0x70] sm:$0xf0]  ;;  %vm349_vm0 = vcmask 523264   ;;  %v3199_v56 = vor.u32 %v4617_v44, %v3196_v45  ;;  %s5203_s26 = smov [#allocation14]  }
  0x2d   :  { %410 = vmatpush.bf16.msra.mxu0 %v3203_v41  ;;  %v3171_v52 = vor.u32 %v4614_v49, %v3170_v47  ;;  %v3138_v54 = vld [vmem:[#allocation5 + $0x10] sm:$0xf]  ;;  %v3162_v57 = vld [vmem:[#allocation5 + $0x48] sm:$0xf]  ;;  %v4609_v59 = vld [vmem:[#allocation5 + $0x4c] sm:$0xf]  ;;  %423 = vmatpush.bf16.msra.mxu1 %v3207_v46  ;;  %v3175_v60 = vor.u32 %v4610_v50, %v3172_v51 }
  0x2e   :  { %v4606_v55 = vld [vmem:[#allocation5 + $0x2c] sm:$0xf0]  ;;  %v4613_v58 = vld [vmem:[#allocation5 + $0x64] sm:$0xf0]  ;;  %v3164_v61 = vld [vmem:[#allocation5 + $0x68] sm:$0xf0] }
  0x2f   :  { %v4602_v62 = vld [vmem:[#allocation5 + $0x14] sm:$0xf]  ;;  %v3130_v0 = vld [vmem:[#allocation5 + $0x8] sm:$0xf]  ;;  %v3139_v1 = vor.u32 %v4606_v55, %v3138_v54  ;;  %v3163_v2 = vor.u32 %v4613_v58, %v3162_v57  ;;  %v4601_v4 = vld [vmem:[#allocation5 + $0xc] sm:$0xf]  ;;  %v3167_v6 = vor.u32 %v4609_v59, %v3164_v61 }
  0x30   :  { %360 = vmatpush.bf16.msra.mxu2 %v3123_v33  ;;  %373 = vmatpush.bf16.msra.mxu3 %v3127_v37  ;;  %v3140_v63 = vld [vmem:[#allocation5 + $0x30] sm:$0xf0]  ;;  %v4605_v3 = vld [vmem:[#allocation5 + $0x24] sm:$0xf0]  ;;  %v3132_v5 = vld [vmem:[#allocation5 + $0x28] sm:$0xf0] }
  0x31   :  { %411 = vmatpush.bf16.msra.mxu0 %v3171_v52  ;;  %424 = vmatpush.bf16.msra.mxu1 %v3175_v60  ;;  %v3242_v7 = vld [vmem:[#allocation5 + $0xd8] sm:$0xf]  ;;  %v3143_v9 = vor.u32 %v4602_v62, %v3140_v63  ;;  %v3370_v10 = vld [vmem:[#allocation8 + $0xe0] sm:$0xf]  ;;  %v4627_v14 = vld [vmem:[#allocation5 + $0xdc] sm:$0xf]  ;;  %v3131_v19 = vor.u32 %v4605_v3, %v3130_v0  ;;  %v3135_v23 = vor.u32 %v4601_v4, %v3132_v5 }
  0x32   :  { %v4631_v8 = vld [vmem:[#allocation5 + $0xf4] sm:$0xf0]  ;;  %v3498_v12 = vld [vmem:[#allocation8 + $0x1e0] sm:$0xf]  ;;  %v3244_v15 = vld [vmem:[#allocation5 + $0xf8] sm:$0xf0] }
  0x33   :  { %3248 = vmatmul.msk.bf16.vlgmr.msra.gmra.mxu2 %vm349_vm0, %v5275_v48  ;;  %3249 = vmatmul.msk.bf16.vlgmr.msra.gmra.mxu3 %vm349_vm0, %v5275_v48  ;;  %v4662_v11 = vld [vmem:[#allocation8 + $0xec] sm:$0xf0]  ;;  %v3482_v18 = vld [vmem:[#allocation8 + $0x1c0] sm:$0xf]  ;;  %v3243_v24 = vor.u32 %v4631_v8, %v3242_v7  ;;  %v3247_v25 = vor.u32 %v4627_v14, %v3244_v15  ;;  %v4619_v29 = vld [vmem:[#allocation5 + $0x9c] sm:$0xf] }
  0x34   :  { %383 = vmatpush.bf16.msrb.mxu2 %v3227_v38  ;;  %396 = vmatpush.bf16.msrb.mxu3 %v3231_v43  ;;  %v4694_v13 = vld [vmem:[#allocation8 + $0x1ec] sm:$0xf0]  ;;  %v3371_v16 = vor.u32 %v4662_v11, %v3370_v10  ;;  %v3354_v20 = vld [vmem:[#allocation8 + $0xc0] sm:$0xf]  ;;  %v3212_v30 = vld [vmem:[#allocation5 + $0xb8] sm:$0xf0] }
  0x35   :  { %412 = vmatpush.bf16.msra.mxu0 %v3139_v1  ;;  %v3499_v17 = vor.u32 %v4694_v13, %v3498_v12  ;;  %v4658_v21 = vld [vmem:[#allocation8 + $0xcc] sm:$0xf0]  ;;  %425 = vmatpush.bf16.msra.mxu1 %v3143_v9  ;;  %v3338_v32 = vld [vmem:[#allocation8 + $0xa0] sm:$0xf]  ;;  %v3215_v37 = vor.u32 %v4619_v29, %v3212_v30  ;;  %v4611_v40 = vld [vmem:[#allocation5 + $0x5c] sm:$0xf] }
  0x36   :  { %v4690_v22 = vld [vmem:[#allocation8 + $0x1cc] sm:$0xf0]  ;;  %v3355_v31 = vor.u32 %v4658_v21, %v3354_v20  ;;  %v3466_v35 = vld [vmem:[#allocation8 + $0x1a0] sm:$0xf]  ;;  %v3180_v41 = vld [vmem:[#allocation5 + $0x78] sm:$0xf0] }
  0x37   :  { %v3210_v26 = vld [vmem:[#allocation5 + $0x98] sm:$0xf]  ;;  %v3483_v28 = vor.u32 %v4690_v22, %v3482_v18  ;;  %v3322_v44 = vld [vmem:[#allocation8 + $0x80] sm:$0xf]  ;;  %v3183_v51 = vor.u32 %v4611_v40, %v3180_v41  ;;  %v3148_v54 = vld [vmem:[#allocation5 + $0x38] sm:$0xf0] }
  0x38   :  { %384 = vmatpush.bf16.msrb.mxu2 %v3195_v53  ;;  %397 = vmatpush.bf16.msrb.mxu3 %v3199_v56  ;;  %v4623_v27 = vld [vmem:[#allocation5 + $0xb4] sm:$0xf0]  ;;  %v3450_v49 = vld [vmem:[#allocation8 + $0x180] sm:$0xf]  ;;  %v4603_v53 = vld [vmem:[#allocation5 + $0x1c] sm:$0xf] }
  0x39   :  { %3252 = vmatmul.msk.bf16.vlgmr.msra.gmra.mxu0 %vm349_vm0, %v5275_v48  ;;  %2032 = vmatpush.bf16.msrb.mxu1 %v3499_v17  ;;  %v4654_v33 = vld [vmem:[#allocation8 + $0xac] sm:$0xf0]  ;;  %v3211_v34 = vor.u32 %v4623_v27, %v3210_v26  ;;  %v3306_v56 = vld [vmem:[#allocation8 + $0x60] sm:$0xf]  ;;  %s3105_s27 = sshll.u32 %s5203_s26, 4  ;;  %s3107_s29 = sshll.u32 %s5430_s9, 4  ;;  %s3106_s27 = int_to_ptr.vmem [resolvable:$true] %s3105_s27  ;;  %s3108_s29 = int_to_ptr.hbm [resolvable:$true] %s3107_s29 }
  0x3a   :  { %2019 = vmatpush.bf16.msrb.mxu0 %v3371_v16  ;;  %3253 = vmatmul.msk.bf16.vlgmr.msra.gmra.mxu1 %vm349_vm0, %v5275_v48  ;;  %v4686_v36 = vld [vmem:[#allocation8 + $0x1ac] sm:$0xf0]  ;;  %v3339_v42 = vor.u32 %v4654_v33, %v3338_v32  ;;  %v3626_v57 = vld [vmem:[#allocation8 + $0x2e0] sm:$0xf] }
  0x3b   :  { %v3178_v38 = vld [vmem:[#allocation5 + $0x58] sm:$0xf]  ;;  %v3467_v43 = vor.u32 %v4686_v36, %v3466_v35  ;;  %v3754_v61 = vld [vmem:[#allocation8 + $0x3e0] sm:$0xf] }
  0x3c   :  { %385 = vmatpush.bf16.msrb.mxu2 %v3163_v2  ;;  %398 = vmatpush.bf16.msrb.mxu3 %v3167_v6  ;;  %v4615_v39 = vld [vmem:[#allocation5 + $0x74] sm:$0xf0]  ;;  %v3434_v0 = vld [vmem:[#allocation8 + $0x160] sm:$0xf]  ;;  %v3151_v2 = vor.u32 %v4603_v53, %v3148_v54 }
  0x3d   :  { %2033 = vmatpush.bf16.msrb.mxu1 %v3483_v28  ;;  %v4650_v45 = vld [vmem:[#allocation8 + $0x8c] sm:$0xf0]  ;;  %v3179_v46 = vor.u32 %v4615_v39, %v3178_v38  ;;  %v3290_v6 = vld [vmem:[#allocation8 + $0x40] sm:$0xf] }
  0x3e   :  { %2020 = vmatpush.bf16.msrb.mxu0 %v3355_v31  ;;  %v3146_v47 = vld [vmem:[#allocation5 + $0x18] sm:$0xf]  ;;  %v3323_v55 = vor.u32 %v4650_v45, %v3322_v44  ;;  %v3610_v7 = vld [vmem:[#allocation8 + $0x2c0] sm:$0xf] }
  0x3f   :  { %v4682_v50 = vld [vmem:[#allocation8 + $0x18c] sm:$0xf0]  ;;  %v3738_v11 = vld [vmem:[#allocation8 + $0x3c0] sm:$0xf] }
  0x40   :  { %386 = vmatpush.bf16.msrb.mxu2 %v3131_v19  ;;  %399 = vmatpush.bf16.msrb.mxu3 %v3135_v23  ;;  %v4607_v52 = vld [vmem:[#allocation5 + $0x34] sm:$0xf0]  ;;  %v3451_v59 = vor.u32 %v4682_v50, %v3450_v49  ;;  %v3418_v13 = vld [vmem:[#allocation8 + $0x140] sm:$0xf] }
  0x41   :  { %v4726_v58 = vld [vmem:[#allocation8 + $0x2ec] sm:$0xf0]  ;;  %2034 = vmatpush.bf16.msrb.mxu1 %v3467_v43  ;;  %v3147_v63 = vor.u32 %v4607_v52, %v3146_v47  ;;  %v3274_v19 = vld [vmem:[#allocation8 + $0x20] sm:$0xf] }
  0x42   :  { %2021 = vmatpush.bf16.msrb.mxu0 %v3339_v42  ;;  %v4646_v60 = vld [vmem:[#allocation8 + $0x6c] sm:$0xf0]  ;;  %v3627_v3 = vor.u32 %v4726_v58, %v3626_v57  ;;  %v3402_v21 = vld [vmem:[#allocation8 + $0x120] sm:$0xf] }
  0x43   :  { %3250 = vmatmul.msk.bf16.vlgmr.msrb.gmra.mxu2 %vm349_vm0, %v5275_v48  ;;  %3251 = vmatmul.msk.bf16.vlgmr.msrb.gmra.mxu3 %vm349_vm0, %v5275_v48  ;;  %v4758_v62 = vld [vmem:[#allocation8 + $0x3ec] sm:$0xf0]  ;;  %v3307_v4 = vor.u32 %v4646_v60, %v3306_v56  ;;  %v3594_v23 = vld [vmem:[#allocation8 + $0x2a0] sm:$0xf] }
  0x44   :  { %435 = vmatpush.bf16.msra.mxu2 %v3243_v24  ;;  %448 = vmatpush.bf16.msra.mxu3 %v3247_v25  ;;  %v4678_v1 = vld [vmem:[#allocation8 + $0x16c] sm:$0xf0]  ;;  %v3755_v5 = vor.u32 %v4758_v62, %v3754_v61  ;;  %v3722_v25 = vld [vmem:[#allocation8 + $0x3a0] sm:$0xf] }
  0x45   :  { %v4722_v8 = vld [vmem:[#allocation8 + $0x2cc] sm:$0xf0]  ;;  %2035 = vmatpush.bf16.msrb.mxu1 %v3451_v59  ;;  %v3435_v9 = vor.u32 %v4678_v1, %v3434_v0  ;;  %v3258_v28 = vld [vmem:[#allocation8] sm:$0xf] }
  0x46   :  { %2022 = vmatpush.bf16.msrb.mxu0 %v3323_v55  ;;  %v4642_v10 = vld [vmem:[#allocation8 + $0x4c] sm:$0xf0]  ;;  %v3611_v15 = vor.u32 %v4722_v8, %v3610_v7  ;;  %v3386_v32 = vld [vmem:[#allocation8 + $0x100] sm:$0xf] }
  0x47   :  { %v4754_v12 = vld [vmem:[#allocation8 + $0x3cc] sm:$0xf0]  ;;  %v3291_v16 = vor.u32 %v4642_v10, %v3290_v6  ;;  %v3578_v35 = vld [vmem:[#allocation8 + $0x280] sm:$0xf] }
  0x48   :  { %436 = vmatpush.bf16.msra.mxu2 %v3211_v34  ;;  %449 = vmatpush.bf16.msra.mxu3 %v3215_v37  ;;  %v4674_v14 = vld [vmem:[#allocation8 + $0x14c] sm:$0xf0]  ;;  %v3739_v17 = vor.u32 %v4754_v12, %v3738_v11  ;;  %v3706_v37 = vld [vmem:[#allocation8 + $0x380] sm:$0xf] }
  0x49   :  { %2036 = vmatpush.bf16.msrb.mxu1 %v3435_v9  ;;  %v3419_v18 = vor.u32 %v4674_v14, %v3418_v13  ;;  %v4638_v20 = vld [vmem:[#allocation8 + $0x2c] sm:$0xf0]  ;;  %v3882_v39 = vld [vmem:[#allocation8 + $0x4e0] sm:$0xf] }
  0x4a   :  { %2023 = vmatpush.bf16.msrb.mxu0 %v3307_v4  ;;  %v4670_v22 = vld [vmem:[#allocation8 + $0x12c] sm:$0xf0]  ;;  %v3275_v27 = vor.u32 %v4638_v20, %v3274_v19  ;;  %v4010_v42 = vld [vmem:[#allocation8 + $0x5e0] sm:$0xf] }
  0x4b   :  { %v4718_v24 = vld [vmem:[#allocation8 + $0x2ac] sm:$0xf0]  ;;  %v3403_v29 = vor.u32 %v4670_v22, %v3402_v21  ;;  %v3866_v54 = vld [vmem:[#allocation8 + $0x4c0] sm:$0xf] }
  0x4c   :  { %437 = vmatpush.bf16.msra.mxu2 %v3179_v46  ;;  %450 = vmatpush.bf16.msra.mxu3 %v3183_v51  ;;  %v4750_v26 = vld [vmem:[#allocation8 + $0x3ac] sm:$0xf0]  ;;  %v3595_v30 = vor.u32 %v4718_v24, %v3594_v23  ;;  %v3562_v46 = vld [vmem:[#allocation8 + $0x260] sm:$0xf] }
  0x4d   :  { %2037 = vmatpush.bf16.msrb.mxu1 %v3419_v18  ;;  %v4634_v31 = vld [vmem:[#allocation8 + $0xc] sm:$0xf0]  ;;  %v3723_v34 = vor.u32 %v4750_v26, %v3722_v25  ;;  %v3690_v51 = vld [vmem:[#allocation8 + $0x360] sm:$0xf] }
  0x4e   :  { %2024 = vmatpush.bf16.msrb.mxu0 %v3291_v16  ;;  %v4666_v33 = vld [vmem:[#allocation8 + $0x10c] sm:$0xf0]  ;;  %v3259_v41 = vor.u32 %v4634_v31, %v3258_v28  ;;  %v3546_v60 = vld [vmem:[#allocation8 + $0x240] sm:$0xf] }
  0x4f   :  { %v4714_v36 = vld [vmem:[#allocation8 + $0x28c] sm:$0xf0]  ;;  %v3387_v44 = vor.u32 %v4666_v33, %v3386_v32  ;;  %v3674_v62 = vld [vmem:[#allocation8 + $0x340] sm:$0xf] }
  0x50   :  { %438 = vmatpush.bf16.msra.mxu2 %v3147_v63  ;;  %451 = vmatpush.bf16.msra.mxu3 %v3151_v2  ;;  %v4746_v38 = vld [vmem:[#allocation8 + $0x38c] sm:$0xf0]  ;;  %v3579_v45 = vor.u32 %v4714_v36, %v3578_v35  ;;  %v3850_v1 = vld [vmem:[#allocation8 + $0x4a0] sm:$0xf] }
  0x51   :  { %v4790_v40 = vld [vmem:[#allocation8 + $0x4ec] sm:$0xf0]  ;;  %2038 = vmatpush.bf16.msrb.mxu1 %v3403_v29  ;;  %v3707_v47 = vor.u32 %v4746_v38, %v3706_v37  ;;  %v3530_v8 = vld [vmem:[#allocation8 + $0x220] sm:$0xf] }
  0x52   :  { %2025 = vmatpush.bf16.msrb.mxu0 %v3275_v27  ;;  %v4822_v43 = vld [vmem:[#allocation8 + $0x5ec] sm:$0xf0]  ;;  %v3883_v49 = vor.u32 %v4790_v40, %v3882_v39  ;;  %v3658_v10 = vld [vmem:[#allocation8 + $0x320] sm:$0xf] }
  0x53   :  { %3254 = vmatmul.msk.bf16.vlgmr.msra.gmra.mxu2 %vm349_vm0, %v5275_v48  ;;  %3255 = vmatmul.msk.bf16.vlgmr.msra.gmra.mxu3 %vm349_vm0, %v5275_v48  ;;  %v4710_v50 = vld [vmem:[#allocation8 + $0x26c] sm:$0xf0]  ;;  %v4011_v53 = vor.u32 %v4822_v43, %v4010_v42  ;;  %v3994_v48 = vld [vmem:[#allocation8 + $0x5c0] sm:$0xf] }
  0x54   :  { %2045 = vmatpush.bf16.msrb.mxu2 %v3627_v3  ;;  %2058 = vmatpush.bf16.msrb.mxu3 %v3755_v5  ;;  %v4742_v52 = vld [vmem:[#allocation8 + $0x36c] sm:$0xf0]  ;;  %v3563_v57 = vor.u32 %v4710_v50, %v3562_v46  ;;  %v3978_v3 = vld [vmem:[#allocation8 + $0x5a0] sm:$0xf] }
  0x55   :  { %v4786_v55 = vld [vmem:[#allocation8 + $0x4cc] sm:$0xf0]  ;;  %2039 = vmatpush.bf16.msrb.mxu1 %v3387_v44  ;;  %v3691_v58 = vor.u32 %v4742_v52, %v3690_v51  ;;  %v3834_v13 = vld [vmem:[#allocation8 + $0x480] sm:$0xf] }
  0x56   :  { %2026 = vmatpush.bf16.msrb.mxu0 %v3259_v41  ;;  %v4818_v56 = vld [vmem:[#allocation8 + $0x5cc] sm:$0xf0]  ;;  %v3867_v59 = vor.u32 %v4786_v55, %v3866_v54  ;;  %v3514_v18 = vld [vmem:[#allocation8 + $0x200] sm:$0xf] }
  0x57   :  { %v4706_v61 = vld [vmem:[#allocation8 + $0x24c] sm:$0xf0]  ;;  %v3995_v63 = vor.u32 %v4818_v56, %v3994_v48  ;;  %v3642_v22 = vld [vmem:[#allocation8 + $0x300] sm:$0xf] }
  0x58   :  { %2046 = vmatpush.bf16.msrb.mxu2 %v3611_v15  ;;  %2059 = vmatpush.bf16.msrb.mxu3 %v3739_v17  ;;  %v4738_v0 = vld [vmem:[#allocation8 + $0x34c] sm:$0xf0]  ;;  %v3547_v5 = vor.u32 %v4706_v61, %v3546_v60  ;;  %v3962_v15 = vld [vmem:[#allocation8 + $0x580] sm:$0xf] }
  0x59   :  { %2084 = vmatpush.bf16.msra.mxu1 %v4011_v53  ;;  %v4782_v2 = vld [vmem:[#allocation8 + $0x4ac] sm:$0xf0]  ;;  %v3675_v6 = vor.u32 %v4738_v0, %v3674_v62  ;;  %v3818_v25 = vld [vmem:[#allocation8 + $0x460] sm:$0xf] }
  0x5a   :  { %2071 = vmatpush.bf16.msra.mxu0 %v3883_v49  ;;  %v4814_v4 = vld [vmem:[#allocation8 + $0x5ac] sm:$0xf0]  ;;  %v3851_v7 = vor.u32 %v4782_v2, %v3850_v1  ;;  %v3946_v27 = vld [vmem:[#allocation8 + $0x560] sm:$0xf] }
  0x5b   :  { %v4702_v9 = vld [vmem:[#allocation8 + $0x22c] sm:$0xf0]  ;;  %v3979_v11 = vor.u32 %v4814_v4, %v3978_v3  ;;  %v4138_v29 = vld [vmem:[#allocation8 + $0x6e0] sm:$0xf] }
  0x5c   :  { %2047 = vmatpush.bf16.msrb.mxu2 %v3595_v30  ;;  %2060 = vmatpush.bf16.msrb.mxu3 %v3723_v34  ;;  %v4734_v12 = vld [vmem:[#allocation8 + $0x32c] sm:$0xf0]  ;;  %v3531_v17 = vor.u32 %v4702_v9, %v3530_v8  ;;  %v4266_v32 = vld [vmem:[#allocation8 + $0x7e0] sm:$0xf] }
  0x5d   :  { %2085 = vmatpush.bf16.msra.mxu1 %v3995_v63  ;;  %v4778_v14 = vld [vmem:[#allocation8 + $0x48c] sm:$0xf0]  ;;  %v3659_v19 = vor.u32 %v4734_v12, %v3658_v10  ;;  %v3802_v38 = vld [vmem:[#allocation8 + $0x440] sm:$0xf] }
  0x5e   :  { %2072 = vmatpush.bf16.msra.mxu0 %v3867_v59  ;;  %v4810_v16 = vld [vmem:[#allocation8 + $0x58c] sm:$0xf0]  ;;  %v3835_v20 = vor.u32 %v4778_v14, %v3834_v13  ;;  %v3930_v40 = vld [vmem:[#allocation8 + $0x540] sm:$0xf] }
  0x5f   :  { %v4698_v21 = vld [vmem:[#allocation8 + $0x20c] sm:$0xf0]  ;;  %v3963_v24 = vor.u32 %v4810_v16, %v3962_v15  ;;  %v4122_v43 = vld [vmem:[#allocation8 + $0x6c0] sm:$0xf] }
  0x60   :  { %2048 = vmatpush.bf16.msrb.mxu2 %v3579_v45  ;;  %2061 = vmatpush.bf16.msrb.mxu3 %v3707_v47  ;;  %v4730_v23 = vld [vmem:[#allocation8 + $0x30c] sm:$0xf0]  ;;  %v3515_v31 = vor.u32 %v4698_v21, %v3514_v18  ;;  %v4250_v45 = vld [vmem:[#allocation8 + $0x7c0] sm:$0xf] }
  0x61   :  { %2086 = vmatpush.bf16.msra.mxu1 %v3979_v11  ;;  %v4774_v26 = vld [vmem:[#allocation8 + $0x46c] sm:$0xf0]  ;;  %v3643_v34 = vor.u32 %v4730_v23, %v3642_v22  ;;  %v3786_v52 = vld [vmem:[#allocation8 + $0x420] sm:$0xf] }
  0x62   :  { %2073 = vmatpush.bf16.msra.mxu0 %v3851_v7  ;;  %v4806_v28 = vld [vmem:[#allocation8 + $0x56c] sm:$0xf0]  ;;  %v3819_v35 = vor.u32 %v4774_v26, %v3818_v25  ;;  %v3914_v55 = vld [vmem:[#allocation8 + $0x520] sm:$0xf] }
  0x63   :  { %v4854_v30 = vld [vmem:[#allocation8 + $0x6ec] sm:$0xf0]  ;;  %v3947_v36 = vor.u32 %v4806_v28, %v3946_v27  ;;  %v4106_v56 = vld [vmem:[#allocation8 + $0x6a0] sm:$0xf] }
  0x64   :  { %2049 = vmatpush.bf16.msrb.mxu2 %v3563_v57  ;;  %2062 = vmatpush.bf16.msrb.mxu3 %v3691_v58  ;;  %v4886_v33 = vld [vmem:[#allocation8 + $0x7ec] sm:$0xf0]  ;;  %v4139_v37 = vor.u32 %v4854_v30, %v4138_v29  ;;  %v4234_v59 = vld [vmem:[#allocation8 + $0x7a0] sm:$0xf] }
  0x65   :  { %2087 = vmatpush.bf16.msra.mxu1 %v3963_v24  ;;  %v4770_v39 = vld [vmem:[#allocation8 + $0x44c] sm:$0xf0]  ;;  %v4267_v41 = vor.u32 %v4886_v33, %v4266_v32  ;;  %v3770_v63 = vld [vmem:[#allocation8 + $0x400] sm:$0xf] }
  0x66   :  { %2074 = vmatpush.bf16.msra.mxu0 %v3835_v20  ;;  %v4802_v42 = vld [vmem:[#allocation8 + $0x54c] sm:$0xf0]  ;;  %v3803_v47 = vor.u32 %v4770_v39, %v3802_v38  ;;  %v3898_v1 = vld [vmem:[#allocation8 + $0x500] sm:$0xf] }
  0x67   :  { %v4850_v44 = vld [vmem:[#allocation8 + $0x6cc] sm:$0xf0]  ;;  %v3931_v49 = vor.u32 %v4802_v42, %v3930_v40  ;;  %v4090_v4 = vld [vmem:[#allocation8 + $0x680] sm:$0xf]  ;;  %v3372_v42 = vld [vmem:[#allocation8 + $0xf0] sm:$0xf0] }
  0x68   :  { %2050 = vmatpush.bf16.msrb.mxu2 %v3547_v5  ;;  %2063 = vmatpush.bf16.msrb.mxu3 %v3675_v6  ;;  %v4882_v46 = vld [vmem:[#allocation8 + $0x7cc] sm:$0xf0]  ;;  %v4123_v50 = vor.u32 %v4850_v44, %v4122_v43  ;;  %v4218_v8 = vld [vmem:[#allocation8 + $0x780] sm:$0xf]  ;;  %v4692_v44 = vld [vmem:[#allocation8 + $0x1e4] sm:$0xf] }
  0x69   :  { %2088 = vmatpush.bf16.msra.mxu1 %v3947_v36  ;;  %v4251_v51 = vor.u32 %v4882_v46, %v4250_v45  ;;  %v4766_v53 = vld [vmem:[#allocation8 + $0x42c] sm:$0xf0]  ;;  %v4074_v11 = vld [vmem:[#allocation8 + $0x660] sm:$0xf]  ;;  %v3500_v45 = vld [vmem:[#allocation8 + $0x1f0] sm:$0xf0] }
  0x6a   :  { %2075 = vmatpush.bf16.msra.mxu0 %v3819_v35  ;;  %v3787_v54 = vor.u32 %v4766_v53, %v3786_v52  ;;  %v4798_v48 = vld [vmem:[#allocation8 + $0x52c] sm:$0xf0]  ;;  %v4202_v13 = vld [vmem:[#allocation8 + $0x760] sm:$0xf]  ;;  %v5293_v35 = vld [vmem:[#allocation7] sm:$0xff]  ;;  %v3503_v53 = vor.u32 %v4692_v44, %v3500_v45 }
  0x6b   :  { %v3915_v57 = vor.u32 %v4798_v48, %v3914_v55  ;;  %v4846_v58 = vld [vmem:[#allocation8 + $0x6ac] sm:$0xf0]  ;;  %v4042_v23 = vld [vmem:[#allocation8 + $0x620] sm:$0xf]  ;;  %v173_v36 = vperm.slane %v5293_v35, 0 }
  0x6c   :  { %2051 = vmatpush.bf16.msrb.mxu2 %v3531_v17  ;;  %2064 = vmatpush.bf16.msrb.mxu3 %v3659_v19  ;;  %v4878_v60 = vld [vmem:[#allocation8 + $0x7ac] sm:$0xf0]  ;;  %v4107_v61 = vor.u32 %v4846_v58, %v4106_v56  ;;  %v4058_v17 = vld [vmem:[#allocation8 + $0x640] sm:$0xf]  ;;  %v3356_v55 = vld [vmem:[#allocation8 + $0xd0] sm:$0xf0] }
  0x6d   :  { %2089 = vmatpush.bf16.msra.mxu1 %v3931_v49  ;;  %v4235_v62 = vor.u32 %v4878_v60, %v4234_v59  ;;  %v4762_v0 = vld [vmem:[#allocation8 + $0x40c] sm:$0xf0]  ;;  %v4186_v19 = vld [vmem:[#allocation8 + $0x740] sm:$0xf]  ;;  %v4688_v56 = vld [vmem:[#allocation8 + $0x1c4] sm:$0xf] }
  0x6e   :  { %2076 = vmatpush.bf16.msra.mxu0 %v3803_v47  ;;  %v3771_v2 = vor.u32 %v4762_v0, %v3770_v63  ;;  %v4794_v3 = vld [vmem:[#allocation8 + $0x50c] sm:$0xf0]  ;;  %v4170_v25 = vld [vmem:[#allocation8 + $0x720] sm:$0xf]  ;;  %v177_v58 = vperm.slane %v5293_v35, 4 }
  0x6f   :  { %v4842_v5 = vld [vmem:[#allocation8 + $0x68c] sm:$0xf0]  ;;  %v3899_v6 = vor.u32 %v4794_v3, %v3898_v1  ;;  %v4026_v29 = vld [vmem:[#allocation8 + $0x600] sm:$0xf]  ;;  %v4652_v0 = vld [vmem:[#allocation8 + $0xa4] sm:$0xf] }
  0x70   :  { %2052 = vmatpush.bf16.msrb.mxu2 %v3515_v31  ;;  %2065 = vmatpush.bf16.msrb.mxu3 %v3643_v34  ;;  %v4091_v7 = vor.u32 %v4842_v5, %v4090_v4  ;;  %v4874_v9 = vld [vmem:[#allocation8 + $0x78c] sm:$0xf0]  ;;  %v4154_v31 = vld [vmem:[#allocation8 + $0x700] sm:$0xf]  ;;  %v3340_v1 = vld [vmem:[#allocation8 + $0xb0] sm:$0xf0] }
  0x71   :  { %2090 = vmatpush.bf16.msra.mxu1 %v3915_v57  ;;  %v4219_v10 = vor.u32 %v4874_v9, %v4218_v8  ;;  %v4838_v12 = vld [vmem:[#allocation8 + $0x66c] sm:$0xf0]  ;;  %v3484_v57 = vld [vmem:[#allocation8 + $0x1d0] sm:$0xf0]  ;;  %v4672_v45 = vld [vmem:[#allocation8 + $0x144] sm:$0xf] }
  0x72   :  { %2077 = vmatpush.bf16.msra.mxu0 %v3787_v54  ;;  %v4075_v14 = vor.u32 %v4838_v12, %v4074_v11  ;;  %v4870_v15 = vld [vmem:[#allocation8 + $0x76c] sm:$0xf0]  ;;  %v4656_v54 = vld [vmem:[#allocation8 + $0xc4] sm:$0xf]  ;;  %v3487_v63 = vor.u32 %v4688_v56, %v3484_v57  ;;  %v3468_v3 = vld [vmem:[#allocation8 + $0x1b0] sm:$0xf0] }
  0x73   :  { %v4203_v16 = vor.u32 %v4870_v15, %v4202_v13  ;;  %v4834_v18 = vld [vmem:[#allocation8 + $0x64c] sm:$0xf0]  ;;  %v3359_v60 = vor.u32 %v4656_v54, %v3356_v55  ;;  %v4648_v11 = vld [vmem:[#allocation8 + $0x84] sm:$0xf]  ;;  %v3324_v12 = vld [vmem:[#allocation8 + $0x90] sm:$0xf0] }
  0x74   :  { %2097 = vmatpush.bf16.msra.mxu2 %v4139_v37  ;;  %2110 = vmatpush.bf16.msra.mxu3 %v4267_v41  ;;  %v4059_v20 = vor.u32 %v4834_v18, %v4058_v17  ;;  %v4866_v21 = vld [vmem:[#allocation8 + $0x74c] sm:$0xf0]  ;;  %v174_v37 = vperm.slane %v5293_v35, 1  ;;  %v4660_v41 = vld [vmem:[#allocation8 + $0xe4] sm:$0xf]  ;;  %v176_v13 = vperm.slane %v5293_v35, 3 }
  0x75   :  { %2091 = vmatpush.bf16.msra.mxu1 %v3899_v6  ;;  %v4187_v22 = vor.u32 %v4866_v21, %v4186_v19  ;;  %v4830_v24 = vld [vmem:[#allocation8 + $0x62c] sm:$0xf0]  ;;  %v3343_v6 = vor.u32 %v4652_v0, %v3340_v1  ;;  %v3452_v15 = vld [vmem:[#allocation8 + $0x190] sm:$0xf0]  ;;  %v3327_v19 = vor.u32 %v4648_v11, %v3324_v12  ;;  %v4636_v57 = vld [vmem:[#allocation8 + $0x24] sm:$0xf] }
  0x76   :  { %2078 = vmatpush.bf16.msra.mxu0 %v3771_v2  ;;  %v4862_v26 = vld [vmem:[#allocation8 + $0x72c] sm:$0xf0]  ;;  %v4043_v27 = vor.u32 %v4830_v24, %v4042_v23  ;;  %v4684_v2 = vld [vmem:[#allocation8 + $0x1a4] sm:$0xf]  ;;  %v3308_v24 = vld [vmem:[#allocation8 + $0x70] sm:$0xf0] }
  0x77   :  { %v4171_v28 = vor.u32 %v4862_v26, %v4170_v25  ;;  %v4826_v30 = vld [vmem:[#allocation8 + $0x60c] sm:$0xf0]  ;;  %v3471_v9 = vor.u32 %v4684_v2, %v3468_v3  ;;  %v4644_v23 = vld [vmem:[#allocation8 + $0x64] sm:$0xf]  ;;  %v3596_v0 = vld [vmem:[#allocation8 + $0x2b0] sm:$0xf0] }
  0x78   :  { %2098 = vmatpush.bf16.msra.mxu2 %v4123_v50  ;;  %2111 = vmatpush.bf16.msra.mxu3 %v4251_v51  ;;  %v4027_v32 = vor.u32 %v4826_v30, %v4026_v29  ;;  %v4858_v33 = vld [vmem:[#allocation8 + $0x70c] sm:$0xf0]  ;;  %v3375_v50 = vor.u32 %v4660_v41, %v3372_v42  ;;  %v4676_v25 = vld [vmem:[#allocation8 + $0x164] sm:$0xf]  ;;  %v3628_v29 = vld [vmem:[#allocation8 + $0x2f0] sm:$0xf0] }
  0x79   :  { %v4155_v34 = vor.u32 %v4858_v33, %v4154_v31  ;;  %v3756_v33 = vld [vmem:[#allocation8 + $0x3f0] sm:$0xf0]  ;;  %v4748_v1 = vld [vmem:[#allocation8 + $0x3a4] sm:$0xf]  ;;  %v179_v3 = vperm.slane %v5293_v35, 6 }
  0x7a   :  { %v3292_v41 = vld [vmem:[#allocation8 + $0x50] sm:$0xf0] }
  0x7b   :  { %v3724_v2 = vld [vmem:[#allocation8 + $0x3b0] sm:$0xf0] }
  0x7c   :  { %2099 = vmatpush.bf16.msra.mxu2 %v4107_v61  ;;  %2112 = vmatpush.bf16.msra.mxu3 %v4235_v62  ;;  %v178_v61 = vperm.slane %v5293_v35, 5  ;;  %v3727_v11 = vor.u32 %v4748_v1, %v3724_v2  ;;  %v3388_v12 = vld [vmem:[#allocation8 + $0x110] sm:$0xf0]  ;;  %v4700_v1 = vld [vmem:[#allocation8 + $0x224] sm:$0xf] }
  0x7d   :  { %v3532_v2 = vld [vmem:[#allocation8 + $0x230] sm:$0xf0] }
  0x80   :  { %2100 = vmatpush.bf16.msra.mxu2 %v4091_v7  ;;  %2113 = vmatpush.bf16.msra.mxu3 %v4219_v10  ;;  %v175_v10 = vperm.slane %v5293_v35, 2 }
  0x84   :  { %2101 = vmatpush.bf16.msra.mxu2 %v4075_v14  ;;  %2114 = vmatpush.bf16.msra.mxu3 %v4203_v16  ;;  %v4680_v14 = vld [vmem:[#allocation8 + $0x184] sm:$0xf] }
  0x88   :  { %2102 = vmatpush.bf16.msra.mxu2 %v4059_v20  ;;  %2115 = vmatpush.bf16.msra.mxu3 %v4187_v22  ;;  %v3455_v22 = vor.u32 %v4680_v14, %v3452_v15  ;;  %v3580_v14 = vld [vmem:[#allocation8 + $0x290] sm:$0xf0]  ;;  %v4744_v15 = vld [vmem:[#allocation8 + $0x384] sm:$0xf] }
  0x8c   :  { %2103 = vmatpush.bf16.msra.mxu2 %v4043_v27  ;;  %2116 = vmatpush.bf16.msra.mxu3 %v4171_v28  ;;  %v3436_v27 = vld [vmem:[#allocation8 + $0x170] sm:$0xf0]  ;;  %v4724_v28 = vld [vmem:[#allocation8 + $0x2e4] sm:$0xf] }
  0x90   :  { %2104 = vmatpush.bf16.msra.mxu2 %v4027_v32  ;;  %2117 = vmatpush.bf16.msra.mxu3 %v4155_v34  ;;  %v4756_v32 = vld [vmem:[#allocation8 + $0x3e4] sm:$0xf] }
  0x91   :  { %v3759_v44 = vor.u32 %v4756_v32, %v3756_v33  ;;  %v3692_v32 = vld [vmem:[#allocation8 + $0x370] sm:$0xf0] }
  0xb6   :  { %v362_v38 = vpop.f32.mrf.mxu2  ;;  %v375_v40 = vpop.f32.mrf.mxu3 }
  0xb7   :  { %v363_v39 = vadd.f32 %v362_v38, %v173_v36  ;;  %v376_v43 = vadd.f32 %v375_v40, %v174_v37  ;;  %v414_v46 = vpop.f32.mrf.mxu0  ;;  %v427_v51 = vpop.f32.mrf.mxu1  ;;  %v3311_v38 = vor.u32 %v4644_v23, %v3308_v24  ;;  %v4640_v40 = vld [vmem:[#allocation8 + $0x44] sm:$0xf] }
  0xb8   :  { %v415_v5 = vadd.f32 %v414_v46, %v177_v58  ;;  %v428_v7 = vadd.f32 %v427_v51, %v178_v61  ;;  %v3420_v46 = vld [vmem:[#allocation8 + $0x150] sm:$0xf0]  ;;  %v3295_v55 = vor.u32 %v4640_v40, %v3292_v41  ;;  %v4668_v61 = vld [vmem:[#allocation8 + $0x124] sm:$0xf] }
  0xb9   :  { %v457_v47 = vmax.f32 %v363_v39, 0.0  ;;  %v458_v49 = vmax.f32 %v376_v43, 0.0  ;;  %v3439_v39 = vor.u32 %v4676_v25, %v3436_v27  ;;  %v3631_v43 = vor.u32 %v4724_v28, %v3628_v29  ;;  %v3740_v51 = vld [vmem:[#allocation8 + $0x3d0] sm:$0xf0]  ;;  %v4708_v25 = vld [vmem:[#allocation8 + $0x264] sm:$0xf] }
  0xba   :  { %v461_v16 = vmax.f32 %v415_v5, 0.0  ;;  %v462_v18 = vmax.f32 %v428_v7, 0.0  ;;  %v3423_v56 = vor.u32 %v4672_v45, %v3420_v46  ;;  %v3276_v58 = vld [vmem:[#allocation8 + $0x30] sm:$0xf0]  ;;  %v4632_v7 = vld [vmem:[#allocation8 + $0x4] sm:$0xf] }
  0xbb   :  { %v5297_v52 = vpack.c.bf16 %v457_v47, %v457_v47  ;;  %v5299_v48 = vpack.c.bf16 %v458_v49, %v458_v49  ;;  %v4720_v47 = vld [vmem:[#allocation8 + $0x2c4] sm:$0xf]  ;;  %v3612_v49 = vld [vmem:[#allocation8 + $0x2d0] sm:$0xf0]  ;;  %v3279_v5 = vor.u32 %v4636_v57, %v3276_v58 }
  0xbc   :  { %v5307_v31 = vpack.c.bf16 %v461_v16, %v461_v16  ;;  %v5309_v36 = vpack.c.bf16 %v462_v18, %v462_v18  ;;  %v3708_v16 = vld [vmem:[#allocation8 + $0x390] sm:$0xf0]  ;;  %v4780_v57 = vld [vmem:[#allocation8 + $0x4a4] sm:$0xf] }
  0xbd   :  { %2027 = vmatmul.bf16.vlgmr.msrb.gmra.mxu0 %v5297_v52  ;;  %2040 = vmatmul.bf16.vlgmr.msrb.gmra.mxu1 %v5299_v48  ;;  %v3711_v28 = vor.u32 %v4744_v15, %v3708_v16  ;;  %v3564_v29 = vld [vmem:[#allocation8 + $0x270] sm:$0xf0]  ;;  %v4728_v15 = vld [vmem:[#allocation8 + $0x304] sm:$0xf] }
  0xbe   :  { %2123 = vmatpush.bf16.msrb.mxu0 %v3375_v50  ;;  %v364_v59 = vpop.f32.mrf.mxu2  ;;  %2136 = vmatpush.bf16.msrb.mxu1 %v3503_v53  ;;  %v377_v62 = vpop.f32.mrf.mxu3  ;;  %v4752_v50 = vld [vmem:[#allocation8 + $0x3c4] sm:$0xf]  ;;  %v3868_v40 = vld [vmem:[#allocation8 + $0x4d0] sm:$0xf0] }
  0xbf   :  { %v416_v4 = vpop.f32.mrf.mxu0  ;;  %v429_v8 = vpop.f32.mrf.mxu1  ;;  %v3615_v59 = vor.u32 %v4720_v47, %v3612_v49  ;;  %v3404_v62 = vld [vmem:[#allocation8 + $0x130] sm:$0xf0]  ;;  %v3567_v47 = vor.u32 %v4708_v25, %v3564_v29 }
  0xc0   :  { %v180_v4 = vperm.slane %v5293_v35, 7  ;;  %v3260_v8 = vld [vmem:[#allocation8 + $0x10] sm:$0xf0]  ;;  %v4820_v35 = vld [vmem:[#allocation8 + $0x5e4] sm:$0xf] }
  0xc1   :  { %v3263_v23 = vor.u32 %v4632_v7, %v3260_v8  ;;  %v3852_v58 = vld [vmem:[#allocation8 + $0x4b0] sm:$0xf0]  ;;  %v4776_v7 = vld [vmem:[#allocation8 + $0x484] sm:$0xf] }
  0xc2   :  { %2124 = vmatpush.bf16.msrb.mxu0 %v3359_v60  ;;  %2137 = vmatpush.bf16.msrb.mxu1 %v3487_v63  ;;  %v3743_v60 = vor.u32 %v4752_v50, %v3740_v51  ;;  %v4716_v63 = vld [vmem:[#allocation8 + $0x2a4] sm:$0xf]  ;;  %v3548_v51 = vld [vmem:[#allocation8 + $0x250] sm:$0xf0] }
  0xc3   :  { %v4704_v50 = vld [vmem:[#allocation8 + $0x244] sm:$0xf]  ;;  %v3836_v8 = vld [vmem:[#allocation8 + $0x490] sm:$0xf0] }
  0xc4   :  { %v3839_v16 = vor.u32 %v4776_v7, %v3836_v8  ;;  %v4268_v25 = vld [vmem:[#allocation8 + $0x7f0] sm:$0xf0]  ;;  %v4872_v7 = vld [vmem:[#allocation8 + $0x784] sm:$0xf] }
  0xc5   :  { %v4220_v8 = vld [vmem:[#allocation8 + $0x790] sm:$0xf0] }
  0xc6   :  { %2125 = vmatpush.bf16.msrb.mxu0 %v3343_v6  ;;  %v388_v17 = vpop.f32.mrf.mxu2  ;;  %2138 = vmatpush.bf16.msrb.mxu1 %v3471_v9  ;;  %v401_v21 = vpop.f32.mrf.mxu3  ;;  %v3407_v6 = vor.u32 %v4668_v61, %v3404_v62  ;;  %v4664_v9 = vld [vmem:[#allocation8 + $0x104] sm:$0xf] }
  0xc7   :  { %v389_v20 = vadd.f32 %v388_v17, %v175_v10  ;;  %v402_v26 = vadd.f32 %v401_v21, %v176_v13  ;;  %v3599_v10 = vor.u32 %v4716_v63, %v3596_v0  ;;  %v4712_v13 = vld [vmem:[#allocation8 + $0x284] sm:$0xf]  ;;  %v3391_v24 = vor.u32 %v4664_v9, %v3388_v12 }
  0xc8   :  { %v4788_v17 = vld [vmem:[#allocation8 + $0x4e4] sm:$0xf]  ;;  %v3583_v27 = vor.u32 %v4712_v13, %v3580_v14  ;;  %v3551_v63 = vor.u32 %v4704_v50, %v3548_v51  ;;  %v3516_v14 = vld [vmem:[#allocation8 + $0x210] sm:$0xf0] }
  0xc9   :  { %v459_v30 = vmax.f32 %v389_v20, 0.0  ;;  %v460_v34 = vmax.f32 %v402_v26, 0.0  ;;  %v4012_v20 = vld [vmem:[#allocation8 + $0x5f0] sm:$0xf0]  ;;  %v4808_v9 = vld [vmem:[#allocation8 + $0x584] sm:$0xf] }
  0xca   :  { %2126 = vmatpush.bf16.msrb.mxu0 %v3327_v19  ;;  %2139 = vmatpush.bf16.msrb.mxu1 %v3455_v22  ;;  %v3884_v19 = vld [vmem:[#allocation8 + $0x4f0] sm:$0xf0]  ;;  %v4696_v13 = vld [vmem:[#allocation8 + $0x204] sm:$0xf] }
  0xcb   :  { %v5311_v37 = vpack.c.bf16 %v459_v30, %v459_v30  ;;  %v5313_v42 = vpack.c.bf16 %v460_v34, %v460_v34  ;;  %v4740_v30 = vld [vmem:[#allocation8 + $0x364] sm:$0xf]  ;;  %v3887_v34 = vor.u32 %v4788_v17, %v3884_v19  ;;  %v3788_v51 = vld [vmem:[#allocation8 + $0x430] sm:$0xf0] }
  0xcc   :  { %v3695_v49 = vor.u32 %v4740_v30, %v3692_v32  ;;  %v4772_v19 = vld [vmem:[#allocation8 + $0x464] sm:$0xf]  ;;  %v3804_v32 = vld [vmem:[#allocation8 + $0x450] sm:$0xf0] }
  0xcd   :  { %2053 = vmatmul.bf16.vlgmr.msrb.gmra.mxu2 %v5311_v37  ;;  %2079 = vmatmul.bf16.vlgmr.msra.gmra.mxu0 %v5307_v31  ;;  %v4768_v30 = vld [vmem:[#allocation8 + $0x444] sm:$0xf] }
  0xce   :  { %2066 = vmatmul.bf16.vlgmr.msrb.gmra.mxu3 %v5313_v42  ;;  %2092 = vmatmul.bf16.vlgmr.msra.gmra.mxu1 %v5309_v36  ;;  %v390_v53 = vpop.f32.mrf.mxu2  ;;  %v403_v54 = vpop.f32.mrf.mxu3  ;;  %v4764_v50 = vld [vmem:[#allocation8 + $0x424] sm:$0xf] }
  0xcf   :  { %2127 = vmatpush.bf16.msrb.mxu0 %v3311_v38  ;;  %2140 = vmatpush.bf16.msrb.mxu1 %v3439_v39  ;;  %v4015_v38 = vor.u32 %v4820_v35, %v4012_v20  ;;  %v4784_v39 = vld [vmem:[#allocation8 + $0x4c4] sm:$0xf]  ;;  %v3820_v35 = vld [vmem:[#allocation8 + $0x470] sm:$0xf0] }
  0xd0   :  { %2149 = vmatpush.bf16.msrb.mxu2 %v3631_v43  ;;  %2162 = vmatpush.bf16.msrb.mxu3 %v3759_v44  ;;  %v4816_v43 = vld [vmem:[#allocation8 + $0x5c4] sm:$0xf]  ;;  %v3996_v44 = vld [vmem:[#allocation8 + $0x5d0] sm:$0xf0]  ;;  %v3871_v53 = vor.u32 %v4784_v39, %v3868_v40 }
  0xd1   :  { %v3999_v54 = vor.u32 %v4816_v43, %v3996_v44  ;;  %v4804_v20 = vld [vmem:[#allocation8 + $0x564] sm:$0xf]  ;;  %v3932_v39 = vld [vmem:[#allocation8 + $0x550] sm:$0xf0] }
  0xd2   :  { %v4848_v40 = vld [vmem:[#allocation8 + $0x6c4] sm:$0xf]  ;;  %v4252_v44 = vld [vmem:[#allocation8 + $0x7d0] sm:$0xf0] }
  0xd3   :  { %2128 = vmatpush.bf16.msrb.mxu0 %v3295_v55  ;;  %2141 = vmatpush.bf16.msrb.mxu1 %v3423_v56  ;;  %v4736_v55 = vld [vmem:[#allocation8 + $0x344] sm:$0xf]  ;;  %v3676_v56 = vld [vmem:[#allocation8 + $0x350] sm:$0xf0] }
  0xd4   :  { %2150 = vmatpush.bf16.msrb.mxu2 %v3615_v59  ;;  %2163 = vmatpush.bf16.msrb.mxu3 %v3743_v60  ;;  %v4812_v59 = vld [vmem:[#allocation8 + $0x5a4] sm:$0xf]  ;;  %v3980_v60 = vld [vmem:[#allocation8 + $0x5b0] sm:$0xf0]  ;;  %v3679_v0 = vor.u32 %v4736_v55, %v3676_v56 }
  0xd5   :  { %v4880_v43 = vld [vmem:[#allocation8 + $0x7c4] sm:$0xf]  ;;  %v3916_v56 = vld [vmem:[#allocation8 + $0x530] sm:$0xf0] }
  0xd6   :  { %v440_v18 = vpop.f32.mrf.mxu2  ;;  %v453_v22 = vpop.f32.mrf.mxu3  ;;  %v4796_v55 = vld [vmem:[#allocation8 + $0x524] sm:$0xf] }
  0xd7   :  { %2129 = vmatpush.bf16.msrb.mxu0 %v3279_v5  ;;  %2142 = vmatpush.bf16.msrb.mxu1 %v3407_v6  ;;  %v441_v21 = vadd.f32 %v440_v18, %v179_v3  ;;  %v454_v26 = vadd.f32 %v453_v22, %v180_v4  ;;  %v3855_v3 = vor.u32 %v4780_v57, %v3852_v58  ;;  %v4732_v5 = vld [vmem:[#allocation8 + $0x324] sm:$0xf]  ;;  %v3660_v6 = vld [vmem:[#allocation8 + $0x330] sm:$0xf0] }
  0xd8   :  { %2151 = vmatpush.bf16.msrb.mxu2 %v3599_v10  ;;  %2164 = vmatpush.bf16.msrb.mxu3 %v3727_v11  ;;  %v3983_v4 = vor.u32 %v4812_v59, %v3980_v60  ;;  %v3964_v10 = vld [vmem:[#allocation8 + $0x590] sm:$0xf0]  ;;  %v3535_v11 = vor.u32 %v4700_v1, %v3532_v2  ;;  %v3663_v12 = vor.u32 %v4732_v5, %v3660_v6  ;;  %v4852_v22 = vld [vmem:[#allocation8 + $0x6e4] sm:$0xf] }
  0xd9   :  { %v463_v33 = vmax.f32 %v441_v21, 0.0  ;;  %v464_v41 = vmax.f32 %v454_v26, 0.0  ;;  %v3967_v17 = vor.u32 %v4808_v9, %v3964_v10  ;;  %v3644_v18 = vld [vmem:[#allocation8 + $0x310] sm:$0xf0]  ;;  %v3519_v26 = vor.u32 %v4696_v13, %v3516_v14  ;;  %v4844_v57 = vld [vmem:[#allocation8 + $0x6a4] sm:$0xf] }
  0xda   :  { %v3948_v21 = vld [vmem:[#allocation8 + $0x570] sm:$0xf0]  ;;  %v4876_v59 = vld [vmem:[#allocation8 + $0x7a4] sm:$0xf]  ;;  %v3378_v9 = vld [vmem:[#allocation8 + $0xe8] sm:$0xf] }
  0xdb   :  { %v5321_v45 = vpack.c.bf16 %v463_v33, %v463_v33  ;;  %2130 = vmatpush.bf16.msrb.mxu0 %v3263_v23  ;;  %2143 = vmatpush.bf16.msrb.mxu1 %v3391_v24  ;;  %v5323_v46 = vpack.c.bf16 %v464_v41, %v464_v41  ;;  %v4140_v23 = vld [vmem:[#allocation8 + $0x6f0] sm:$0xf0]  ;;  %v4884_v24 = vld [vmem:[#allocation8 + $0x7e4] sm:$0xf]  ;;  %v3951_v29 = vor.u32 %v4804_v20, %v3948_v21  ;;  %v4663_v10 = vld [vmem:[#allocation8 + $0xf4] sm:$0xf0] }
  0xdc   :  { %2152 = vmatpush.bf16.msrb.mxu2 %v3583_v27  ;;  %2165 = vmatpush.bf16.msrb.mxu3 %v3711_v28  ;;  %v3647_v27 = vor.u32 %v4728_v15, %v3644_v18  ;;  %v3823_v28 = vor.u32 %v4772_v19, %v3820_v35  ;;  %v4143_v33 = vor.u32 %v4852_v22, %v4140_v23  ;;  %v4124_v41 = vld [vmem:[#allocation8 + $0x6d0] sm:$0xf0]  ;;  %v4792_v1 = vld [vmem:[#allocation8 + $0x504] sm:$0xf]  ;;  %v3362_v22 = vld [vmem:[#allocation8 + $0xc8] sm:$0xf] }
  0xdd   :  { %2105 = vmatmul.bf16.vlgmr.msra.gmra.mxu2 %v5321_v45  ;;  %v4108_v58 = vld [vmem:[#allocation8 + $0x6b0] sm:$0xf0]  ;;  %v4840_v5 = vld [vmem:[#allocation8 + $0x684] sm:$0xf]  ;;  %v3379_v19 = vor.u32 %v4663_v10, %v3378_v9  ;;  %v4659_v23 = vld [vmem:[#allocation8 + $0xd4] sm:$0xf0] }
  0xde   :  { %2118 = vmatmul.bf16.vlgmr.msra.gmra.mxu3 %v5323_v46  ;;  %v442_v61 = vpop.f32.mrf.mxu2  ;;  %2131 = vmatmul.bf16.vlgmr.msrb.gmra.mxu0 %v5297_v52  ;;  %v455_v62 = vpop.f32.mrf.mxu3  ;;  %v4236_v60 = vld [vmem:[#allocation8 + $0x7b0] sm:$0xf0]  ;;  %v4111_v2 = vor.u32 %v4844_v57, %v4108_v58  ;;  %v4868_v20 = vld [vmem:[#allocation8 + $0x764] sm:$0xf]  ;;  %v3458_v57 = vld [vmem:[#allocation8 + $0x188] sm:$0xf] }
  0xdf   :  { %2175 = vmatpush.bf16.msra.mxu0 %v3887_v34  ;;  %2188 = vmatpush.bf16.msra.mxu1 %v4015_v38  ;;  %v4271_v34 = vor.u32 %v4884_v24, %v4268_v25  ;;  %v4800_v38 = vld [vmem:[#allocation8 + $0x544] sm:$0xf]  ;;  %v3791_v61 = vor.u32 %v4764_v50, %v3788_v51  ;;  %v3919_v62 = vor.u32 %v4796_v55, %v3916_v56  ;;  %v4092_v6 = vld [vmem:[#allocation8 + $0x690] sm:$0xf0]  ;;  %v3490_v24 = vld [vmem:[#allocation8 + $0x1c8] sm:$0xf] }
  0xe0   :  { %2144 = vmatmul.bf16.vlgmr.msrb.gmra.mxu1 %v5299_v48  ;;  %2153 = vmatpush.bf16.msrb.mxu2 %v3567_v47  ;;  %v3807_v47 = vor.u32 %v4768_v30, %v3804_v32  ;;  %v4095_v15 = vor.u32 %v4840_v5, %v4092_v6  ;;  %v4076_v18 = vld [vmem:[#allocation8 + $0x670] sm:$0xf0]  ;;  %v4691_v25 = vld [vmem:[#allocation8 + $0x1d4] sm:$0xf0]  ;;  %v3363_v30 = vor.u32 %v4659_v23, %v3362_v22  ;;  %v3330_v55 = vld [vmem:[#allocation8 + $0x88] sm:$0xf] }
  0xe1   :  { %2166 = vmatpush.bf16.msrb.mxu3 %v3695_v49  ;;  %v3935_v49 = vor.u32 %v4800_v38, %v3932_v39  ;;  %v4204_v21 = vld [vmem:[#allocation8 + $0x770] sm:$0xf0]  ;;  %v3491_v32 = vor.u32 %v4691_v25, %v3490_v24  ;;  %v3346_v38 = vld [vmem:[#allocation8 + $0xa8] sm:$0xf]  ;;  %v4655_v39 = vld [vmem:[#allocation8 + $0xb4] sm:$0xf0] }
  0xe2   :  { %v3347_v50 = vor.u32 %v4655_v39, %v3346_v38  ;;  %v4651_v56 = vld [vmem:[#allocation8 + $0x94] sm:$0xf0]  ;;  %v3442_v5 = vld [vmem:[#allocation8 + $0x168] sm:$0xf] }
  0xe3   :  { %2176 = vmatpush.bf16.msra.mxu0 %v3871_v53  ;;  %2189 = vmatpush.bf16.msra.mxu1 %v3999_v54  ;;  %v4127_v53 = vor.u32 %v4848_v40, %v4124_v41  ;;  %v4255_v54 = vor.u32 %v4880_v43, %v4252_v44  ;;  %v3474_v40 = vld [vmem:[#allocation8 + $0x1a8] sm:$0xf]  ;;  %v4687_v41 = vld [vmem:[#allocation8 + $0x1b4] sm:$0xf0] }
  0xe4   :  { %2154 = vmatpush.bf16.msrb.mxu2 %v3551_v63  ;;  %v4760_v63 = vld [vmem:[#allocation8 + $0x404] sm:$0xf]  ;;  %v3475_v51 = vor.u32 %v4687_v41, %v3474_v40  ;;  %v4683_v58 = vld [vmem:[#allocation8 + $0x194] sm:$0xf0]  ;;  %v3762_v9 = vld [vmem:[#allocation8 + $0x3e8] sm:$0xf] }
  0xe5   :  { %2167 = vmatpush.bf16.msrb.mxu3 %v3679_v0  ;;  %v3772_v0 = vld [vmem:[#allocation8 + $0x410] sm:$0xf0]  ;;  %v4679_v6 = vld [vmem:[#allocation8 + $0x174] sm:$0xf0]  ;;  %v3746_v22 = vld [vmem:[#allocation8 + $0x3c8] sm:$0xf] }
  0xe6   :  { %v3775_v13 = vor.u32 %v4760_v63, %v3772_v0  ;;  %v4856_v63 = vld [vmem:[#allocation8 + $0x704] sm:$0xf]  ;;  %v3331_v0 = vor.u32 %v4651_v56, %v3330_v55  ;;  %v4759_v10 = vld [vmem:[#allocation8 + $0x3f4] sm:$0xf0]  ;;  %v3730_v38 = vld [vmem:[#allocation8 + $0x3a8] sm:$0xf] }
  0xe7   :  { %2177 = vmatpush.bf16.msra.mxu0 %v3855_v3  ;;  %2190 = vmatpush.bf16.msra.mxu1 %v3983_v4  ;;  %v4239_v3 = vor.u32 %v4876_v59, %v4236_v60  ;;  %v3900_v4 = vld [vmem:[#allocation8 + $0x510] sm:$0xf0]  ;;  %v4755_v23 = vld [vmem:[#allocation8 + $0x3d4] sm:$0xf0]  ;;  %v3714_v55 = vld [vmem:[#allocation8 + $0x388] sm:$0xf] }
  0xe8   :  { %2155 = vmatpush.bf16.msrb.mxu2 %v3535_v11  ;;  %v3506_v11 = vld [vmem:[#allocation8 + $0x1e8] sm:$0xf]  ;;  %v3903_v14 = vor.u32 %v4792_v1, %v3900_v4  ;;  %v3459_v1 = vor.u32 %v4683_v58, %v3458_v57  ;;  %v4647_v4 = vld [vmem:[#allocation8 + $0x74] sm:$0xf0] }
  0xe9   :  { %2168 = vmatpush.bf16.msrb.mxu3 %v3663_v12  ;;  %v4695_v12 = vld [vmem:[#allocation8 + $0x1f4] sm:$0xf0]  ;;  %v3890_v57 = vld [vmem:[#allocation8 + $0x4e8] sm:$0xf] }
  0xea   :  { %v3507_v35 = vor.u32 %v4695_v12, %v3506_v11  ;;  %v4751_v39 = vld [vmem:[#allocation8 + $0x3b4] sm:$0xf0] }
  0xeb   :  { %2178 = vmatpush.bf16.msra.mxu0 %v3839_v16  ;;  %2191 = vmatpush.bf16.msra.mxu1 %v3967_v17  ;;  %v4223_v16 = vor.u32 %v4872_v7, %v4220_v8  ;;  %v4836_v17 = vld [vmem:[#allocation8 + $0x664] sm:$0xf]  ;;  %v3634_v7 = vld [vmem:[#allocation8 + $0x2e8] sm:$0xf]  ;;  %v4727_v8 = vld [vmem:[#allocation8 + $0x2f4] sm:$0xf0] }
  0xec   :  { %2156 = vmatpush.bf16.msrb.mxu2 %v3519_v26  ;;  %v4079_v26 = vor.u32 %v4836_v17, %v4076_v18  ;;  %v3635_v17 = vor.u32 %v4727_v8, %v3634_v7  ;;  %v3763_v18 = vor.u32 %v4759_v10, %v3762_v9  ;;  %v4747_v56 = vld [vmem:[#allocation8 + $0x394] sm:$0xf0]  ;;  %v3874_v7 = vld [vmem:[#allocation8 + $0x4c8] sm:$0xf] }
  0xed   :  { %2169 = vmatpush.bf16.msrb.mxu3 %v3647_v27  ;;  %v4207_v27 = vor.u32 %v4868_v20, %v4204_v21  ;;  %v3618_v20 = vld [vmem:[#allocation8 + $0x2c8] sm:$0xf]  ;;  %v4723_v21 = vld [vmem:[#allocation8 + $0x2d4] sm:$0xf0] }
  0xee   :  { %v4791_v58 = vld [vmem:[#allocation8 + $0x4f4] sm:$0xf0]  ;;  %v4002_v9 = vld [vmem:[#allocation8 + $0x5c8] sm:$0xf] }
  0xef   :  { %2179 = vmatpush.bf16.msra.mxu0 %v3823_v28  ;;  %2192 = vmatpush.bf16.msra.mxu1 %v3951_v29  ;;  %v4832_v28 = vld [vmem:[#allocation8 + $0x644] sm:$0xf]  ;;  %v4060_v29 = vld [vmem:[#allocation8 + $0x650] sm:$0xf0]  ;;  %v4787_v8 = vld [vmem:[#allocation8 + $0x4d4] sm:$0xf0] }
  0xf0   :  { %2201 = vmatpush.bf16.msra.mxu2 %v4143_v33  ;;  %2170 = vmatmul.bf16.vlgmr.msrb.gmra.mxu3 %v5313_v42  ;;  %v4864_v33 = vld [vmem:[#allocation8 + $0x744] sm:$0xf]  ;;  %v4063_v43 = vor.u32 %v4832_v28, %v4060_v29  ;;  %v3619_v28 = vor.u32 %v4723_v21, %v3618_v20  ;;  %v3747_v29 = vor.u32 %v4755_v23, %v3746_v22  ;;  %v4819_v10 = vld [vmem:[#allocation8 + $0x5d4] sm:$0xf0]  ;;  %v3986_v20 = vld [vmem:[#allocation8 + $0x5a8] sm:$0xf] }
  0xf1   :  { %2214 = vmatpush.bf16.msra.mxu3 %v4271_v34  ;;  %2157 = vmatmul.bf16.vlgmr.msrb.gmra.mxu2 %v5311_v37  ;;  %v4188_v34 = vld [vmem:[#allocation8 + $0x750] sm:$0xf0]  ;;  %v4815_v21 = vld [vmem:[#allocation8 + $0x5b4] sm:$0xf0] }
  0xf2   :  { %v4191_v44 = vor.u32 %v4864_v33, %v4188_v34  ;;  %v3602_v33 = vld [vmem:[#allocation8 + $0x2a8] sm:$0xf]  ;;  %v4719_v34 = vld [vmem:[#allocation8 + $0x2b4] sm:$0xf0] }
  0xf3   :  { %2180 = vmatpush.bf16.msra.mxu0 %v3807_v47  ;;  %2193 = vmatpush.bf16.msra.mxu1 %v3935_v49  ;;  %v4828_v47 = vld [vmem:[#allocation8 + $0x624] sm:$0xf]  ;;  %v4044_v49 = vld [vmem:[#allocation8 + $0x630] sm:$0xf0] }
  0xf4   :  { %2202 = vmatpush.bf16.msra.mxu2 %v4127_v53  ;;  %v4860_v53 = vld [vmem:[#allocation8 + $0x724] sm:$0xf]  ;;  %v4047_v59 = vor.u32 %v4828_v47, %v4044_v49  ;;  %v3394_v47 = vld [vmem:[#allocation8 + $0x108] sm:$0xf]  ;;  %v3603_v49 = vor.u32 %v4719_v34, %v3602_v33  ;;  %v4811_v34 = vld [vmem:[#allocation8 + $0x594] sm:$0xf0] }
  0xf5   :  { %2215 = vmatpush.bf16.msra.mxu3 %v4255_v54  ;;  %v4172_v54 = vld [vmem:[#allocation8 + $0x730] sm:$0xf0]  ;;  %v3970_v33 = vld [vmem:[#allocation8 + $0x588] sm:$0xf] }
  0xf6   :  { %v4175_v60 = vor.u32 %v4860_v53, %v4172_v54  ;;  %v3586_v53 = vld [vmem:[#allocation8 + $0x288] sm:$0xf]  ;;  %v4715_v54 = vld [vmem:[#allocation8 + $0x294] sm:$0xf0] }
  0xf7   :  { %2181 = vmatpush.bf16.msra.mxu0 %v3791_v61  ;;  %2194 = vmatpush.bf16.msra.mxu1 %v3919_v62  ;;  %v4824_v61 = vld [vmem:[#allocation8 + $0x604] sm:$0xf]  ;;  %v4028_v62 = vld [vmem:[#allocation8 + $0x610] sm:$0xf0] }
  0xf8   :  { %2203 = vmatpush.bf16.msra.mxu2 %v4111_v2  ;;  %v4156_v2 = vld [vmem:[#allocation8 + $0x710] sm:$0xf0]  ;;  %v4031_v11 = vor.u32 %v4824_v61, %v4028_v62 }
  0xf9   :  { %2216 = vmatpush.bf16.msra.mxu3 %v4239_v3  ;;  %v3314_v3 = vld [vmem:[#allocation8 + $0x68] sm:$0xf]  ;;  %v4159_v12 = vor.u32 %v4856_v63, %v4156_v2  ;;  %v3587_v63 = vor.u32 %v4715_v54, %v3586_v53  ;;  %v4711_v2 = vld [vmem:[#allocation8 + $0x274] sm:$0xf0] }
  0xfa   :  { %v3954_v53 = vld [vmem:[#allocation8 + $0x568] sm:$0xf]  ;;  %v4807_v54 = vld [vmem:[#allocation8 + $0x574] sm:$0xf0] }
  0xfb   :  { %2182 = vmatpush.bf16.msra.mxu0 %v3775_v13  ;;  %2195 = vmatpush.bf16.msra.mxu1 %v3903_v14  ;;  %v3315_v13 = vor.u32 %v4647_v4, %v3314_v3  ;;  %v3443_v14 = vor.u32 %v4679_v6, %v3442_v5  ;;  %v3891_v3 = vor.u32 %v4791_v58, %v3890_v57  ;;  %v3698_v5 = vld [vmem:[#allocation8 + $0x368] sm:$0xf]  ;;  %v4743_v6 = vld [vmem:[#allocation8 + $0x374] sm:$0xf0] }
  0xfc   :  { %2204 = vmatpush.bf16.msra.mxu2 %v4095_v15  ;;  %v3298_v15 = vld [vmem:[#allocation8 + $0x48] sm:$0xf]  ;;  %v4887_v58 = vld [vmem:[#allocation8 + $0x7f4] sm:$0xf0] }
  0xfd   :  { %2217 = vmatpush.bf16.msra.mxu3 %v4223_v16  ;;  %v4643_v16 = vld [vmem:[#allocation8 + $0x54] sm:$0xf0]  ;;  %v4274_v57 = vld [vmem:[#allocation8 + $0x7e8] sm:$0xf] }
  0xfe   :  { %2183 = vmatmul.bf16.vlgmr.msra.gmra.mxu0 %v5307_v31  ;;  %2196 = vmatmul.bf16.vlgmr.msra.gmra.mxu1 %v5309_v36  ;;  %v3299_v24 = vor.u32 %v4643_v16, %v3298_v15  ;;  %v3875_v15 = vor.u32 %v4787_v8, %v3874_v7  ;;  %v4003_v16 = vor.u32 %v4819_v10, %v4002_v9  ;;  %v4258_v7 = vld [vmem:[#allocation8 + $0x7c8] sm:$0xf]  ;;  %v4883_v8 = vld [vmem:[#allocation8 + $0x7d4] sm:$0xf0] }
  0xff   :  { %2227 = vmatpush.bf16.msrb.mxu0 %v3379_v19  ;;  %2240 = vmatpush.bf16.msrb.mxu1 %v3507_v35  ;;  %v3426_v19 = vld [vmem:[#allocation8 + $0x148] sm:$0xf]  ;;  %v4675_v35 = vld [vmem:[#allocation8 + $0x154] sm:$0xf0] }
 0x100   :  { %2205 = vmatpush.bf16.msra.mxu2 %v4079_v26  ;;  %v3427_v25 = vor.u32 %v4675_v35, %v3426_v19  ;;  %v3282_v26 = vld [vmem:[#allocation8 + $0x28] sm:$0xf]  ;;  %v4783_v35 = vld [vmem:[#allocation8 + $0x4b4] sm:$0xf0] }
 0x101   :  { %2218 = vmatpush.bf16.msra.mxu3 %v4207_v27  ;;  %v4639_v27 = vld [vmem:[#allocation8 + $0x34] sm:$0xf0]  ;;  %v3858_v19 = vld [vmem:[#allocation8 + $0x4a8] sm:$0xf] }
 0x102   :  { %v3283_v40 = vor.u32 %v4639_v27, %v3282_v26  ;;  %v3859_v26 = vor.u32 %v4783_v35, %v3858_v19  ;;  %v3987_v27 = vor.u32 %v4815_v21, %v3986_v20  ;;  %v4242_v19 = vld [vmem:[#allocation8 + $0x7a8] sm:$0xf]  ;;  %v4879_v35 = vld [vmem:[#allocation8 + $0x7b4] sm:$0xf0] }
 0x103   :  { %2228 = vmatpush.bf16.msrb.mxu0 %v3363_v30  ;;  %2241 = vmatpush.bf16.msrb.mxu1 %v3491_v32  ;;  %v3410_v30 = vld [vmem:[#allocation8 + $0x128] sm:$0xf]  ;;  %v4671_v32 = vld [vmem:[#allocation8 + $0x134] sm:$0xf0] }
 0x104   :  { %2206 = vmatpush.bf16.msra.mxu2 %v4063_v43  ;;  %v3411_v41 = vor.u32 %v4671_v32, %v3410_v30  ;;  %v3266_v43 = vld [vmem:[#allocation8 + $0x8] sm:$0xf]  ;;  %v4779_v32 = vld [vmem:[#allocation8 + $0x494] sm:$0xf0] }
 0x105   :  { %2219 = vmatpush.bf16.msra.mxu3 %v4191_v44  ;;  %v4635_v44 = vld [vmem:[#allocation8 + $0x14] sm:$0xf0]  ;;  %v3842_v30 = vld [vmem:[#allocation8 + $0x488] sm:$0xf] }
 0x106   :  { %v3267_v61 = vor.u32 %v4635_v44, %v3266_v43  ;;  %v3650_v43 = vld [vmem:[#allocation8 + $0x308] sm:$0xf]  ;;  %v3843_v44 = vor.u32 %v4779_v32, %v3842_v30  ;;  %v4875_v32 = vld [vmem:[#allocation8 + $0x794] sm:$0xf0] }
 0x107   :  { %2229 = vmatpush.bf16.msrb.mxu0 %v3347_v50  ;;  %2242 = vmatpush.bf16.msrb.mxu1 %v3475_v51  ;;  %v3731_v50 = vor.u32 %v4751_v39, %v3730_v38  ;;  %v4667_v51 = vld [vmem:[#allocation8 + $0x114] sm:$0xf0]  ;;  %v4226_v30 = vld [vmem:[#allocation8 + $0x788] sm:$0xf] }
 0x108   :  { %2207 = vmatpush.bf16.msra.mxu2 %v4047_v59  ;;  %v4018_v59 = vld [vmem:[#allocation8 + $0x5e8] sm:$0xf]  ;;  %v3395_v62 = vor.u32 %v4667_v51, %v3394_v47  ;;  %v3971_v47 = vor.u32 %v4811_v34, %v3970_v33  ;;  %v4775_v51 = vld [vmem:[#allocation8 + $0x474] sm:$0xf0]  ;;  %v4661_v33 = vld [vmem:[#allocation8 + $0xec] sm:$0xf] }
 0x109   :  { %2220 = vmatpush.bf16.msra.mxu3 %v4175_v60  ;;  %v4823_v60 = vld [vmem:[#allocation8 + $0x5f4] sm:$0xf0]  ;;  %v3380_v34 = vld [vmem:[#allocation8 + $0xf8] sm:$0xf0] }
 0x10a   :  { %v4019_v4 = vor.u32 %v4823_v60, %v4018_v59 }
 0x10b   :  { %2230 = vmatpush.bf16.msrb.mxu0 %v3331_v0  ;;  %2243 = vmatpush.bf16.msrb.mxu1 %v3459_v1  ;;  %v3715_v0 = vor.u32 %v4747_v56, %v3714_v55  ;;  %v3570_v1 = vld [vmem:[#allocation8 + $0x268] sm:$0xf]  ;;  %v4855_v56 = vld [vmem:[#allocation8 + $0x6f4] sm:$0xf0] }
 0x10c   :  { %2208 = vmatpush.bf16.msra.mxu2 %v4031_v11  ;;  %v3571_v11 = vor.u32 %v4711_v2, %v3570_v1  ;;  %v4146_v55 = vld [vmem:[#allocation8 + $0x6e8] sm:$0xf]  ;;  %v4275_v2 = vor.u32 %v4887_v58, %v4274_v57  ;;  %v4689_v57 = vld [vmem:[#allocation8 + $0x1cc] sm:$0xf]  ;;  %v3492_v58 = vld [vmem:[#allocation8 + $0x1d8] sm:$0xf0] }
 0x10d   :  { %2221 = vmatpush.bf16.msra.mxu3 %v4159_v12  ;;  %v3699_v12 = vor.u32 %v4743_v6, %v3698_v5  ;;  %v4147_v1 = vor.u32 %v4855_v56, %v4146_v55  ;;  %v4130_v5 = vld [vmem:[#allocation8 + $0x6c8] sm:$0xf]  ;;  %v4851_v6 = vld [vmem:[#allocation8 + $0x6d4] sm:$0xf0]  ;;  %v4657_v55 = vld [vmem:[#allocation8 + $0xcc] sm:$0xf] }
 0x10e   :  { %v3364_v56 = vld [vmem:[#allocation8 + $0xd8] sm:$0xf0] }
 0x10f   :  { %2231 = vmatpush.bf16.msrb.mxu0 %v3315_v13  ;;  %2244 = vmatpush.bf16.msrb.mxu1 %v3443_v14  ;;  %v3554_v13 = vld [vmem:[#allocation8 + $0x248] sm:$0xf]  ;;  %v4707_v14 = vld [vmem:[#allocation8 + $0x254] sm:$0xf0] }
 0x110   :  { %2253 = vmatpush.bf16.msrb.mxu2 %v3635_v17  ;;  %2222 = vmatmul.bf16.vlgmr.msra.gmra.mxu3 %v5323_v46  ;;  %v3682_v17 = vld [vmem:[#allocation8 + $0x348] sm:$0xf]  ;;  %v3555_v22 = vor.u32 %v4707_v14, %v3554_v13  ;;  %v4131_v13 = vor.u32 %v4851_v6, %v4130_v5  ;;  %v4259_v14 = vor.u32 %v4883_v8, %v4258_v7  ;;  %v3348_v6 = vld [vmem:[#allocation8 + $0xb8] sm:$0xf0]  ;;  %v4685_v7 = vld [vmem:[#allocation8 + $0x1ac] sm:$0xf] }
 0x111   :  { %2266 = vmatpush.bf16.msrb.mxu3 %v3763_v18  ;;  %2209 = vmatmul.bf16.vlgmr.msra.gmra.mxu2 %v5321_v45  ;;  %v4739_v18 = vld [vmem:[#allocation8 + $0x354] sm:$0xf0]  ;;  %v3476_v8 = vld [vmem:[#allocation8 + $0x1b8] sm:$0xf0] }
 0x112   :  { %v3683_v23 = vor.u32 %v4739_v18, %v3682_v17  ;;  %v4114_v17 = vld [vmem:[#allocation8 + $0x6a8] sm:$0xf]  ;;  %v4847_v18 = vld [vmem:[#allocation8 + $0x6b4] sm:$0xf0] }
 0x113   :  { %2232 = vmatpush.bf16.msrb.mxu0 %v3299_v24  ;;  %2245 = vmatpush.bf16.msrb.mxu1 %v3427_v25  ;;  %v3538_v24 = vld [vmem:[#allocation8 + $0x228] sm:$0xf]  ;;  %v4703_v25 = vld [vmem:[#allocation8 + $0x234] sm:$0xf0] }
 0x114   :  { %2254 = vmatpush.bf16.msrb.mxu2 %v3619_v28  ;;  %v3666_v28 = vld [vmem:[#allocation8 + $0x328] sm:$0xf]  ;;  %v3539_v38 = vor.u32 %v4703_v25, %v3538_v24  ;;  %v4115_v25 = vor.u32 %v4847_v18, %v4114_v17 }
 0x115   :  { %2267 = vmatpush.bf16.msrb.mxu3 %v3747_v29  ;;  %v4735_v29 = vld [vmem:[#allocation8 + $0x334] sm:$0xf0]  ;;  %v3906_v24 = vld [vmem:[#allocation8 + $0x508] sm:$0xf] }
 0x116   :  { %v3667_v39 = vor.u32 %v4735_v29, %v3666_v28  ;;  %v4098_v28 = vld [vmem:[#allocation8 + $0x688] sm:$0xf]  ;;  %v4843_v29 = vld [vmem:[#allocation8 + $0x694] sm:$0xf0] }
 0x117   :  { %2233 = vmatpush.bf16.msrb.mxu0 %v3283_v40  ;;  %2246 = vmatpush.bf16.msrb.mxu1 %v3411_v41  ;;  %v3522_v40 = vld [vmem:[#allocation8 + $0x208] sm:$0xf]  ;;  %v4699_v41 = vld [vmem:[#allocation8 + $0x214] sm:$0xf0] }
 0x118   :  { %2255 = vmatpush.bf16.msrb.mxu2 %v3603_v49  ;;  %v4731_v49 = vld [vmem:[#allocation8 + $0x314] sm:$0xf0]  ;;  %v3523_v59 = vor.u32 %v4699_v41, %v3522_v40  ;;  %v4178_v18 = vld [vmem:[#allocation8 + $0x728] sm:$0xf] }
 0x119   :  { %2268 = vmatpush.bf16.msrb.mxu3 %v3731_v50  ;;  %v3826_v50 = vld [vmem:[#allocation8 + $0x468] sm:$0xf]  ;;  %v3651_v60 = vor.u32 %v4731_v49, %v3650_v43  ;;  %v4099_v43 = vor.u32 %v4843_v29, %v4098_v28  ;;  %v4839_v49 = vld [vmem:[#allocation8 + $0x674] sm:$0xf0] }
 0x11a   :  { %v4162_v28 = vld [vmem:[#allocation8 + $0x708] sm:$0xf] }
 0x11b   :  { %2234 = vmatpush.bf16.msrb.mxu0 %v3267_v61  ;;  %2247 = vmatpush.bf16.msrb.mxu1 %v3395_v62  ;;  %v3827_v61 = vor.u32 %v4775_v51, %v3826_v50  ;;  %v3955_v62 = vor.u32 %v4807_v54, %v3954_v53  ;;  %v4210_v50 = vld [vmem:[#allocation8 + $0x768] sm:$0xf]  ;;  %v3383_v51 = vor.u32 %v4661_v33, %v3380_v34  ;;  %v4871_v54 = vld [vmem:[#allocation8 + $0x774] sm:$0xf0]  ;;  %v4645_v33 = vld [vmem:[#allocation8 + $0x6c] sm:$0xf] }
 0x11c   :  { %2256 = vmatpush.bf16.msrb.mxu2 %v3587_v63  ;;  %v3810_v63 = vld [vmem:[#allocation8 + $0x448] sm:$0xf]  ;;  %v3316_v34 = vld [vmem:[#allocation8 + $0x78] sm:$0xf0] }
 0x11d   :  { %2269 = vmatpush.bf16.msrb.mxu3 %v3715_v0  ;;  %v4771_v0 = vld [vmem:[#allocation8 + $0x454] sm:$0xf0] }
 0x11e   :  { %2235 = vmatmul.bf16.vlgmr.msrb.gmra.mxu0 %v5297_v52  ;;  %2248 = vmatmul.bf16.vlgmr.msrb.gmra.mxu1 %v5299_v48  ;;  %v3811_v9 = vor.u32 %v4771_v0, %v3810_v63  ;;  %v4835_v63 = vld [vmem:[#allocation8 + $0x654] sm:$0xf0]  ;;  %v4194_v0 = vld [vmem:[#allocation8 + $0x748] sm:$0xf] }
 0x11f   :  { %2279 = vmatpush.bf16.msra.mxu0 %v3891_v3  ;;  %2292 = vmatpush.bf16.msra.mxu1 %v4019_v4  ;;  %v3938_v3 = vld [vmem:[#allocation8 + $0x548] sm:$0xf]  ;;  %v4803_v4 = vld [vmem:[#allocation8 + $0x554] sm:$0xf0] }
 0x120   :  { %2257 = vmatpush.bf16.msrb.mxu2 %v3571_v11  ;;  %v3939_v10 = vor.u32 %v4803_v4, %v3938_v3  ;;  %v3794_v11 = vld [vmem:[#allocation8 + $0x428] sm:$0xf]  ;;  %v4867_v3 = vld [vmem:[#allocation8 + $0x754] sm:$0xf0]  ;;  %v4653_v4 = vld [vmem:[#allocation8 + $0xac] sm:$0xf] }
 0x121   :  { %2270 = vmatpush.bf16.msrb.mxu3 %v3699_v12  ;;  %v4767_v12 = vld [vmem:[#allocation8 + $0x434] sm:$0xf0] }
 0x122   :  { %v3795_v20 = vor.u32 %v4767_v12, %v3794_v11  ;;  %v4050_v12 = vld [vmem:[#allocation8 + $0x628] sm:$0xf] }
 0x123   :  { %2280 = vmatpush.bf16.msra.mxu0 %v3875_v15  ;;  %2293 = vmatpush.bf16.msra.mxu1 %v4003_v16  ;;  %v3922_v15 = vld [vmem:[#allocation8 + $0x528] sm:$0xf]  ;;  %v4799_v16 = vld [vmem:[#allocation8 + $0x534] sm:$0xf0] }
 0x124   :  { %2258 = vmatpush.bf16.msrb.mxu2 %v3555_v22  ;;  %v3923_v21 = vor.u32 %v4799_v16, %v3922_v15  ;;  %v3778_v22 = vld [vmem:[#allocation8 + $0x408] sm:$0xf]  ;;  %v3479_v15 = vor.u32 %v4685_v7, %v3476_v8  ;;  %v4669_v8 = vld [vmem:[#allocation8 + $0x12c] sm:$0xf] }
 0x125   :  { %2271 = vmatpush.bf16.msrb.mxu3 %v3683_v23  ;;  %v4763_v23 = vld [vmem:[#allocation8 + $0x414] sm:$0xf0] }
 0x126   :  { %v3779_v40 = vor.u32 %v4763_v23, %v3778_v22  ;;  %v3460_v22 = vld [vmem:[#allocation8 + $0x198] sm:$0xf0] }
 0x127   :  { %2281 = vmatpush.bf16.msra.mxu0 %v3859_v26  ;;  %2294 = vmatpush.bf16.msra.mxu1 %v3987_v27  ;;  %v4243_v26 = vor.u32 %v4879_v35, %v4242_v19  ;;  %v4795_v27 = vld [vmem:[#allocation8 + $0x514] sm:$0xf0]  ;;  %v4649_v35 = vld [vmem:[#allocation8 + $0x8c] sm:$0xf] }
 0x128   :  { %2259 = vmatpush.bf16.msrb.mxu2 %v3539_v38  ;;  %v4693_v38 = vld [vmem:[#allocation8 + $0x1ec] sm:$0xf]  ;;  %v3907_v41 = vor.u32 %v4795_v27, %v3906_v24  ;;  %v4863_v19 = vld [vmem:[#allocation8 + $0x734] sm:$0xf0] }
 0x129   :  { %2272 = vmatpush.bf16.msrb.mxu3 %v3667_v39  ;;  %v3508_v39 = vld [vmem:[#allocation8 + $0x1f8] sm:$0xf0]  ;;  %v4827_v27 = vld [vmem:[#allocation8 + $0x614] sm:$0xf0] }
 0x12a   :  { %v3511_v53 = vor.u32 %v4693_v38, %v3508_v39  ;;  %v4677_v38 = vld [vmem:[#allocation8 + $0x16c] sm:$0xf]  ;;  %v3444_v39 = vld [vmem:[#allocation8 + $0x178] sm:$0xf0] }
 0x12b   :  { %2282 = vmatpush.bf16.msra.mxu0 %v3843_v44  ;;  %2295 = vmatpush.bf16.msra.mxu1 %v3971_v47  ;;  %v4227_v44 = vor.u32 %v4875_v32, %v4226_v30  ;;  %v4082_v47 = vld [vmem:[#allocation8 + $0x668] sm:$0xf]  ;;  %v4859_v32 = vld [vmem:[#allocation8 + $0x714] sm:$0xf0] }
 0x12c   :  { %2260 = vmatpush.bf16.msrb.mxu2 %v3523_v59  ;;  %v5339_v59 = vld [vmem:[#allocation10] sm:$0xf] }
 0x12d   :  { %2273 = vmatpush.bf16.msrb.mxu3 %v3651_v60  ;;  %v4083_v60 = vor.u32 %v4839_v49, %v4082_v47  ;;  %v731_v5 = vperm.slane %v5339_v59, 0  ;;  %v4163_v49 = vor.u32 %v4859_v32, %v4162_v28  ;;  %v4789_v28 = vld [vmem:[#allocation8 + $0x4ec] sm:$0xf]  ;;  %v4020_v32 = vld [vmem:[#allocation8 + $0x5f8] sm:$0xf0] }
 0x12f   :  { %2283 = vmatpush.bf16.msra.mxu0 %v3827_v61  ;;  %2296 = vmatpush.bf16.msra.mxu1 %v3955_v62  ;;  %v4211_v61 = vor.u32 %v4871_v54, %v4210_v50  ;;  %v4066_v62 = vld [vmem:[#allocation8 + $0x648] sm:$0xf] }
 0x130   :  { %2305 = vmatpush.bf16.msra.mxu2 %v4147_v1  ;;  %2274 = vmatmul.bf16.vlgmr.msrb.gmra.mxu3 %v5313_v42  ;;  %v3367_v1 = vor.u32 %v4657_v55, %v3364_v56  ;;  %v4641_v55 = vld [vmem:[#allocation8 + $0x4c] sm:$0xf]  ;;  %v3300_v56 = vld [vmem:[#allocation8 + $0x58] sm:$0xf0] }
 0x131   :  { %2318 = vmatpush.bf16.msra.mxu3 %v4275_v2  ;;  %2261 = vmatmul.bf16.vlgmr.msrb.gmra.mxu2 %v5311_v37  ;;  %v3495_v2 = vor.u32 %v4689_v57, %v3492_v58 }
 0x133   :  { %2284 = vmatpush.bf16.msra.mxu0 %v3811_v9  ;;  %2297 = vmatpush.bf16.msra.mxu1 %v3939_v10  ;;  %v4067_v9 = vor.u32 %v4835_v63, %v4066_v62  ;;  %v4195_v10 = vor.u32 %v4867_v3, %v4194_v0  ;;  %v4721_v62 = vld [vmem:[#allocation8 + $0x2cc] sm:$0xf]  ;;  %v3620_v63 = vld [vmem:[#allocation8 + $0x2d8] sm:$0xf0] }
 0x134   :  { %2306 = vmatpush.bf16.msra.mxu2 %v4131_v13  ;;  %v4831_v13 = vld [vmem:[#allocation8 + $0x634] sm:$0xf0]  ;;  %v4753_v0 = vld [vmem:[#allocation8 + $0x3cc] sm:$0xf] }
 0x135   :  { %2319 = vmatpush.bf16.msra.mxu3 %v4259_v14  ;;  %v3351_v14 = vor.u32 %v4653_v4, %v3348_v6  ;;  %v4051_v24 = vor.u32 %v4831_v13, %v4050_v12  ;;  %v4637_v4 = vld [vmem:[#allocation8 + $0x2c] sm:$0xf]  ;;  %v3623_v6 = vor.u32 %v4721_v62, %v3620_v63  ;;  %v3732_v13 = vld [vmem:[#allocation8 + $0x3b8] sm:$0xf0] }
 0x136   :  { %v4749_v12 = vld [vmem:[#allocation8 + $0x3ac] sm:$0xf]  ;;  %v3556_v63 = vld [vmem:[#allocation8 + $0x258] sm:$0xf0] }
 0x137   :  { %2285 = vmatpush.bf16.msra.mxu0 %v3795_v20  ;;  %2298 = vmatpush.bf16.msra.mxu1 %v3923_v21  ;;  %v3332_v20 = vld [vmem:[#allocation8 + $0x98] sm:$0xf0]  ;;  %v4681_v21 = vld [vmem:[#allocation8 + $0x18c] sm:$0xf] }
 0x138   :  { %2307 = vmatpush.bf16.msra.mxu2 %v4115_v25  ;;  %v4179_v25 = vor.u32 %v4863_v19, %v4178_v18  ;;  %v3335_v29 = vor.u32 %v4649_v35, %v3332_v20  ;;  %v3463_v30 = vor.u32 %v4681_v21, %v3460_v22  ;;  %v4633_v18 = vld [vmem:[#allocation8 + $0xc] sm:$0xf]  ;;  %v3268_v19 = vld [vmem:[#allocation8 + $0x18] sm:$0xf0]  ;;  %v3735_v21 = vor.u32 %v4749_v12, %v3732_v13 }
 0x139   :  { %2320 = vmatpush.bf16.msra.mxu3 %v4243_v26  ;;  %v4034_v26 = vld [vmem:[#allocation8 + $0x608] sm:$0xf]  ;;  %v4665_v35 = vld [vmem:[#allocation8 + $0x10c] sm:$0xf]  ;;  %v3396_v22 = vld [vmem:[#allocation8 + $0x118] sm:$0xf0] }
 0x13a   :  { %v2028_v11 = vpop.f32.mrf.mxu0  ;;  %v2041_v17 = vpop.f32.mrf.mxu1  ;;  %v4035_v47 = vor.u32 %v4827_v27, %v4034_v26  ;;  %v4745_v26 = vld [vmem:[#allocation8 + $0x38c] sm:$0xf]  ;;  %v3716_v27 = vld [vmem:[#allocation8 + $0x398] sm:$0xf0] }
 0x13b   :  { %2286 = vmatpush.bf16.msra.mxu0 %v3779_v40  ;;  %2299 = vmatpush.bf16.msra.mxu1 %v3907_v41  ;;  %v2029_v16 = vadd.f32 %v2028_v11, %v731_v5  ;;  %v4725_v40 = vld [vmem:[#allocation8 + $0x2ec] sm:$0xf]  ;;  %v3636_v41 = vld [vmem:[#allocation8 + $0x2f8] sm:$0xf0] }
 0x13c   :  { %2308 = vmatpush.bf16.msra.mxu2 %v4099_v43  ;;  %v4757_v43 = vld [vmem:[#allocation8 + $0x3ec] sm:$0xf]  ;;  %v3639_v57 = vor.u32 %v4725_v40, %v3636_v41  ;;  %v3284_v5 = vld [vmem:[#allocation8 + $0x38] sm:$0xf0] }
 0x13d   :  { %2321 = vmatpush.bf16.msra.mxu3 %v4227_v44  ;;  %v5344_v23 = vadd.f32 %v2041_v17, %v2029_v16  ;;  %v3764_v44 = vld [vmem:[#allocation8 + $0x3f8] sm:$0xf0]  ;;  %v4709_v41 = vld [vmem:[#allocation8 + $0x26c] sm:$0xf] }
 0x13e   :  { %2287 = vmatmul.bf16.vlgmr.msra.gmra.mxu0 %v5307_v31  ;;  %2300 = vmatmul.bf16.vlgmr.msra.gmra.mxu1 %v5309_v36  ;;  %v3767_v58 = vor.u32 %v4757_v43, %v3764_v44  ;;  %v3604_v11 = vld [vmem:[#allocation8 + $0x2b8] sm:$0xf0]  ;;  %v4705_v62 = vld [vmem:[#allocation8 + $0x24c] sm:$0xf] }
 0x13f   :  { %2331 = vmatpush.bf16.msrb.mxu0 %v3383_v51  ;;  %2344 = vmatpush.bf16.msrb.mxu1 %v3511_v53  ;;  %v3319_v51 = vor.u32 %v4645_v33, %v3316_v34  ;;  %v3447_v53 = vor.u32 %v4677_v38, %v3444_v39  ;;  %v3271_v33 = vor.u32 %v4633_v18, %v3268_v19  ;;  %v3572_v43 = vld [vmem:[#allocation8 + $0x278] sm:$0xf0]  ;;  %v4733_v18 = vld [vmem:[#allocation8 + $0x32c] sm:$0xf] }
 0x140   :  { %2309 = vmatpush.bf16.msra.mxu2 %v4083_v60  ;;  %v4673_v60 = vld [vmem:[#allocation8 + $0x14c] sm:$0xf]  ;;  %v3399_v34 = vor.u32 %v4665_v35, %v3396_v22  ;;  %v3719_v39 = vor.u32 %v4745_v26, %v3716_v27  ;;  %v3540_v12 = vld [vmem:[#allocation8 + $0x238] sm:$0xf0] }
 0x141   :  { %2322 = vmatpush.bf16.msra.mxu3 %v4211_v61  ;;  %v3428_v61 = vld [vmem:[#allocation8 + $0x158] sm:$0xf0]  ;;  %v4697_v26 = vld [vmem:[#allocation8 + $0x20c] sm:$0xf] }
 0x142   :  { %v2030_v50 = vpop.f32.mrf.mxu0  ;;  %v2043_v54 = vpop.f32.mrf.mxu1  ;;  %v3431_v3 = vor.u32 %v4673_v60, %v3428_v61  ;;  %v3575_v60 = vor.u32 %v4709_v41, %v3572_v43  ;;  %v3668_v19 = vld [vmem:[#allocation8 + $0x338] sm:$0xf0]  ;;  %v4853_v41 = vld [vmem:[#allocation8 + $0x6ec] sm:$0xf] }
 0x143   :  { %2332 = vmatpush.bf16.msrb.mxu0 %v3367_v1  ;;  %2345 = vmatpush.bf16.msrb.mxu1 %v3495_v2  ;;  %v3748_v1 = vld [vmem:[#allocation8 + $0x3d8] sm:$0xf0]  ;;  %v3303_v2 = vor.u32 %v4641_v55, %v3300_v56  ;;  %v4741_v50 = vld [vmem:[#allocation8 + $0x36c] sm:$0xf]  ;;  %v3671_v22 = vor.u32 %v4733_v18, %v3668_v19 }
 0x144   :  { %2310 = vmatpush.bf16.msra.mxu2 %v4067_v9  ;;  %v3751_v7 = vor.u32 %v4753_v0, %v3748_v1  ;;  %v3412_v9 = vld [vmem:[#allocation8 + $0x138] sm:$0xf0]  ;;  %v4817_v56 = vld [vmem:[#allocation8 + $0x5cc] sm:$0xf] }
 0x145   :  { %2323 = vmatpush.bf16.msra.mxu3 %v4195_v10  ;;  %v4717_v10 = vld [vmem:[#allocation8 + $0x2ac] sm:$0xf]  ;;  %v3415_v16 = vor.u32 %v4669_v8, %v3412_v9  ;;  %v3876_v55 = vld [vmem:[#allocation8 + $0x4d8] sm:$0xf0]  ;;  %v3559_v8 = vor.u32 %v4705_v62, %v3556_v63 }
 0x146   :  { %v3607_v20 = vor.u32 %v4717_v10, %v3604_v11  ;;  %v4701_v11 = vld [vmem:[#allocation8 + $0x22c] sm:$0xf]  ;;  %v3844_v35 = vld [vmem:[#allocation8 + $0x498] sm:$0xf0] }
 0x147   :  { %2333 = vmatpush.bf16.msrb.mxu0 %v3351_v14  ;;  %2346 = vmatpush.bf16.msrb.mxu1 %v3479_v15  ;;  %v3287_v15 = vor.u32 %v4637_v4, %v3284_v5  ;;  %v4781_v4 = vld [vmem:[#allocation8 + $0x4ac] sm:$0xf]  ;;  %v3860_v5 = vld [vmem:[#allocation8 + $0x4b8] sm:$0xf0] }
 0x148   :  { %2311 = vmatpush.bf16.msra.mxu2 %v4051_v24  ;;  %v4713_v24 = vld [vmem:[#allocation8 + $0x28c] sm:$0xf]  ;;  %v3863_v13 = vor.u32 %v4781_v4, %v3860_v5  ;;  %v3524_v27 = vld [vmem:[#allocation8 + $0x218] sm:$0xf0] }
 0x149   :  { %2324 = vmatpush.bf16.msra.mxu3 %v4179_v25  ;;  %v3588_v25 = vld [vmem:[#allocation8 + $0x298] sm:$0xf0]  ;;  %v4801_v62 = vld [vmem:[#allocation8 + $0x54c] sm:$0xf] }
 0x14a   :  { %v5348_v14 = vpop.f32.mrf.mxu0  ;;  %v3591_v38 = vor.u32 %v4713_v24, %v3588_v25  ;;  %v4148_v43 = vld [vmem:[#allocation8 + $0x6f8] sm:$0xf0]  ;;  %v4877_v18 = vld [vmem:[#allocation8 + $0x7ac] sm:$0xf] }
 0x14b   :  { %2334 = vmatpush.bf16.msrb.mxu0 %v3335_v29  ;;  %2347 = vmatpush.bf16.msrb.mxu1 %v3463_v30  ;;  %v5350_v17 = vpop.f32.mrf.mxu1  ;;  %v3892_v29 = vld [vmem:[#allocation8 + $0x4f8] sm:$0xf0]  ;;  %v4821_v30 = vld [vmem:[#allocation8 + $0x5ec] sm:$0xf] }
 0x14c   :  { %2312 = vmatpush.bf16.msra.mxu2 %v4035_v47  ;;  %v3895_v44 = vor.u32 %v4789_v28, %v3892_v29  ;;  %v4023_v47 = vor.u32 %v4821_v30, %v4020_v32  ;;  %v4729_v28 = vld [vmem:[#allocation8 + $0x30c] sm:$0xf]  ;;  %v3652_v32 = vld [vmem:[#allocation8 + $0x318] sm:$0xf0] }
 0x14d   :  { %2325 = vmatpush.bf16.msra.mxu3 %v4163_v49  ;;  %v3940_v63 = vld [vmem:[#allocation8 + $0x558] sm:$0xf0] }
 0x14e   :  { %v4244_v19 = vld [vmem:[#allocation8 + $0x7b8] sm:$0xf0] }
 0x14f   :  { %2335 = vmatpush.bf16.msrb.mxu0 %v3319_v51  ;;  %2348 = vmatpush.bf16.msrb.mxu1 %v3447_v53  ;;  %v3700_v51 = vld [vmem:[#allocation8 + $0x378] sm:$0xf0]  ;;  %v4785_v53 = vld [vmem:[#allocation8 + $0x4cc] sm:$0xf] }
 0x150   :  { %2357 = vmatpush.bf16.msrb.mxu2 %v3639_v57  ;;  %2326 = vmatmul.bf16.vlgmr.msra.gmra.mxu3 %v5323_v46  ;;  %v5352_v40 = vpop.f32.mrf.mxu2  ;;  %v4004_v57 = vld [vmem:[#allocation8 + $0x5d8] sm:$0xf0]  ;;  %v3703_v61 = vor.u32 %v4741_v50, %v3700_v51  ;;  %v3879_v0 = vor.u32 %v4785_v53, %v3876_v55  ;;  %v3527_v50 = vor.u32 %v4697_v26, %v3524_v27  ;;  %v4793_v26 = vld [vmem:[#allocation8 + $0x50c] sm:$0xf] }
 0x151   :  { %2370 = vmatpush.bf16.msrb.mxu3 %v3767_v58  ;;  %2313 = vmatmul.bf16.vlgmr.msra.gmra.mxu2 %v5321_v45  ;;  %v5354_v49 = vpop.f32.mrf.mxu3  ;;  %v4007_v1 = vor.u32 %v4817_v56, %v4004_v57  ;;  %v3655_v51 = vor.u32 %v4729_v28, %v3652_v32  ;;  %v4769_v57 = vld [vmem:[#allocation8 + $0x44c] sm:$0xf]  ;;  %v4247_v28 = vor.u32 %v4877_v18, %v4244_v19  ;;  %v4228_v32 = vld [vmem:[#allocation8 + $0x798] sm:$0xf0] }
 0x152   :  { %v2082_v54 = vpop.f32.mrf.mxu0  ;;  %v4829_v19 = vld [vmem:[#allocation8 + $0x62c] sm:$0xf] }
 0x153   :  { %2336 = vmatpush.bf16.msrb.mxu0 %v3303_v2  ;;  %2349 = vmatpush.bf16.msrb.mxu1 %v3431_v3  ;;  %v2095_v58 = vpop.f32.mrf.mxu1  ;;  %v4737_v2 = vld [vmem:[#allocation8 + $0x34c] sm:$0xf]  ;;  %v3684_v3 = vld [vmem:[#allocation8 + $0x358] sm:$0xf0] }
 0x154   :  { %2358 = vmatpush.bf16.msrb.mxu2 %v3623_v6  ;;  %v4813_v6 = vld [vmem:[#allocation8 + $0x5ac] sm:$0xf]  ;;  %v3687_v9 = vor.u32 %v4737_v2, %v3684_v3  ;;  %v3812_v58 = vld [vmem:[#allocation8 + $0x458] sm:$0xf0] }
 0x155   :  { %2371 = vmatpush.bf16.msrb.mxu3 %v3751_v7  ;;  %v3988_v7 = vld [vmem:[#allocation8 + $0x5b8] sm:$0xf0]  ;;  %v4881_v2 = vld [vmem:[#allocation8 + $0x7cc] sm:$0xf] }
 0x156   :  { %v4260_v3 = vld [vmem:[#allocation8 + $0x7d8] sm:$0xf0] }
 0x157   :  { %2337 = vmatpush.bf16.msrb.mxu0 %v3287_v15  ;;  %2350 = vmatpush.bf16.msrb.mxu1 %v3415_v16  ;;  %v3991_v15 = vor.u32 %v4813_v6, %v3988_v7  ;;  %v3815_v6 = vor.u32 %v4769_v57, %v3812_v58  ;;  %v3943_v7 = vor.u32 %v4801_v62, %v3940_v63  ;;  %v4869_v57 = vld [vmem:[#allocation8 + $0x76c] sm:$0xf]  ;;  %v4212_v58 = vld [vmem:[#allocation8 + $0x778] sm:$0xf0]  ;;  %v4394_v62 = vld [vmem:[#allocation11 + $0xe0] sm:$0xf] }
 0x158   :  { %2359 = vmatpush.bf16.msrb.mxu2 %v3607_v20  ;;  %v2056_v10 = vpop.f32.mrf.mxu2  ;;  %v3972_v20 = vld [vmem:[#allocation8 + $0x598] sm:$0xf0]  ;;  %v4917_v63 = vld [vmem:[#allocation11 + $0xe4] sm:$0xf0] }
 0x159   :  { %2372 = vmatpush.bf16.msrb.mxu3 %v3735_v21  ;;  %v2069_v16 = vpop.f32.mrf.mxu3  ;;  %v3543_v21 = vor.u32 %v4701_v11, %v3540_v12  ;;  %v4263_v11 = vor.u32 %v4881_v2, %v4260_v3  ;;  %v4797_v12 = vld [vmem:[#allocation8 + $0x52c] sm:$0xf] }
 0x15a   :  { %v4116_v16 = vld [vmem:[#allocation8 + $0x6b8] sm:$0xf0] }
 0x15b   :  { %2338 = vmatpush.bf16.msrb.mxu0 %v3271_v33  ;;  %2351 = vmatpush.bf16.msrb.mxu1 %v3399_v34  ;;  %v5358_v24 = vpop.f32.mrf.mxu0  ;;  %v4773_v33 = vld [vmem:[#allocation8 + $0x46c] sm:$0xf]  ;;  %v3828_v34 = vld [vmem:[#allocation8 + $0x478] sm:$0xf0] }
 0x15c   :  { %2360 = vmatpush.bf16.msrb.mxu2 %v3591_v38  ;;  %v4805_v38 = vld [vmem:[#allocation8 + $0x56c] sm:$0xf]  ;;  %v3831_v53 = vor.u32 %v4773_v33, %v3828_v34  ;;  %v4338_v33 = vld [vmem:[#allocation11 + $0x70] sm:$0xf]  ;;  %v4903_v34 = vld [vmem:[#allocation11 + $0x74] sm:$0xf0] }
 0x15d   :  { %2373 = vmatpush.bf16.msrb.mxu3 %v3719_v39  ;;  %v5360_v25 = vpop.f32.mrf.mxu1  ;;  %v3956_v39 = vld [vmem:[#allocation8 + $0x578] sm:$0xf0] }
 0x15e   :  { %2339 = vmatmul.bf16.vlgmr.msrb.gmra.mxu0 %v5297_v52  ;;  %2352 = vmatmul.bf16.vlgmr.msrb.gmra.mxu1 %v5299_v48  ;;  %v4777_v52 = vld [vmem:[#allocation8 + $0x48c] sm:$0xf]  ;;  %v3959_v54 = vor.u32 %v4805_v38, %v3956_v39  ;;  %v4402_v38 = vld [vmem:[#allocation11 + $0xf0] sm:$0xf]  ;;  %v4919_v39 = vld [vmem:[#allocation11 + $0xf4] sm:$0xf0] }
 0x15f   :  { %2383 = vmatpush.bf16.msra.mxu0 %v3895_v44  ;;  %2396 = vmatpush.bf16.msra.mxu1 %v4023_v47  ;;  %v4809_v48 = vld [vmem:[#allocation8 + $0x58c] sm:$0xf]  ;;  %v3847_v29 = vor.u32 %v4777_v52, %v3844_v35  ;;  %v4276_v47 = vld [vmem:[#allocation8 + $0x7f8] sm:$0xf0] }
 0x160   :  { %2361 = vmatpush.bf16.msrb.mxu2 %v3575_v60  ;;  %v3975_v30 = vor.u32 %v4809_v48, %v3972_v20  ;;  %v4885_v44 = vld [vmem:[#allocation8 + $0x7ec] sm:$0xf]  ;;  %v5362_v55 = vpop.f32.mrf.mxu2  ;;  %v4151_v60 = vor.u32 %v4853_v41, %v4148_v43 }
 0x161   :  { %2374 = vmatpush.bf16.msrb.mxu3 %v3703_v61  ;;  %v5364_v56 = vpop.f32.mrf.mxu3  ;;  %v4279_v61 = vor.u32 %v4885_v44, %v4276_v47 }
 0x163   :  { %2384 = vmatpush.bf16.msra.mxu0 %v3879_v0  ;;  %2397 = vmatpush.bf16.msra.mxu1 %v4007_v1  ;;  %v4849_v0 = vld [vmem:[#allocation8 + $0x6cc] sm:$0xf]  ;;  %v4132_v1 = vld [vmem:[#allocation8 + $0x6d8] sm:$0xf0]  ;;  %v2134_v4 = vpop.f32.mrf.mxu0 }
 0x164   :  { %2362 = vmatpush.bf16.msrb.mxu2 %v3559_v8  ;;  %v4765_v8 = vld [vmem:[#allocation8 + $0x42c] sm:$0xf]  ;;  %v4135_v10 = vor.u32 %v4849_v0, %v4132_v1  ;;  %v4215_v1 = vor.u32 %v4869_v57, %v4212_v58  ;;  %v4298_v58 = vld [vmem:[#allocation11 + $0x20] sm:$0xf] }
 0x165   :  { %2375 = vmatpush.bf16.msrb.mxu3 %v3687_v9  ;;  %v2147_v5 = vpop.f32.mrf.mxu1  ;;  %v3796_v9 = vld [vmem:[#allocation8 + $0x438] sm:$0xf0]  ;;  %v4833_v4 = vld [vmem:[#allocation8 + $0x64c] sm:$0xf] }
 0x166   :  { %v3799_v52 = vor.u32 %v4765_v8, %v3796_v9  ;;  %v4068_v5 = vld [vmem:[#allocation8 + $0x658] sm:$0xf0]  ;;  %v4865_v8 = vld [vmem:[#allocation8 + $0x74c] sm:$0xf] }
 0x167   :  { %2385 = vmatpush.bf16.msra.mxu0 %v3863_v13  ;;  %2398 = vmatpush.bf16.msra.mxu1 %v3991_v15  ;;  %v3924_v13 = vld [vmem:[#allocation8 + $0x538] sm:$0xf0]  ;;  %v4845_v15 = vld [vmem:[#allocation8 + $0x6ac] sm:$0xf] }
 0x168   :  { %2363 = vmatpush.bf16.msrb.mxu2 %v3543_v21  ;;  %v3927_v35 = vor.u32 %v4797_v12, %v3924_v13  ;;  %v2108_v48 = vpop.f32.mrf.mxu2  ;;  %v4761_v21 = vld [vmem:[#allocation8 + $0x40c] sm:$0xf]  ;;  %v4119_v27 = vor.u32 %v4845_v15, %v4116_v16  ;;  %v4196_v9 = vld [vmem:[#allocation8 + $0x758] sm:$0xf0]  ;;  %v4386_v12 = vld [vmem:[#allocation11 + $0xd0] sm:$0xf]  ;;  %v2055_v15 = vadd.f32 %v5352_v40, %v5344_v23  ;;  %v4071_v16 = vor.u32 %v4833_v4, %v4068_v5 }
 0x169   :  { %2376 = vmatpush.bf16.msrb.mxu3 %v3671_v22  ;;  %v2121_v20 = vpop.f32.mrf.mxu3  ;;  %v3780_v22 = vld [vmem:[#allocation8 + $0x418] sm:$0xf0]  ;;  %v4199_v18 = vor.u32 %v4865_v8, %v4196_v9  ;;  %v732_v40 = vperm.slane %v5339_v59, 1  ;;  %v4354_v8 = vld [vmem:[#allocation11 + $0x90] sm:$0xf] }
 0x16a   :  { %v3783_v41 = vor.u32 %v4761_v21, %v3780_v22  ;;  %v4915_v13 = vld [vmem:[#allocation11 + $0xd4] sm:$0xf0]  ;;  %v4861_v20 = vld [vmem:[#allocation8 + $0x72c] sm:$0xf]  ;;  %v4314_v21 = vld [vmem:[#allocation11 + $0x40] sm:$0xf] }
 0x16b   :  { %2386 = vmatpush.bf16.msra.mxu0 %v3847_v29  ;;  %2399 = vmatpush.bf16.msra.mxu1 %v3975_v30  ;;  %v3908_v29 = vld [vmem:[#allocation8 + $0x518] sm:$0xf0]  ;;  %v4387_v48 = vor.u32 %v4915_v13, %v4386_v12  ;;  %v4378_v22 = vld [vmem:[#allocation11 + $0xc0] sm:$0xf]  ;;  %v4889_v12 = vld [vmem:[#allocation11 + $0x4] sm:$0xf0] }
 0x16c   :  { %2364 = vmatpush.bf16.msrb.mxu2 %v3527_v50  ;;  %v4100_v30 = vld [vmem:[#allocation8 + $0x698] sm:$0xf0]  ;;  %v3911_v43 = vor.u32 %v4793_v26, %v3908_v29  ;;  %v4837_v50 = vld [vmem:[#allocation8 + $0x66c] sm:$0xf]  ;;  %v4346_v13 = vld [vmem:[#allocation11 + $0x80] sm:$0xf] }
 0x16d   :  { %2377 = vmatpush.bf16.msrb.mxu3 %v3655_v51  ;;  %v4084_v51 = vld [vmem:[#allocation8 + $0x678] sm:$0xf0]  ;;  %v4913_v26 = vld [vmem:[#allocation11 + $0xc4] sm:$0xf0] }
 0x16e   :  { %v4087_v0 = vor.u32 %v4837_v50, %v4084_v51  ;;  %v2133_v50 = vadd.f32 %v5358_v24, %v732_v40  ;;  %v4907_v9 = vld [vmem:[#allocation11 + $0x94] sm:$0xf0]  ;;  %v4332_v40 = vld [vmem:[#allocation11 + $0x68] sm:$0xf0] }
 0x16f   :  { %2387 = vmatpush.bf16.msra.mxu0 %v3831_v53  ;;  %2400 = vmatpush.bf16.msra.mxu1 %v3959_v54  ;;  %v4339_v53 = vor.u32 %v4903_v34, %v4338_v33  ;;  %v4403_v54 = vor.u32 %v4919_v39, %v4402_v38  ;;  %v4036_v33 = vld [vmem:[#allocation8 + $0x618] sm:$0xf0]  ;;  %v4379_v38 = vor.u32 %v4913_v26, %v4378_v22  ;;  %v4857_v39 = vld [vmem:[#allocation8 + $0x70c] sm:$0xf]  ;;  %v4900_v22 = vld [vmem:[#allocation11 + $0x64] sm:$0xf] }
 0x170   :  { %2409 = vmatpush.bf16.msra.mxu2 %v4151_v60  ;;  %2378 = vmatmul.bf16.vlgmr.msrb.gmra.mxu3 %v5313_v42  ;;  %v4873_v42 = vld [vmem:[#allocation8 + $0x78c] sm:$0xf]  ;;  %v4330_v60 = vld [vmem:[#allocation11 + $0x60] sm:$0xf] }
 0x171   :  { %2422 = vmatpush.bf16.msra.mxu3 %v4279_v61  ;;  %2365 = vmatmul.bf16.vlgmr.msrb.gmra.mxu2 %v5311_v37  ;;  %v4841_v37 = vld [vmem:[#allocation8 + $0x68c] sm:$0xf]  ;;  %v4231_v47 = vor.u32 %v4873_v42, %v4228_v32  ;;  %v4458_v26 = vld [vmem:[#allocation11 + $0x160] sm:$0xf] }
 0x172   :  { %v4103_v44 = vor.u32 %v4841_v37, %v4100_v30  ;;  %v4901_v61 = vld [vmem:[#allocation11 + $0x64] sm:$0xf0] }
 0x173   :  { %2388 = vmatpush.bf16.msra.mxu0 %v3815_v6  ;;  %2401 = vmatpush.bf16.msra.mxu1 %v3943_v7  ;;  %v5370_v3 = vpop.f32.mrf.mxu3  ;;  %v4331_v6 = vor.u32 %v4901_v61, %v4330_v60  ;;  %v4395_v7 = vor.u32 %v4917_v63, %v4394_v62  ;;  %v4825_v32 = vld [vmem:[#allocation8 + $0x60c] sm:$0xf]  ;;  %v4362_v61 = vld [vmem:[#allocation11 + $0xa0] sm:$0xf] }
 0x174   :  { %2410 = vmatpush.bf16.msra.mxu2 %v4135_v10  ;;  %v5368_v2 = vpop.f32.mrf.mxu2  ;;  %v4322_v10 = vld [vmem:[#allocation11 + $0x50] sm:$0xf]  ;;  %v4039_v51 = vor.u32 %v4825_v32, %v4036_v33  ;;  %v4893_v60 = vld [vmem:[#allocation11 + $0x24] sm:$0xf0]  ;;  %v4335_v33 = vor.u32 %v4900_v22, %v4332_v40  ;;  %v4356_v22 = vld [vmem:[#allocation11 + $0x98] sm:$0xf0] }
 0x175   :  { %2423 = vmatpush.bf16.msra.mxu3 %v4263_v11  ;;  %v4899_v11 = vld [vmem:[#allocation11 + $0x54] sm:$0xf0]  ;;  %v4909_v62 = vld [vmem:[#allocation11 + $0xa4] sm:$0xf0]  ;;  %v4299_v4 = vor.u32 %v4893_v60, %v4298_v58  ;;  %v4316_v58 = vld [vmem:[#allocation11 + $0x48] sm:$0xf0] }
 0x176   :  { %v4363_v5 = vor.u32 %v4909_v62, %v4362_v61  ;;  %v4912_v61 = vld [vmem:[#allocation11 + $0xc4] sm:$0xf]  ;;  %v4380_v62 = vld [vmem:[#allocation11 + $0xc8] sm:$0xf0]  ;;  %v4921_v40 = vld [vmem:[#allocation11 + $0x104] sm:$0xf0] }
 0x177   :  { %2389 = vmatpush.bf16.msra.mxu0 %v3799_v52  ;;  %2402 = vmatpush.bf16.msra.mxu1 %v3927_v35  ;;  %v4052_v52 = vld [vmem:[#allocation8 + $0x638] sm:$0xf0]  ;;  %v4323_v35 = vor.u32 %v4899_v11, %v4322_v10  ;;  %v4355_v11 = vor.u32 %v4907_v9, %v4354_v8  ;;  %v4434_v8 = vld [vmem:[#allocation11 + $0x130] sm:$0xf] }
 0x178   :  { %2411 = vmatpush.bf16.msra.mxu2 %v4119_v27  ;;  %v2068_v27 = vadd.f32 %v5354_v49, %v2055_v15  ;;  %v4055_v29 = vor.u32 %v4829_v19, %v4052_v52  ;;  %v4164_v49 = vld [vmem:[#allocation8 + $0x718] sm:$0xf0]  ;;  %v4905_v15 = vld [vmem:[#allocation11 + $0x84] sm:$0xf0] }
 0x179   :  { %2424 = vmatpush.bf16.msra.mxu3 %v4247_v28  ;;  %v4935_v19 = vld [vmem:[#allocation11 + $0x174] sm:$0xf0] }
 0x17a   :  { %v2081_v59 = vadd.f32 %v5348_v14, %v2068_v27  ;;  %v2146_v14 = vadd.f32 %v5360_v25, %v2133_v50  ;;  %v4933_v27 = vld [vmem:[#allocation11 + $0x164] sm:$0xf0]  ;;  %v4927_v9 = vld [vmem:[#allocation11 + $0x134] sm:$0xf0] }
 0x17b   :  { %2390 = vmatpush.bf16.msra.mxu0 %v3783_v41  ;;  %2403 = vmatpush.bf16.msra.mxu1 %v3911_v43  ;;  %v5377_v28 = vpop.f32.mrf.mxu0  ;;  %v5379_v23 = vpop.f32.mrf.mxu1  ;;  %v4306_v41 = vld [vmem:[#allocation11 + $0x30] sm:$0xf]  ;;  %v4895_v43 = vld [vmem:[#allocation11 + $0x34] sm:$0xf0]  ;;  %v4929_v50 = vld [vmem:[#allocation11 + $0x144] sm:$0xf0] }
 0x17c   :  { %2412 = vmatpush.bf16.msra.mxu2 %v4103_v44  ;;  %v2160_v30 = vpop.f32.mrf.mxu2  ;;  %v2173_v42 = vpop.f32.mrf.mxu3  ;;  %v4370_v44 = vld [vmem:[#allocation11 + $0xb0] sm:$0xf]  ;;  %v2094_v63 = vadd.f32 %v5350_v17, %v2081_v59  ;;  %v2159_v10 = vadd.f32 %v5368_v2, %v2146_v14  ;;  %v4282_v17 = vld [vmem:[#allocation11] sm:$0xf]  ;;  %v4340_v2 = vld [vmem:[#allocation11 + $0x78] sm:$0xf0] }
 0x17d   :  { %2425 = vmatpush.bf16.msra.mxu3 %v4231_v47  ;;  %v4911_v47 = vld [vmem:[#allocation11 + $0xb4] sm:$0xf0] }
 0x17e   :  { %2391 = vmatmul.bf16.vlgmr.msra.gmra.mxu0 %v5307_v31  ;;  %2404 = vmatmul.bf16.vlgmr.msra.gmra.mxu1 %v5309_v36  ;;  %v4180_v31 = vld [vmem:[#allocation8 + $0x738] sm:$0xf0]  ;;  %v4897_v36 = vld [vmem:[#allocation11 + $0x44] sm:$0xf0]  ;;  %v4371_v57 = vor.u32 %v4911_v47, %v4370_v44  ;;  %v2107_v24 = vadd.f32 %v5362_v55, %v2094_v63  ;;  %v2172_v52 = vadd.f32 %v5370_v3, %v2159_v10  ;;  %v4396_v3 = vld [vmem:[#allocation11 + $0xe8] sm:$0xf0] }
 0x17f   :  { %2833 = vmatpush.bf16.msrb.mxu0 %v4339_v53  ;;  %2846 = vmatpush.bf16.msrb.mxu1 %v4403_v54  ;;  %v4183_v37 = vor.u32 %v4861_v20, %v4180_v31  ;;  %v4315_v34 = vor.u32 %v4897_v36, %v4314_v21  ;;  %v4167_v53 = vor.u32 %v4857_v39, %v4164_v49  ;;  %v4450_v39 = vld [vmem:[#allocation11 + $0x150] sm:$0xf]  ;;  %v4931_v49 = vld [vmem:[#allocation11 + $0x154] sm:$0xf0]  ;;  %v4914_v44 = vld [vmem:[#allocation11 + $0xd4] sm:$0xf] }
 0x180   :  { %2413 = vmatpush.bf16.msra.mxu2 %v4087_v0  ;;  %v4307_v54 = vor.u32 %v4895_v43, %v4306_v41  ;;  %v2120_v25 = vadd.f32 %v5364_v56, %v2107_v24  ;;  %v2185_v20 = vadd.f32 %v5377_v28, %v2172_v52  ;;  %v4283_v56 = vor.u32 %v4889_v12, %v4282_v17  ;;  %v4324_v43 = vld [vmem:[#allocation11 + $0x58] sm:$0xf0]  ;;  %v4910_v17 = vld [vmem:[#allocation11 + $0xb4] sm:$0xf]  ;;  %v4925_v12 = vld [vmem:[#allocation11 + $0x124] sm:$0xf0] }
 0x181   :  { %2426 = vmatpush.bf16.msra.mxu3 %v4215_v1  ;;  %v4347_v31 = vor.u32 %v4905_v15, %v4346_v13  ;;  %v4388_v47 = vld [vmem:[#allocation11 + $0xd8] sm:$0xf0]  ;;  %v4451_v59 = vor.u32 %v4931_v49, %v4450_v39  ;;  %v4364_v52 = vld [vmem:[#allocation11 + $0xa8] sm:$0xf0]  ;;  %v4932_v49 = vld [vmem:[#allocation11 + $0x164] sm:$0xf] }
 0x182   :  { %v2198_v30 = vadd.f32 %v5379_v23, %v2185_v20  ;;  %v4442_v23 = vld [vmem:[#allocation11 + $0x140] sm:$0xf]  ;;  %v4308_v10 = vld [vmem:[#allocation11 + $0x38] sm:$0xf0] }
 0x183   :  { %2834 = vmatpush.bf16.msrb.mxu0 %v4331_v6  ;;  %2847 = vmatpush.bf16.msrb.mxu1 %v4395_v7  ;;  %v2186_v0 = vpop.f32.mrf.mxu0  ;;  %v2199_v1 = vpop.f32.mrf.mxu1  ;;  %v4290_v6 = vld [vmem:[#allocation11 + $0x10] sm:$0xf]  ;;  %v4891_v7 = vld [vmem:[#allocation11 + $0x14] sm:$0xf0]  ;;  %v4443_v63 = vor.u32 %v4929_v50, %v4442_v23  ;;  %v4452_v23 = vld [vmem:[#allocation11 + $0x158] sm:$0xf0] }
 0x184   :  { %2414 = vmatpush.bf16.msra.mxu2 %v4071_v16  ;;  %v4291_v55 = vor.u32 %v4891_v7, %v4290_v6  ;;  %v4902_v16 = vld [vmem:[#allocation11 + $0x74] sm:$0xf]  ;;  %v4383_v6 = vor.u32 %v4912_v61, %v4380_v62 }
 0x185   :  { %2427 = vmatpush.bf16.msra.mxu3 %v4199_v18  ;;  %v4466_v18 = vld [vmem:[#allocation11 + $0x170] sm:$0xf]  ;;  %v4343_v21 = vor.u32 %v4902_v16, %v4340_v2  ;;  %v4894_v7 = vld [vmem:[#allocation11 + $0x34] sm:$0xf]  ;;  %v4892_v16 = vld [vmem:[#allocation11 + $0x24] sm:$0xf] }
 0x186   :  { %v4311_v13 = vor.u32 %v4894_v7, %v4308_v10  ;;  %v4926_v62 = vld [vmem:[#allocation11 + $0x134] sm:$0xf] }
 0x187   :  { %2835 = vmatpush.bf16.msrb.mxu0 %v4323_v35  ;;  %2848 = vmatpush.bf16.msrb.mxu1 %v4387_v48  ;;  %v4918_v35 = vld [vmem:[#allocation11 + $0xf4] sm:$0xf]  ;;  %v4467_v48 = vor.u32 %v4935_v19, %v4466_v18  ;;  %v4300_v18 = vld [vmem:[#allocation11 + $0x28] sm:$0xf0]  ;;  %v4908_v19 = vld [vmem:[#allocation11 + $0xa4] sm:$0xf] }
 0x188   :  { %2415 = vmatpush.bf16.msra.mxu2 %v4055_v29  ;;  %v4916_v29 = vld [vmem:[#allocation11 + $0xe4] sm:$0xf]  ;;  %v4303_v20 = vor.u32 %v4892_v16, %v4300_v18  ;;  %v4922_v10 = vld [vmem:[#allocation11 + $0x114] sm:$0xf] }
 0x189   :  { %2428 = vmatpush.bf16.msra.mxu3 %v4183_v37  ;;  %v4459_v37 = vor.u32 %v4933_v27, %v4458_v26  ;;  %v4410_v27 = vld [vmem:[#allocation11 + $0x100] sm:$0xf]  ;;  %v4920_v18 = vld [vmem:[#allocation11 + $0x104] sm:$0xf] }
 0x18b   :  { %2836 = vmatpush.bf16.msrb.mxu0 %v4315_v34  ;;  %2849 = vmatpush.bf16.msrb.mxu1 %v4379_v38  ;;  %v4399_v34 = vor.u32 %v4916_v29, %v4396_v3  ;;  %v4898_v38 = vld [vmem:[#allocation11 + $0x54] sm:$0xf]  ;;  %v4468_v3 = vld [vmem:[#allocation11 + $0x178] sm:$0xf0] }
 0x18c   :  { %2416 = vmatpush.bf16.msra.mxu2 %v4039_v51  ;;  %v4934_v29 = vld [vmem:[#allocation11 + $0x174] sm:$0xf] }
 0x18d   :  { %2429 = vmatpush.bf16.msra.mxu3 %v4167_v53  ;;  %v4327_v53 = vor.u32 %v4898_v38, %v4324_v43  ;;  %v4411_v38 = vor.u32 %v4921_v40, %v4410_v27  ;;  %v4471_v39 = vor.u32 %v4934_v29, %v4468_v3  ;;  %v4945_v27 = vld [vmem:[#allocation11 + $0x1c4] sm:$0xf0] }
 0x18f   :  { %2837 = vmatpush.bf16.msrb.mxu0 %v4307_v54  ;;  %2850 = vmatpush.bf16.msrb.mxu1 %v4371_v57  ;;  %v4391_v54 = vor.u32 %v4914_v44, %v4388_v47  ;;  %v4896_v57 = vld [vmem:[#allocation11 + $0x44] sm:$0xf] }
 0x190   :  { %2417 = vmatmul.bf16.vlgmr.msra.gmra.mxu2 %v5321_v45  ;;  %2430 = vmatmul.bf16.vlgmr.msra.gmra.mxu3 %v5323_v46  ;;  %v4404_v45 = vld [vmem:[#allocation11 + $0xf8] sm:$0xf0]  ;;  %v2435_v46 = vmax.f32 %v2120_v25, 0.0 }
 0x191   :  { %v4407_v36 = vor.u32 %v4918_v35, %v4404_v45  ;;  %2859 = vmatpush.bf16.msrb.mxu2 %v4467_v48  ;;  %v4372_v25 = vld [vmem:[#allocation11 + $0xb8] sm:$0xf0]  ;;  %v4418_v35 = vld [vmem:[#allocation11 + $0x110] sm:$0xf]  ;;  %v4923_v45 = vld [vmem:[#allocation11 + $0x114] sm:$0xf0] }
 0x192   :  { %v5394_v42 = vpack.c.bf16 %v2435_v46, %v2435_v46  ;;  %v4375_v15 = vor.u32 %v4910_v17, %v4372_v25  ;;  %v4419_v26 = vor.u32 %v4923_v45, %v4418_v35  ;;  %v4420_v17 = vld [vmem:[#allocation11 + $0x118] sm:$0xf0]  ;;  %v4530_v25 = vld [vmem:[#allocation11 + $0x1f0] sm:$0xf]  ;;  %v4522_v45 = vld [vmem:[#allocation11 + $0x1e0] sm:$0xf] }
 0x193   :  { %2838 = vmatpush.bf16.msrb.mxu0 %v4299_v4  ;;  %2851 = vmatpush.bf16.msrb.mxu1 %v4363_v5  ;;  %v2223_v32 = vpop.f32.mrf.mxu3  ;;  %v4319_v5 = vor.u32 %v4896_v57, %v4316_v58  ;;  %v4444_v57 = vld [vmem:[#allocation11 + $0x148] sm:$0xf0] }
 0x194   :  { %v2210_v28 = vpop.f32.mrf.mxu2 }
 0x195   :  { %v2211_v41 = vadd.f32 %v2210_v28, %v2198_v30  ;;  %2860 = vmatpush.bf16.msrb.mxu2 %v4459_v37  ;;  %v4888_v28 = vld [vmem:[#allocation11 + $0x4] sm:$0xf] }
 0x197   :  { %2839 = vmatpush.bf16.msrb.mxu0 %v4291_v55  ;;  %2852 = vmatpush.bf16.msrb.mxu1 %v4355_v11  ;;  %v2224_v51 = vadd.f32 %v2223_v32, %v2211_v41  ;;  %v4435_v55 = vor.u32 %v4927_v9, %v4434_v8  ;;  %v4426_v11 = vld [vmem:[#allocation11 + $0x120] sm:$0xf]  ;;  %v4284_v32 = vld [vmem:[#allocation11 + $0x8] sm:$0xf0]  ;;  %v4924_v8 = vld [vmem:[#allocation11 + $0x124] sm:$0xf] }
 0x198   :  { %v4427_v2 = vor.u32 %v4925_v12, %v4426_v11  ;;  %v4460_v41 = vld [vmem:[#allocation11 + $0x168] sm:$0xf0]  ;;  %v4287_v43 = vor.u32 %v4888_v28, %v4284_v32 }
 0x199   :  { %v2436_v60 = vmax.f32 %v2224_v51, 0.0  ;;  %2861 = vmatpush.bf16.msrb.mxu2 %v4451_v59  ;;  %v4463_v47 = vor.u32 %v4932_v49, %v4460_v41  ;;  %v4930_v59 = vld [vmem:[#allocation11 + $0x154] sm:$0xf]  ;;  %v4490_v49 = vld [vmem:[#allocation11 + $0x1a0] sm:$0xf] }
 0x19a   :  { %v4941_v41 = vld [vmem:[#allocation11 + $0x1a4] sm:$0xf0] }
 0x19b   :  { %2840 = vmatpush.bf16.msrb.mxu0 %v4283_v56  ;;  %2853 = vmatpush.bf16.msrb.mxu1 %v4347_v31  ;;  %v5397_v0 = vpack.c.bf16 %v2436_v60, %v2436_v60  ;;  %v5399_v1 = vpop.f32.mrf.mxu0  ;;  %v5401_v14 = vpop.f32.mrf.mxu1  ;;  %v4367_v56 = vor.u32 %v4908_v19, %v4364_v52  ;;  %v4890_v31 = vld [vmem:[#allocation11 + $0x14] sm:$0xf]  ;;  %v4412_v19 = vld [vmem:[#allocation11 + $0x108] sm:$0xf0] }
 0x19c   :  { %v2212_v24 = vpop.f32.mrf.mxu2  ;;  %v2225_v4 = vpop.f32.mrf.mxu3 }
 0x19d   :  { %2862 = vmatpush.bf16.msrb.mxu2 %v4443_v63  ;;  %v4436_v63 = vld [vmem:[#allocation11 + $0x138] sm:$0xf0] }
 0x19e   :  { %2841 = vmatmul.bf16.vlgmr.msrb.gmra.mxu0 %v5394_v42  ;;  %2854 = vmatmul.bf16.vlgmr.msrb.gmra.mxu1 %v5397_v0 }
 0x19f   :  { %2885 = vmatpush.bf16.msra.mxu0 %v4343_v21  ;;  %2898 = vmatpush.bf16.msra.mxu1 %v4407_v36  ;;  %v4292_v21 = vld [vmem:[#allocation11 + $0x18] sm:$0xf0]  ;;  %v4906_v36 = vld [vmem:[#allocation11 + $0x94] sm:$0xf] }
 0x1a0   :  { %v4295_v37 = vor.u32 %v4890_v31, %v4292_v21  ;;  %v4359_v30 = vor.u32 %v4906_v36, %v4356_v22 }
 0x1a1   :  { %2863 = vmatpush.bf16.msrb.mxu2 %v4435_v55  ;;  %v4951_v55 = vld [vmem:[#allocation11 + $0x1f4] sm:$0xf0] }
 0x1a3   :  { %2886 = vmatpush.bf16.msra.mxu0 %v4335_v33  ;;  %2899 = vmatpush.bf16.msra.mxu1 %v4399_v34  ;;  %v2238_v48 = vpop.f32.mrf.mxu0  ;;  %v2251_v46 = vpop.f32.mrf.mxu1  ;;  %v4904_v33 = vld [vmem:[#allocation11 + $0x84] sm:$0xf]  ;;  %v4348_v34 = vld [vmem:[#allocation11 + $0x88] sm:$0xf0] }
 0x1a4   :  { %v4351_v44 = vor.u32 %v4904_v33, %v4348_v34 }
 0x1a5   :  { %2864 = vmatpush.bf16.msrb.mxu2 %v4427_v2  ;;  %v4415_v2 = vor.u32 %v4920_v18, %v4412_v19 }
 0x1a7   :  { %2887 = vmatpush.bf16.msra.mxu0 %v4327_v53  ;;  %2900 = vmatpush.bf16.msra.mxu1 %v4391_v54  ;;  %v4455_v53 = vor.u32 %v4930_v59, %v4452_v23  ;;  %v4928_v54 = vld [vmem:[#allocation11 + $0x144] sm:$0xf]  ;;  %v4474_v23 = vld [vmem:[#allocation11 + $0x180] sm:$0xf] }
 0x1a8   :  { %v4447_v58 = vor.u32 %v4928_v54, %v4444_v57  ;;  %v4950_v54 = vld [vmem:[#allocation11 + $0x1f4] sm:$0xf]  ;;  %v4532_v57 = vld [vmem:[#allocation11 + $0x1f8] sm:$0xf0] }
 0x1a9   :  { %2865 = vmatpush.bf16.msrb.mxu2 %v4419_v26  ;;  %v4506_v26 = vld [vmem:[#allocation11 + $0x1c0] sm:$0xf] }
 0x1aa   :  { %v4507_v40 = vor.u32 %v4945_v27, %v4506_v26 }
 0x1ab   :  { %2888 = vmatpush.bf16.msra.mxu0 %v4319_v5  ;;  %2901 = vmatpush.bf16.msra.mxu1 %v4383_v6  ;;  %v4439_v5 = vor.u32 %v4926_v62, %v4436_v63  ;;  %v5406_v6 = vld [vmem:[#allocation10] sm:$0xf]  ;;  %v4524_v62 = vld [vmem:[#allocation11 + $0x1e8] sm:$0xf0] }
 0x1ac   :  { %v733_v7 = vperm.slane %v5406_v6, 2  ;;  %v734_v19 = vperm.slane %v5406_v6, 3 }
 0x1ad   :  { %2866 = vmatpush.bf16.msrb.mxu2 %v4411_v38 }
 0x1ae   :  { %v2237_v9 = vadd.f32 %v5399_v1, %v733_v7  ;;  %v4949_v1 = vld [vmem:[#allocation11 + $0x1e4] sm:$0xf0] }
 0x1af   :  { %2889 = vmatpush.bf16.msra.mxu0 %v4311_v13  ;;  %2902 = vmatpush.bf16.msra.mxu1 %v4375_v15  ;;  %v4531_v13 = vor.u32 %v4951_v55, %v4530_v25  ;;  %v4423_v15 = vor.u32 %v4922_v10, %v4420_v17  ;;  %v4523_v48 = vor.u32 %v4949_v1, %v4522_v45  ;;  %v4942_v10 = vld [vmem:[#allocation11 + $0x1b4] sm:$0xf]  ;;  %v4500_v17 = vld [vmem:[#allocation11 + $0x1b8] sm:$0xf0]  ;;  %v4936_v45 = vld [vmem:[#allocation11 + $0x184] sm:$0xf] }
 0x1b0   :  { %v2250_v16 = vadd.f32 %v5401_v14, %v2237_v9  ;;  %v4503_v25 = vor.u32 %v4942_v10, %v4500_v17  ;;  %v4963_v10 = vld [vmem:[#allocation13 + $0x58] sm:$0xff]  ;;  %v4962_v17 = vld [vmem:[#allocation13 + $0x50] sm:$0xff] }
 0x1b1   :  { %2911 = vmatpush.bf16.msra.mxu2 %v4471_v39  ;;  %2872 = vmatpush.bf16.msrb.mxu3 %v4531_v13  ;;  %v4492_v13 = vld [vmem:[#allocation11 + $0x1a8] sm:$0xf0] }
 0x1b3   :  { %2890 = vmatpush.bf16.msra.mxu0 %v4303_v20  ;;  %2903 = vmatpush.bf16.msra.mxu1 %v4367_v56  ;;  %v2275_v51 = vpop.f32.mrf.mxu3  ;;  %v4514_v20 = vld [vmem:[#allocation11 + $0x1d0] sm:$0xf]  ;;  %v4947_v56 = vld [vmem:[#allocation11 + $0x1d4] sm:$0xf0] }
 0x1b4   :  { %v2262_v50 = vpop.f32.mrf.mxu2  ;;  %v4515_v21 = vor.u32 %v4947_v56, %v4514_v20 }
 0x1b5   :  { %2912 = vmatpush.bf16.msra.mxu2 %v4463_v47  ;;  %v2263_v52 = vadd.f32 %v2262_v50, %v2250_v16  ;;  %2873 = vmatpush.bf16.msrb.mxu3 %v4523_v48  ;;  %v4939_v47 = vld [vmem:[#allocation11 + $0x194] sm:$0xf0]  ;;  %v4937_v50 = vld [vmem:[#allocation11 + $0x184] sm:$0xf0]  ;;  %v4476_v48 = vld [vmem:[#allocation11 + $0x188] sm:$0xf0] }
 0x1b6   :  { %v4479_v56 = vor.u32 %v4936_v45, %v4476_v48 }
 0x1b7   :  { %2891 = vmatpush.bf16.msra.mxu0 %v4295_v37  ;;  %2904 = vmatpush.bf16.msra.mxu1 %v4359_v30  ;;  %v2276_v35 = vadd.f32 %v2275_v51, %v2263_v52  ;;  %v4498_v37 = vld [vmem:[#allocation11 + $0x1b0] sm:$0xf]  ;;  %v4943_v30 = vld [vmem:[#allocation11 + $0x1b4] sm:$0xf0] }
 0x1b8   :  { %v4499_v34 = vor.u32 %v4943_v30, %v4498_v37 }
 0x1b9   :  { %2913 = vmatpush.bf16.msra.mxu2 %v4455_v53  ;;  %2874 = vmatpush.bf16.msrb.mxu3 %v4515_v21 }
 0x1bb   :  { %2892 = vmatpush.bf16.msra.mxu0 %v4287_v43  ;;  %2905 = vmatpush.bf16.msra.mxu1 %v4351_v44  ;;  %v2288_v60 = vpop.f32.mrf.mxu0  ;;  %v2301_v61 = vpop.f32.mrf.mxu1  ;;  %v4491_v43 = vor.u32 %v4941_v41, %v4490_v49  ;;  %v4482_v44 = vld [vmem:[#allocation11 + $0x190] sm:$0xf] }
 0x1bc   :  { %v2264_v24 = vpop.f32.mrf.mxu2  ;;  %v2277_v4 = vpop.f32.mrf.mxu3  ;;  %v2289_v46 = vadd.f32 %v2288_v60, %v2276_v35  ;;  %v4483_v59 = vor.u32 %v4939_v47, %v4482_v44  ;;  %v4535_v60 = vor.u32 %v4950_v54, %v4532_v57  ;;  %v4484_v35 = vld [vmem:[#allocation11 + $0x198] sm:$0xf0]  ;;  %v4958_v57 = vld [vmem:[#allocation13 + $0x30] sm:$0xff] }
 0x1bd   :  { %2914 = vmatpush.bf16.msra.mxu2 %v4447_v58  ;;  %2875 = vmatpush.bf16.msrb.mxu3 %v4507_v40  ;;  %v4475_v58 = vor.u32 %v4937_v50, %v4474_v23  ;;  %v4946_v24 = vld [vmem:[#allocation11 + $0x1d4] sm:$0xf]  ;;  %v4516_v4 = vld [vmem:[#allocation11 + $0x1d8] sm:$0xf0] }
 0x1be   :  { %2893 = vmatmul.bf16.vlgmr.msra.gmra.mxu0 %v5394_v42  ;;  %2906 = vmatmul.bf16.vlgmr.msra.gmra.mxu1 %v5397_v0  ;;  %v4428_v42 = vld [vmem:[#allocation11 + $0x128] sm:$0xf0]  ;;  %v2302_v31 = vadd.f32 %v2301_v61, %v2289_v46  ;;  %v4948_v61 = vld [vmem:[#allocation11 + $0x1e4] sm:$0xf]  ;;  %v4967_v54 = vld [vmem:[#allocation13 + $0x78] sm:$0xff] }
 0x1bf   :  { %v4431_v0 = vor.u32 %v4924_v8, %v4428_v42  ;;  %v4527_v63 = vor.u32 %v4948_v61, %v4524_v62  ;;  %v4944_v42 = vld [vmem:[#allocation11 + $0x1c4] sm:$0xf]  ;;  %3086 = vmatpush.bf16.msrb.mxu1 %v4967_v54 }
 0x1c0   :  { %v4956_v62 = vld [vmem:[#allocation13 + $0x20] sm:$0xff] }
 0x1c1   :  { %2915 = vmatpush.bf16.msra.mxu2 %v4439_v5  ;;  %2876 = vmatpush.bf16.msrb.mxu3 %v4499_v34  ;;  %v4519_v5 = vor.u32 %v4946_v24, %v4516_v4  ;;  %v4954_v4 = vld [vmem:[#allocation13 + $0x10] sm:$0xff] }
 0x1c3   :  { %v2290_v11 = vpop.f32.mrf.mxu0  ;;  %v2303_v12 = vpop.f32.mrf.mxu1 }
 0x1c4   :  { %v4940_v12 = vld [vmem:[#allocation11 + $0x1a4] sm:$0xf] }
 0x1c5   :  { %2916 = vmatpush.bf16.msra.mxu2 %v4431_v0  ;;  %2877 = vmatpush.bf16.msrb.mxu3 %v4491_v43  ;;  %v4508_v0 = vld [vmem:[#allocation11 + $0x1c8] sm:$0xf0]  ;;  %v4495_v18 = vor.u32 %v4940_v12, %v4492_v13 }
 0x1c6   :  { %v4511_v9 = vor.u32 %v4944_v42, %v4508_v0  ;;  %v4965_v42 = vld [vmem:[#allocation13 + $0x68] sm:$0xff]  ;;  %v4952_v0 = vld [vmem:[#allocation13] sm:$0xff] }
 0x1c9   :  { %2917 = vmatpush.bf16.msra.mxu2 %v4423_v15  ;;  %2878 = vmatpush.bf16.msrb.mxu3 %v4483_v59 }
 0x1cd   :  { %2918 = vmatpush.bf16.msra.mxu2 %v4415_v2  ;;  %2879 = vmatpush.bf16.msrb.mxu3 %v4475_v58  ;;  %v4938_v2 = vld [vmem:[#allocation11 + $0x194] sm:$0xf] }
 0x1ce   :  { %v4487_v1 = vor.u32 %v4938_v2, %v4484_v35  ;;  %v4966_v58 = vld [vmem:[#allocation13 + $0x70] sm:$0xff] }
 0x1cf   :  { %3087 = vmatpush.bf16.msrb.mxu1 %v4966_v58 }
 0x1d1   :  { %2924 = vmatpush.bf16.msra.mxu3 %v4535_v60  ;;  %v4957_v60 = vld [vmem:[#allocation13 + $0x28] sm:$0xff] }
 0x1d3   :  { %v2327_v22 = vpop.f32.mrf.mxu3  ;;  %3088 = vmatpush.bf16.msrb.mxu1 %v4965_v42 }
 0x1d4   :  { %v2314_v36 = vpop.f32.mrf.mxu2 }
 0x1d5   :  { %v2315_v14 = vadd.f32 %v2314_v36, %v2302_v31  ;;  %2925 = vmatpush.bf16.msra.mxu3 %v4527_v63  ;;  %v4955_v63 = vld [vmem:[#allocation13 + $0x18] sm:$0xff] }
 0x1d7   :  { %v2328_v29 = vadd.f32 %v2327_v22, %v2315_v14 }
 0x1d9   :  { %v2437_v3 = vmax.f32 %v2328_v29, 0.0  ;;  %2926 = vmatpush.bf16.msra.mxu3 %v4519_v5 }
 0x1db   :  { %v2441_v28 = vpack.c.bf16 %v2437_v3, %v2437_v3  ;;  %v2340_v32 = vpop.f32.mrf.mxu0  ;;  %v2353_v33 = vpop.f32.mrf.mxu1  ;;  %v2507_v3 = vld [vmem:[%s5427_s6] sm:$0x3] }
 0x1dc   :  { %v2316_v38 = vpop.f32.mrf.mxu2  ;;  %v2329_v39 = vpop.f32.mrf.mxu3  ;;  %v2341_v52 = vadd.f32 %v2340_v32, %v734_v19  ;;  %v2509_v34 = vperm.slane %v2507_v3, 0  ;;  %v2510_v43 = vperm.slane %v2507_v3, 1 }
 0x1dd   :  { %2867 = vmatmul.bf16.vlgmr.msrb.gmra.mxu2 %v2441_v28  ;;  %2927 = vmatpush.bf16.msra.mxu3 %v4511_v9  ;;  %v4964_v9 = vld [vmem:[#allocation13 + $0x60] sm:$0xff] }
 0x1de   :  { %v2354_v31 = vadd.f32 %v2353_v33, %v2341_v52  ;;  %3089 = vmatpush.bf16.msrb.mxu1 %v4964_v9 }
 0x1e1   :  { %2928 = vmatpush.bf16.msra.mxu3 %v4503_v25  ;;  %v4961_v25 = vld [vmem:[#allocation13 + $0x48] sm:$0xff] }
 0x1e2   :  { %3090 = vmatpush.bf16.msrb.mxu1 %v4963_v10 }
 0x1e3   :  { %v2342_v51 = vpop.f32.mrf.mxu0  ;;  %v2355_v53 = vpop.f32.mrf.mxu1 }
 0x1e4   :  { %v4959_v53 = vld [vmem:[#allocation13 + $0x38] sm:$0xff] }
 0x1e5   :  { %2929 = vmatpush.bf16.msra.mxu3 %v4495_v18  ;;  %3073 = vmatpush.bf16.msrb.mxu0 %v4959_v53 }
 0x1e6   :  { %3091 = vmatpush.bf16.msrb.mxu1 %v4962_v17 }
 0x1e9   :  { %2930 = vmatpush.bf16.msra.mxu3 %v4487_v1  ;;  %3074 = vmatpush.bf16.msrb.mxu0 %v4958_v57 }
 0x1ea   :  { %3092 = vmatpush.bf16.msrb.mxu1 %v4961_v25 }
 0x1ed   :  { %2919 = vmatmul.bf16.vlgmr.msra.gmra.mxu2 %v2441_v28  ;;  %2931 = vmatpush.bf16.msra.mxu3 %v4479_v56 }
 0x1ee   :  { %3075 = vmatpush.bf16.msrb.mxu0 %v4957_v60 }
 0x1f2   :  { %3076 = vmatpush.bf16.msrb.mxu0 %v4956_v62 }
 0x1f3   :  { %v2379_v8 = vpop.f32.mrf.mxu3 }
 0x1f4   :  { %v2366_v7 = vpop.f32.mrf.mxu2 }
 0x1f5   :  { %v2367_v21 = vadd.f32 %v2366_v7, %v2354_v31 }
 0x1f6   :  { %3077 = vmatpush.bf16.msrb.mxu0 %v4955_v63 }
 0x1f7   :  { %v2380_v36 = vadd.f32 %v2379_v8, %v2367_v21  ;;  %v4953_v8 = vld [vmem:[#allocation13 + $0x8] sm:$0xff] }
 0x1fa   :  { %3078 = vmatpush.bf16.msrb.mxu0 %v4954_v4 }
 0x1fb   :  { %v2392_v55 = vpop.f32.mrf.mxu0  ;;  %v2405_v11 = vpop.f32.mrf.mxu1 }
 0x1fc   :  { %v2368_v15 = vpop.f32.mrf.mxu2  ;;  %v2381_v16 = vpop.f32.mrf.mxu3  ;;  %v2393_v22 = vadd.f32 %v2392_v55, %v2380_v36  ;;  %v4960_v55 = vld [vmem:[#allocation13 + $0x40] sm:$0xff] }
 0x1fd   :  { %3093 = vmatpush.bf16.msrb.mxu1 %v4960_v55 }
 0x1fe   :  { %v2406_v14 = vadd.f32 %v2405_v11, %v2393_v22  ;;  %3079 = vmatpush.bf16.msrb.mxu0 %v4953_v8 }
 0x202   :  { %3080 = vmatpush.bf16.msrb.mxu0 %v4952_v0 }
 0x203   :  { %v2394_v46 = vpop.f32.mrf.mxu0  ;;  %v2407_v20 = vpop.f32.mrf.mxu1 }
 0x204   :  { %v4984_v20 = vld [vmem:[%s5429_s8] ss:$0 sm:$0xff] }
 0x213   :  { %v2418_v26 = vpop.f32.mrf.mxu2  ;;  %v2431_v27 = vpop.f32.mrf.mxu3 }
 0x214   :  { %v2419_v6 = vadd.f32 %v2418_v26, %v2406_v14 }
 0x216   :  { %v2432_v40 = vadd.f32 %v2431_v27, %v2419_v6 }
 0x218   :  { %v2438_v29 = vmax.f32 %v2432_v40, 0.0 }
 0x21a   :  { %v2442_v37 = vpack.c.bf16 %v2438_v29, %v2438_v29 }
 0x21b   :  { %v2842_v30 = vpop.f32.mrf.mxu0  ;;  %v2420_v28 = vpop.f32.mrf.mxu2 }
 0x21c   :  { %v2433_v32 = vpop.f32.mrf.mxu3  ;;  %2880 = vmatmul.bf16.vlgmr.msrb.gmra.mxu3 %v2442_v37  ;;  %v2843_v33 = vadd.f32 %v2842_v30, %v2509_v34  ;;  %v2855_v38 = vpop.f32.mrf.mxu1 }
 0x21e   :  { %v2856_v49 = vadd.f32 %v2855_v38, %v2843_v33 }
 0x223   :  { %v2844_v39 = vpop.f32.mrf.mxu0 }
 0x224   :  { %v2857_v41 = vpop.f32.mrf.mxu1 }
 0x22c   :  { %2932 = vmatmul.bf16.vlgmr.msra.gmra.mxu3 %v2442_v37 }
 0x23b   :  { %v2894_v44 = vpop.f32.mrf.mxu0  ;;  %v2907_v47 = vpop.f32.mrf.mxu1 }
 0x23c   :  { %v2895_v59 = vadd.f32 %v2894_v44, %v2510_v43 }
 0x23e   :  { %v2908_v23 = vadd.f32 %v2907_v47, %v2895_v59 }
 0x243   :  { %v2896_v50 = vpop.f32.mrf.mxu0  ;;  %v2909_v51 = vpop.f32.mrf.mxu1 }
 0x260   :  { %v2868_v61 = vpop.f32.mrf.mxu2 }
 0x261   :  { %v2869_v11 = vadd.f32 %v2868_v61, %v2856_v49 }
 0x268   :  { %v2870_v24 = vpop.f32.mrf.mxu2 }
 0x270   :  { %v2920_v5 = vpop.f32.mrf.mxu2 }
 0x271   :  { %v2921_v19 = vadd.f32 %v2920_v5, %v2908_v23 }
 0x278   :  { %v2922_v7 = vpop.f32.mrf.mxu2 }
 0x29f   :  { %v2881_v12 = vpop.f32.mrf.mxu3 }
 0x2a0   :  { %v2882_v13 = vadd.f32 %v2881_v12, %v2869_v11 }
 0x2a2   :  { %v2937_v15 = vmax.f32 %v2882_v13, 0.0 }
 0x2a4   :  { %v2939_v16 = vpack.c.bf16 %v2937_v15, %v2937_v15 }
 0x2a6   :  { %3081 = vmatmul.bf16.vlgmr.msrb.gmra.mxu0 %v2939_v16 }
 0x2a7   :  { %v2883_v18 = vpop.f32.mrf.mxu3 }
 0x2af   :  { %v2933_v52 = vpop.f32.mrf.mxu3 }
 0x2b0   :  { %v2934_v2 = vadd.f32 %v2933_v52, %v2921_v19 }
 0x2b2   :  { %v2938_v35 = vmax.f32 %v2934_v2, 0.0 }
 0x2b4   :  { %v2940_v45 = vpack.c.bf16 %v2938_v35, %v2938_v35 }
 0x2b6   :  { %3094 = vmatmul.bf16.vlgmr.msrb.gmra.mxu1 %v2940_v45 }
 0x2b7   :  { %v2935_v1 = vpop.f32.mrf.mxu3 }
 0x323   :  { %v3082_v48 = vpop.f32.mrf.mxu0 }
 0x324   :  { %v3083_v56 = vadd.f32 %v4984_v20, %v3082_v48 }
 0x32b   :  { %v3084_v46 = vpop.f32.mrf.mxu0 }
 0x333   :  { %v3095_v31 = vpop.f32.mrf.mxu1 }
 0x334   :  { %v3096_v21 = vadd.f32 %v3095_v31, %v3083_v56 }
 0x336   :  { %3099 = vst [vmem:[#allocation14] sm:$0x3] %v3096_v21 }
 0x337   :  { %3110 = dma.vmem_to_hbm [thread:$0]  %s3106_s27, 32, %s3108_s29, [#allocation4]  }
 0x33b   :  { %v3097_v36 = vpop.f32.mrf.mxu1 }
 0x33c   :  { %5186 = dma.done.wait [#allocation4], 32  }
 0x33d   :  { %5187 = vsyncadd [#allocation4], 4294967264 }
 0x33e   :  { %3115 = vsyncpa [#allocation3], 1 }
 0x33f   :  { %3116 = vsyncpa [#allocation6], 1 }
 0x340   :  { %3117 = vsyncpa [#allocation9], 1 }
 0x341   :  { %3118 = vsyncpa [#allocation12], 1 }
 0x342   :  { %3119 = vsyncpa [#allocation4], 1 }

// kernel: tpu_custom_call.1
= control target key start
LH: loop header
LB: loop body
LE: loop exit
PB: predicated region body
PF: predicated region fallthrough
CT: control target
= control target key end

     0   :  { %14 = vsyncpa [#allocation3], 0  ;;  %s5421_s0 = inlined_call_operand.hbm [shape: f32[2,64], index: 0, kind: input, shape index: {}]   ;;  %s5422_s1 = inlined_call_operand.hbm [shape: bf16[64,1024], index: 1, kind: input, shape index: {}]   ;;  %s5423_s2 = inlined_call_operand.hbm [shape: f32[1,1024], index: 2, kind: input, shape index: {}]   ;;  %s5424_s3 = inlined_call_operand.hbm [shape: bf16[1024,512], index: 3, kind: input, shape index: {}]   ;;  %s5425_s4 = inlined_call_operand.hbm [shape: f32[1,512], index: 4, kind: input, shape index: {}]   ;;  %s5426_s5 = inlined_call_operand.hbm [shape: bf16[512,256], index: 5, kind: input, shape index: {}]   ;;  %s5427_s6 = inlined_call_operand.vmem [shape: f32[1,256], index: 6, kind: input, shape index: {}]   ;;  %s5428_s7 = inlined_call_operand.hbm [shape: bf16[256,128], index: 7, kind: input, shape index: {}]   ;;  %s5429_s8 = inlined_call_operand.vmem [shape: f32[1,128], index: 8, kind: input, shape index: {}]   ;;  %s5430_s9 = inlined_call_operand.hbm [shape: f32[2,128], index: 9, kind: output, shape index: {}]  }
   0x1   :  { %15 = vsyncpa [#allocation6], 0 }
   0x2   :  { %16 = vsyncpa [#allocation9], 0 }
   0x3   :  { %17 = vsyncpa [#allocation12], 0  ;;  %s34_s11 = sshll.u32 %s5422_s1, 4  ;;  %s35_s11 = int_to_ptr.hbm [resolvable:$true] %s34_s11 }
   0x4   :  { %18 = vsyncpa [#allocation4], 0  ;;  %s5188_s12 = smov [#allocation5]   ;;  %s58_s16 = sshll.u32 %s5424_s3, 4  ;;  %s59_s16 = int_to_ptr.hbm [resolvable:$true] %s58_s16 }
   0x5   :  { %s36_s13 = sshll.u32 %s5188_s12, 4  ;;  %s5189_s17 = smov 512   ;;  %s37_s13 = int_to_ptr.vmem [resolvable:$true] %s36_s13 }
   0x6   :  { %s5190_s18 = smov 32   ;;  %s5191_s19 = smov [#allocation8]  }
   0x7   :  { %42 = dma.hbm_to_vmem [thread:$0]  %s35_s11, 4096, %s37_s13, [#allocation6], %s5189_s17, %s5189_s17, %s5190_s18  }
   0x8   :  { %s60_s20 = sshll.u32 %s5191_s19, 4  ;;  %s5192_s21 = smov 256   ;;  %s61_s20 = int_to_ptr.vmem [resolvable:$true] %s60_s20 }
   0x9   :  { %s5193_s22 = smov 16   ;;  %s82_s24 = sshll.u32 %s5426_s5, 4  ;;  %s83_s24 = int_to_ptr.hbm [resolvable:$true] %s82_s24 }
   0xa   :  { %66 = dma.hbm_to_vmem [thread:$0]  %s59_s16, 32768, %s61_s20, [#allocation9], %s5192_s21, %s5192_s21, %s5193_s22  }
   0xb   :  { %s5194_s25 = smov [#allocation11]   ;;  %s24_s28 = sshll.u32 %s5421_s0, 4  ;;  %s25_s28 = int_to_ptr.hbm [resolvable:$true] %s24_s28 }
   0xc   :  { %s84_s26 = sshll.u32 %s5194_s25, 4  ;;  %s5195_s29 = smov 128   ;;  %s85_s26 = int_to_ptr.vmem [resolvable:$true] %s84_s26 }
   0xd   :  { %s5196_s30 = smov 8   ;;  %s5197_s10 = smov [#allocation2]  }
   0xe   :  { %90 = dma.hbm_to_vmem [thread:$0]  %s83_s24, 8192, %s85_s26, [#allocation12], %s5195_s29, %s5195_s29, %s5196_s30  }
   0xf   :  { %s26_s11 = sshll.u32 %s5197_s10, 4  ;;  %s48_s14 = sshll.u32 %s5423_s2, 4  ;;  %s27_s11 = int_to_ptr.vmem [resolvable:$true] %s26_s11  ;;  %s49_s14 = int_to_ptr.hbm [resolvable:$true] %s48_s14 }
  0x10   :  { %29 = dma.hbm_to_vmem [thread:$0]  %s25_s28, 32, %s27_s11, [#allocation3]  }
  0x11   :  { %s72_s16 = sshll.u32 %s5425_s4, 4  ;;  %s5198_s17 = smov [#allocation7]   ;;  %s73_s16 = int_to_ptr.hbm [resolvable:$true] %s72_s16 }
  0x12   :  { %s50_s18 = sshll.u32 %s5198_s17, 4  ;;  %s5199_s0 = smov [#allocation10]   ;;  %s51_s18 = int_to_ptr.vmem [resolvable:$true] %s50_s18 }
  0x13   :  { %53 = dma.hbm_to_vmem [thread:$0]  %s49_s14, 128, %s51_s18, [#allocation6]  }
  0x14   :  { %s74_s19 = sshll.u32 %s5199_s0, 4  ;;  %s97_s22 = sshll.u32 %s5428_s7, 4  ;;  %s75_s19 = int_to_ptr.vmem [resolvable:$true] %s74_s19  ;;  %s98_s22 = int_to_ptr.hbm [resolvable:$true] %s97_s22 }
  0x15   :  { %77 = dma.hbm_to_vmem [thread:$0]  %s73_s16, 64, %s75_s19, [#allocation9]  }
  0x16   :  { %s5200_s2 = smov [#allocation13]   ;;  %s5201_s23 = smov 64  }
  0x17   :  { %s99_s1 = sshll.u32 %s5200_s2, 4  ;;  %s5202_s24 = smov 4   ;;  %s100_s1 = int_to_ptr.vmem [resolvable:$true] %s99_s1 }
  0x18   :  { %105 = dma.hbm_to_vmem [thread:$0]  %s98_s22, 2048, %s100_s1, [#allocation12], %s5201_s23, %s5201_s23, %s5202_s24  }
  0x19   :  { %5178 = dma.done.wait [#allocation3], 32  }
  0x1a   :  { %5179 = vsyncadd [#allocation3], 4294967264 }
  0x1b   :  { %5180 = dma.done.wait [#allocation6], 4224  }
  0x1c   :  { %5181 = vsyncadd [#allocation6], 4294963072 }
  0x1d   :  { %5182 = dma.done.wait [#allocation9], 32832  }
  0x1e   :  { %5183 = vsyncadd [#allocation9], 4294934464 }
  0x1f   :  { %5184 = dma.done.wait [#allocation12], 10240  }
  0x20   :  { %5185 = vsyncadd [#allocation12], 4294957056  ;;  %v3218_v0 = vld [vmem:[#allocation5 + $0xc0] sm:$0xf]  ;;  %v4624_v2 = vld [vmem:[#allocation5 + $0xc4] sm:$0xf] }
  0x21   :  { %v4628_v1 = vld [vmem:[#allocation5 + $0xdc] sm:$0xf0]  ;;  %v3220_v4 = vld [vmem:[#allocation5 + $0xe0] sm:$0xf0]  ;;  %v3226_v22 = vld [vmem:[#allocation5 + $0xc8] sm:$0xf] }
  0x22   :  { %v3219_v3 = vor.u32 %v4628_v1, %v3218_v0  ;;  %v3186_v5 = vld [vmem:[#allocation5 + $0x80] sm:$0xf]  ;;  %v3223_v7 = vor.u32 %v4624_v2, %v3220_v4  ;;  %v4616_v8 = vld [vmem:[#allocation5 + $0x84] sm:$0xf]  ;;  %v3234_v23 = vld [vmem:[#allocation5 + $0xd0] sm:$0xf] }
  0x23   :  { %v4620_v6 = vld [vmem:[#allocation5 + $0x9c] sm:$0xf0]  ;;  %v3188_v9 = vld [vmem:[#allocation5 + $0xa0] sm:$0xf0]  ;;  %v4630_v24 = vld [vmem:[#allocation5 + $0xec] sm:$0xf0] }
  0x24   :  { %357 = vmatpush.bf16.msra.mxu2 %v3219_v3  ;;  %v3187_v10 = vor.u32 %v4620_v6, %v3186_v5  ;;  %370 = vmatpush.bf16.msra.mxu3 %v3223_v7  ;;  %v3191_v11 = vor.u32 %v4616_v8, %v3188_v9  ;;  %v3154_v12 = vld [vmem:[#allocation5 + $0x40] sm:$0xf]  ;;  %v4608_v14 = vld [vmem:[#allocation5 + $0x44] sm:$0xf]  ;;  %v4629_v25 = vld [vmem:[#allocation5 + $0xe4] sm:$0xf0]  ;;  %v3235_v26 = vor.u32 %v4630_v24, %v3234_v23 }
  0x25   :  { %v4612_v13 = vld [vmem:[#allocation5 + $0x5c] sm:$0xf0]  ;;  %v3156_v15 = vld [vmem:[#allocation5 + $0x60] sm:$0xf0]  ;;  %v4626_v27 = vld [vmem:[#allocation5 + $0xd4] sm:$0xf]  ;;  %v3227_v38 = vor.u32 %v4629_v25, %v3226_v22 }
  0x26   :  { %v3122_v16 = vld [vmem:[#allocation5] sm:$0xf]  ;;  %v3155_v17 = vor.u32 %v4612_v13, %v3154_v12  ;;  %v4600_v19 = vld [vmem:[#allocation5 + $0x4] sm:$0xf]  ;;  %v3159_v21 = vor.u32 %v4608_v14, %v3156_v15  ;;  %v3236_v28 = vld [vmem:[#allocation5 + $0xf0] sm:$0xf0]  ;;  %409 = vmatpush.bf16.msra.mxu0 %v3235_v26 }
  0x27   :  { %v4604_v18 = vld [vmem:[#allocation5 + $0x1c] sm:$0xf0]  ;;  %v3124_v20 = vld [vmem:[#allocation5 + $0x20] sm:$0xf0]  ;;  %v137_v29 = vld [vmem:[#allocation2] sm:$0x3]  ;;  %v3239_v32 = vor.u32 %v4626_v27, %v3236_v28 }
  0x28   :  { %358 = vmatpush.bf16.msra.mxu2 %v3187_v10  ;;  %371 = vmatpush.bf16.msra.mxu3 %v3191_v11  ;;  %v4625_v30 = vld [vmem:[#allocation5 + $0xcc] sm:$0xf]  ;;  %v3123_v33 = vor.u32 %v4604_v18, %v3122_v16  ;;  %v3202_v34 = vld [vmem:[#allocation5 + $0x90] sm:$0xf]  ;;  %v4618_v36 = vld [vmem:[#allocation5 + $0x94] sm:$0xf]  ;;  %v3127_v37 = vor.u32 %v4600_v19, %v3124_v20  ;;  %v5275_v48 = vpack.c.bf16 %v137_v29, %v137_v29 }
  0x29   :  { %v3228_v31 = vld [vmem:[#allocation5 + $0xe8] sm:$0xf0]  ;;  %v4622_v35 = vld [vmem:[#allocation5 + $0xac] sm:$0xf0]  ;;  %v3194_v39 = vld [vmem:[#allocation5 + $0x88] sm:$0xf]  ;;  %422 = vmatpush.bf16.msra.mxu1 %v3239_v32 }
  0x2a   :  { %v4621_v40 = vld [vmem:[#allocation5 + $0xa4] sm:$0xf0]  ;;  %v3203_v41 = vor.u32 %v4622_v35, %v3202_v34  ;;  %v3204_v42 = vld [vmem:[#allocation5 + $0xb0] sm:$0xf0]  ;;  %v3231_v43 = vor.u32 %v4625_v30, %v3228_v31  ;;  %v4617_v44 = vld [vmem:[#allocation5 + $0x8c] sm:$0xf] }
  0x2b   :  { %v3196_v45 = vld [vmem:[#allocation5 + $0xa8] sm:$0xf0]  ;;  %v3207_v46 = vor.u32 %v4618_v36, %v3204_v42  ;;  %v3170_v47 = vld [vmem:[#allocation5 + $0x50] sm:$0xf]  ;;  %v4610_v50 = vld [vmem:[#allocation5 + $0x54] sm:$0xf]  ;;  %v3195_v53 = vor.u32 %v4621_v40, %v3194_v39 }
  0x2c   :  { %359 = vmatpush.bf16.msra.mxu2 %v3155_v17  ;;  %372 = vmatpush.bf16.msra.mxu3 %v3159_v21  ;;  %v4614_v49 = vld [vmem:[#allocation5 + $0x6c] sm:$0xf0]  ;;  %v3172_v51 = vld [vmem:[#allocation5 + $0x70] sm:$0xf0]  ;;  %vm349_vm0 = vcmask 523264   ;;  %v3199_v56 = vor.u32 %v4617_v44, %v3196_v45  ;;  %s5203_s26 = smov [#allocation14]  }
  0x2d   :  { %410 = vmatpush.bf16.msra.mxu0 %v3203_v41  ;;  %v3171_v52 = vor.u32 %v4614_v49, %v3170_v47  ;;  %v3138_v54 = vld [vmem:[#allocation5 + $0x10] sm:$0xf]  ;;  %v3162_v57 = vld [vmem:[#allocation5 + $0x48] sm:$0xf]  ;;  %v4609_v59 = vld [vmem:[#allocation5 + $0x4c] sm:$0xf]  ;;  %423 = vmatpush.bf16.msra.mxu1 %v3207_v46  ;;  %v3175_v60 = vor.u32 %v4610_v50, %v3172_v51 }
  0x2e   :  { %v4606_v55 = vld [vmem:[#allocation5 + $0x2c] sm:$0xf0]  ;;  %v4613_v58 = vld [vmem:[#allocation5 + $0x64] sm:$0xf0]  ;;  %v3164_v61 = vld [vmem:[#allocation5 + $0x68] sm:$0xf0] }
  0x2f   :  { %v4602_v62 = vld [vmem:[#allocation5 + $0x14] sm:$0xf]  ;;  %v3130_v0 = vld [vmem:[#allocation5 + $0x8] sm:$0xf]  ;;  %v3139_v1 = vor.u32 %v4606_v55, %v3138_v54  ;;  %v3163_v2 = vor.u32 %v4613_v58, %v3162_v57  ;;  %v4601_v4 = vld [vmem:[#allocation5 + $0xc] sm:$0xf]  ;;  %v3167_v6 = vor.u32 %v4609_v59, %v3164_v61 }
  0x30   :  { %360 = vmatpush.bf16.msra.mxu2 %v3123_v33  ;;  %373 = vmatpush.bf16.msra.mxu3 %v3127_v37  ;;  %v3140_v63 = vld [vmem:[#allocation5 + $0x30] sm:$0xf0]  ;;  %v4605_v3 = vld [vmem:[#allocation5 + $0x24] sm:$0xf0]  ;;  %v3132_v5 = vld [vmem:[#allocation5 + $0x28] sm:$0xf0] }
  0x31   :  { %411 = vmatpush.bf16.msra.mxu0 %v3171_v52  ;;  %424 = vmatpush.bf16.msra.mxu1 %v3175_v60  ;;  %v3242_v7 = vld [vmem:[#allocation5 + $0xd8] sm:$0xf]  ;;  %v3143_v9 = vor.u32 %v4602_v62, %v3140_v63  ;;  %v3370_v10 = vld [vmem:[#allocation8 + $0xe0] sm:$0xf]  ;;  %v4627_v14 = vld [vmem:[#allocation5 + $0xdc] sm:$0xf]  ;;  %v3131_v19 = vor.u32 %v4605_v3, %v3130_v0  ;;  %v3135_v23 = vor.u32 %v4601_v4, %v3132_v5 }
  0x32   :  { %v4631_v8 = vld [vmem:[#allocation5 + $0xf4] sm:$0xf0]  ;;  %v3498_v12 = vld [vmem:[#allocation8 + $0x1e0] sm:$0xf]  ;;  %v3244_v15 = vld [vmem:[#allocation5 + $0xf8] sm:$0xf0] }
  0x33   :  { %3248 = vmatmul.msk.bf16.vlgmr.msra.gmra.mxu2 %vm349_vm0, %v5275_v48  ;;  %3249 = vmatmul.msk.bf16.vlgmr.msra.gmra.mxu3 %vm349_vm0, %v5275_v48  ;;  %v4662_v11 = vld [vmem:[#allocation8 + $0xec] sm:$0xf0]  ;;  %v3482_v18 = vld [vmem:[#allocation8 + $0x1c0] sm:$0xf]  ;;  %v3243_v24 = vor.u32 %v4631_v8, %v3242_v7  ;;  %v3247_v25 = vor.u32 %v4627_v14, %v3244_v15  ;;  %v4619_v29 = vld [vmem:[#allocation5 + $0x9c] sm:$0xf] }
  0x34   :  { %383 = vmatpush.bf16.msrb.mxu2 %v3227_v38  ;;  %396 = vmatpush.bf16.msrb.mxu3 %v3231_v43  ;;  %v4694_v13 = vld [vmem:[#allocation8 + $0x1ec] sm:$0xf0]  ;;  %v3371_v16 = vor.u32 %v4662_v11, %v3370_v10  ;;  %v3354_v20 = vld [vmem:[#allocation8 + $0xc0] sm:$0xf]  ;;  %v3212_v30 = vld [vmem:[#allocation5 + $0xb8] sm:$0xf0] }
  0x35   :  { %412 = vmatpush.bf16.msra.mxu0 %v3139_v1  ;;  %v3499_v17 = vor.u32 %v4694_v13, %v3498_v12  ;;  %v4658_v21 = vld [vmem:[#allocation8 + $0xcc] sm:$0xf0]  ;;  %425 = vmatpush.bf16.msra.mxu1 %v3143_v9  ;;  %v3338_v32 = vld [vmem:[#allocation8 + $0xa0] sm:$0xf]  ;;  %v3215_v37 = vor.u32 %v4619_v29, %v3212_v30  ;;  %v4611_v40 = vld [vmem:[#allocation5 + $0x5c] sm:$0xf] }
  0x36   :  { %v4690_v22 = vld [vmem:[#allocation8 + $0x1cc] sm:$0xf0]  ;;  %v3355_v31 = vor.u32 %v4658_v21, %v3354_v20  ;;  %v3466_v35 = vld [vmem:[#allocation8 + $0x1a0] sm:$0xf]  ;;  %v3180_v41 = vld [vmem:[#allocation5 + $0x78] sm:$0xf0] }
  0x37   :  { %v3210_v26 = vld [vmem:[#allocation5 + $0x98] sm:$0xf]  ;;  %v3483_v28 = vor.u32 %v4690_v22, %v3482_v18  ;;  %v3322_v44 = vld [vmem:[#allocation8 + $0x80] sm:$0xf]  ;;  %v3183_v51 = vor.u32 %v4611_v40, %v3180_v41  ;;  %v3148_v54 = vld [vmem:[#allocation5 + $0x38] sm:$0xf0] }
  0x38   :  { %384 = vmatpush.bf16.msrb.mxu2 %v3195_v53  ;;  %397 = vmatpush.bf16.msrb.mxu3 %v3199_v56  ;;  %v4623_v27 = vld [vmem:[#allocation5 + $0xb4] sm:$0xf0]  ;;  %v3450_v49 = vld [vmem:[#allocation8 + $0x180] sm:$0xf]  ;;  %v4603_v53 = vld [vmem:[#allocation5 + $0x1c] sm:$0xf] }
  0x39   :  { %3252 = vmatmul.msk.bf16.vlgmr.msra.gmra.mxu0 %vm349_vm0, %v5275_v48  ;;  %2032 = vmatpush.bf16.msrb.mxu1 %v3499_v17  ;;  %v4654_v33 = vld [vmem:[#allocation8 + $0xac] sm:$0xf0]  ;;  %v3211_v34 = vor.u32 %v4623_v27, %v3210_v26  ;;  %v3306_v56 = vld [vmem:[#allocation8 + $0x60] sm:$0xf]  ;;  %s3105_s27 = sshll.u32 %s5203_s26, 4  ;;  %s3107_s29 = sshll.u32 %s5430_s9, 4  ;;  %s3106_s27 = int_to_ptr.vmem [resolvable:$true] %s3105_s27  ;;  %s3108_s29 = int_to_ptr.hbm [resolvable:$true] %s3107_s29 }
  0x3a   :  { %2019 = vmatpush.bf16.msrb.mxu0 %v3371_v16  ;;  %3253 = vmatmul.msk.bf16.vlgmr.msra.gmra.mxu1 %vm349_vm0, %v5275_v48  ;;  %v4686_v36 = vld [vmem:[#allocation8 + $0x1ac] sm:$0xf0]  ;;  %v3339_v42 = vor.u32 %v4654_v33, %v3338_v32  ;;  %v3626_v57 = vld [vmem:[#allocation8 + $0x2e0] sm:$0xf] }
  0x3b   :  { %v3178_v38 = vld [vmem:[#allocation5 + $0x58] sm:$0xf]  ;;  %v3467_v43 = vor.u32 %v4686_v36, %v3466_v35  ;;  %v3754_v61 = vld [vmem:[#allocation8 + $0x3e0] sm:$0xf] }
  0x3c   :  { %385 = vmatpush.bf16.msrb.mxu2 %v3163_v2  ;;  %398 = vmatpush.bf16.msrb.mxu3 %v3167_v6  ;;  %v4615_v39 = vld [vmem:[#allocation5 + $0x74] sm:$0xf0]  ;;  %v3434_v0 = vld [vmem:[#allocation8 + $0x160] sm:$0xf]  ;;  %v3151_v2 = vor.u32 %v4603_v53, %v3148_v54 }
  0x3d   :  { %2033 = vmatpush.bf16.msrb.mxu1 %v3483_v28  ;;  %v4650_v45 = vld [vmem:[#allocation8 + $0x8c] sm:$0xf0]  ;;  %v3179_v46 = vor.u32 %v4615_v39, %v3178_v38  ;;  %v3290_v6 = vld [vmem:[#allocation8 + $0x40] sm:$0xf] }
  0x3e   :  { %2020 = vmatpush.bf16.msrb.mxu0 %v3355_v31  ;;  %v3146_v47 = vld [vmem:[#allocation5 + $0x18] sm:$0xf]  ;;  %v3323_v55 = vor.u32 %v4650_v45, %v3322_v44  ;;  %v3610_v7 = vld [vmem:[#allocation8 + $0x2c0] sm:$0xf] }
  0x3f   :  { %v4682_v50 = vld [vmem:[#allocation8 + $0x18c] sm:$0xf0]  ;;  %v3738_v11 = vld [vmem:[#allocation8 + $0x3c0] sm:$0xf] }
  0x40   :  { %386 = vmatpush.bf16.msrb.mxu2 %v3131_v19  ;;  %399 = vmatpush.bf16.msrb.mxu3 %v3135_v23  ;;  %v4607_v52 = vld [vmem:[#allocation5 + $0x34] sm:$0xf0]  ;;  %v3451_v59 = vor.u32 %v4682_v50, %v3450_v49  ;;  %v3418_v13 = vld [vmem:[#allocation8 + $0x140] sm:$0xf] }
  0x41   :  { %v4726_v58 = vld [vmem:[#allocation8 + $0x2ec] sm:$0xf0]  ;;  %2034 = vmatpush.bf16.msrb.mxu1 %v3467_v43  ;;  %v3147_v63 = vor.u32 %v4607_v52, %v3146_v47  ;;  %v3274_v19 = vld [vmem:[#allocation8 + $0x20] sm:$0xf] }
  0x42   :  { %2021 = vmatpush.bf16.msrb.mxu0 %v3339_v42  ;;  %v4646_v60 = vld [vmem:[#allocation8 + $0x6c] sm:$0xf0]  ;;  %v3627_v3 = vor.u32 %v4726_v58, %v3626_v57  ;;  %v3402_v21 = vld [vmem:[#allocation8 + $0x120] sm:$0xf] }
  0x43   :  { %3250 = vmatmul.msk.bf16.vlgmr.msrb.gmra.mxu2 %vm349_vm0, %v5275_v48  ;;  %3251 = vmatmul.msk.bf16.vlgmr.msrb.gmra.mxu3 %vm349_vm0, %v5275_v48  ;;  %v4758_v62 = vld [vmem:[#allocation8 + $0x3ec] sm:$0xf0]  ;;  %v3307_v4 = vor.u32 %v4646_v60, %v3306_v56  ;;  %v3594_v23 = vld [vmem:[#allocation8 + $0x2a0] sm:$0xf] }
  0x44   :  { %435 = vmatpush.bf16.msra.mxu2 %v3243_v24  ;;  %448 = vmatpush.bf16.msra.mxu3 %v3247_v25  ;;  %v4678_v1 = vld [vmem:[#allocation8 + $0x16c] sm:$0xf0]  ;;  %v3755_v5 = vor.u32 %v4758_v62, %v3754_v61  ;;  %v3722_v25 = vld [vmem:[#allocation8 + $0x3a0] sm:$0xf] }
  0x45   :  { %v4722_v8 = vld [vmem:[#allocation8 + $0x2cc] sm:$0xf0]  ;;  %2035 = vmatpush.bf16.msrb.mxu1 %v3451_v59  ;;  %v3435_v9 = vor.u32 %v4678_v1, %v3434_v0  ;;  %v3258_v28 = vld [vmem:[#allocation8] sm:$0xf] }
  0x46   :  { %2022 = vmatpush.bf16.msrb.mxu0 %v3323_v55  ;;  %v4642_v10 = vld [vmem:[#allocation8 + $0x4c] sm:$0xf0]  ;;  %v3611_v15 = vor.u32 %v4722_v8, %v3610_v7  ;;  %v3386_v32 = vld [vmem:[#allocation8 + $0x100] sm:$0xf] }
  0x47   :  { %v4754_v12 = vld [vmem:[#allocation8 + $0x3cc] sm:$0xf0]  ;;  %v3291_v16 = vor.u32 %v4642_v10, %v3290_v6  ;;  %v3578_v35 = vld [vmem:[#allocation8 + $0x280] sm:$0xf] }
  0x48   :  { %436 = vmatpush.bf16.msra.mxu2 %v3211_v34  ;;  %449 = vmatpush.bf16.msra.mxu3 %v3215_v37  ;;  %v4674_v14 = vld [vmem:[#allocation8 + $0x14c] sm:$0xf0]  ;;  %v3739_v17 = vor.u32 %v4754_v12, %v3738_v11  ;;  %v3706_v37 = vld [vmem:[#allocation8 + $0x380] sm:$0xf] }
  0x49   :  { %2036 = vmatpush.bf16.msrb.mxu1 %v3435_v9  ;;  %v3419_v18 = vor.u32 %v4674_v14, %v3418_v13  ;;  %v4638_v20 = vld [vmem:[#allocation8 + $0x2c] sm:$0xf0]  ;;  %v3882_v39 = vld [vmem:[#allocation8 + $0x4e0] sm:$0xf] }
  0x4a   :  { %2023 = vmatpush.bf16.msrb.mxu0 %v3307_v4  ;;  %v4670_v22 = vld [vmem:[#allocation8 + $0x12c] sm:$0xf0]  ;;  %v3275_v27 = vor.u32 %v4638_v20, %v3274_v19  ;;  %v4010_v42 = vld [vmem:[#allocation8 + $0x5e0] sm:$0xf] }
  0x4b   :  { %v4718_v24 = vld [vmem:[#allocation8 + $0x2ac] sm:$0xf0]  ;;  %v3403_v29 = vor.u32 %v4670_v22, %v3402_v21  ;;  %v3866_v54 = vld [vmem:[#allocation8 + $0x4c0] sm:$0xf] }
  0x4c   :  { %437 = vmatpush.bf16.msra.mxu2 %v3179_v46  ;;  %450 = vmatpush.bf16.msra.mxu3 %v3183_v51  ;;  %v4750_v26 = vld [vmem:[#allocation8 + $0x3ac] sm:$0xf0]  ;;  %v3595_v30 = vor.u32 %v4718_v24, %v3594_v23  ;;  %v3562_v46 = vld [vmem:[#allocation8 + $0x260] sm:$0xf] }
  0x4d   :  { %2037 = vmatpush.bf16.msrb.mxu1 %v3419_v18  ;;  %v4634_v31 = vld [vmem:[#allocation8 + $0xc] sm:$0xf0]  ;;  %v3723_v34 = vor.u32 %v4750_v26, %v3722_v25  ;;  %v3690_v51 = vld [vmem:[#allocation8 + $0x360] sm:$0xf] }
  0x4e   :  { %2024 = vmatpush.bf16.msrb.mxu0 %v3291_v16  ;;  %v4666_v33 = vld [vmem:[#allocation8 + $0x10c] sm:$0xf0]  ;;  %v3259_v41 = vor.u32 %v4634_v31, %v3258_v28  ;;  %v3546_v60 = vld [vmem:[#allocation8 + $0x240] sm:$0xf] }
  0x4f   :  { %v4714_v36 = vld [vmem:[#allocation8 + $0x28c] sm:$0xf0]  ;;  %v3387_v44 = vor.u32 %v4666_v33, %v3386_v32  ;;  %v3674_v62 = vld [vmem:[#allocation8 + $0x340] sm:$0xf] }
  0x50   :  { %438 = vmatpush.bf16.msra.mxu2 %v3147_v63  ;;  %451 = vmatpush.bf16.msra.mxu3 %v3151_v2  ;;  %v4746_v38 = vld [vmem:[#allocation8 + $0x38c] sm:$0xf0]  ;;  %v3579_v45 = vor.u32 %v4714_v36, %v3578_v35  ;;  %v3850_v1 = vld [vmem:[#allocation8 + $0x4a0] sm:$0xf] }
  0x51   :  { %v4790_v40 = vld [vmem:[#allocation8 + $0x4ec] sm:$0xf0]  ;;  %2038 = vmatpush.bf16.msrb.mxu1 %v3403_v29  ;;  %v3707_v47 = vor.u32 %v4746_v38, %v3706_v37  ;;  %v3530_v8 = vld [vmem:[#allocation8 + $0x220] sm:$0xf] }
  0x52   :  { %2025 = vmatpush.bf16.msrb.mxu0 %v3275_v27  ;;  %v4822_v43 = vld [vmem:[#allocation8 + $0x5ec] sm:$0xf0]  ;;  %v3883_v49 = vor.u32 %v4790_v40, %v3882_v39  ;;  %v3658_v10 = vld [vmem:[#allocation8 + $0x320] sm:$0xf] }
  0x53   :  { %3254 = vmatmul.msk.bf16.vlgmr.msra.gmra.mxu2 %vm349_vm0, %v5275_v48  ;;  %3255 = vmatmul.msk.bf16.vlgmr.msra.gmra.mxu3 %vm349_vm0, %v5275_v48  ;;  %v4710_v50 = vld [vmem:[#allocation8 + $0x26c] sm:$0xf0]  ;;  %v4011_v53 = vor.u32 %v4822_v43, %v4010_v42  ;;  %v3994_v48 = vld [vmem:[#allocation8 + $0x5c0] sm:$0xf] }
  0x54   :  { %2045 = vmatpush.bf16.msrb.mxu2 %v3627_v3  ;;  %2058 = vmatpush.bf16.msrb.mxu3 %v3755_v5  ;;  %v4742_v52 = vld [vmem:[#allocation8 + $0x36c] sm:$0xf0]  ;;  %v3563_v57 = vor.u32 %v4710_v50, %v3562_v46  ;;  %v3978_v3 = vld [vmem:[#allocation8 + $0x5a0] sm:$0xf] }
  0x55   :  { %v4786_v55 = vld [vmem:[#allocation8 + $0x4cc] sm:$0xf0]  ;;  %2039 = vmatpush.bf16.msrb.mxu1 %v3387_v44  ;;  %v3691_v58 = vor.u32 %v4742_v52, %v3690_v51  ;;  %v3834_v13 = vld [vmem:[#allocation8 + $0x480] sm:$0xf] }
  0x56   :  { %2026 = vmatpush.bf16.msrb.mxu0 %v3259_v41  ;;  %v4818_v56 = vld [vmem:[#allocation8 + $0x5cc] sm:$0xf0]  ;;  %v3867_v59 = vor.u32 %v4786_v55, %v3866_v54  ;;  %v3514_v18 = vld [vmem:[#allocation8 + $0x200] sm:$0xf] }
  0x57   :  { %v4706_v61 = vld [vmem:[#allocation8 + $0x24c] sm:$0xf0]  ;;  %v3995_v63 = vor.u32 %v4818_v56, %v3994_v48  ;;  %v3642_v22 = vld [vmem:[#allocation8 + $0x300] sm:$0xf] }
  0x58   :  { %2046 = vmatpush.bf16.msrb.mxu2 %v3611_v15  ;;  %2059 = vmatpush.bf16.msrb.mxu3 %v3739_v17  ;;  %v4738_v0 = vld [vmem:[#allocation8 + $0x34c] sm:$0xf0]  ;;  %v3547_v5 = vor.u32 %v4706_v61, %v3546_v60  ;;  %v3962_v15 = vld [vmem:[#allocation8 + $0x580] sm:$0xf] }
  0x59   :  { %2084 = vmatpush.bf16.msra.mxu1 %v4011_v53  ;;  %v4782_v2 = vld [vmem:[#allocation8 + $0x4ac] sm:$0xf0]  ;;  %v3675_v6 = vor.u32 %v4738_v0, %v3674_v62  ;;  %v3818_v25 = vld [vmem:[#allocation8 + $0x460] sm:$0xf] }
  0x5a   :  { %2071 = vmatpush.bf16.msra.mxu0 %v3883_v49  ;;  %v4814_v4 = vld [vmem:[#allocation8 + $0x5ac] sm:$0xf0]  ;;  %v3851_v7 = vor.u32 %v4782_v2, %v3850_v1  ;;  %v3946_v27 = vld [vmem:[#allocation8 + $0x560] sm:$0xf] }
  0x5b   :  { %v4702_v9 = vld [vmem:[#allocation8 + $0x22c] sm:$0xf0]  ;;  %v3979_v11 = vor.u32 %v4814_v4, %v3978_v3  ;;  %v4138_v29 = vld [vmem:[#allocation8 + $0x6e0] sm:$0xf] }
  0x5c   :  { %2047 = vmatpush.bf16.msrb.mxu2 %v3595_v30  ;;  %2060 = vmatpush.bf16.msrb.mxu3 %v3723_v34  ;;  %v4734_v12 = vld [vmem:[#allocation8 + $0x32c] sm:$0xf0]  ;;  %v3531_v17 = vor.u32 %v4702_v9, %v3530_v8  ;;  %v4266_v32 = vld [vmem:[#allocation8 + $0x7e0] sm:$0xf] }
  0x5d   :  { %2085 = vmatpush.bf16.msra.mxu1 %v3995_v63  ;;  %v4778_v14 = vld [vmem:[#allocation8 + $0x48c] sm:$0xf0]  ;;  %v3659_v19 = vor.u32 %v4734_v12, %v3658_v10  ;;  %v3802_v38 = vld [vmem:[#allocation8 + $0x440] sm:$0xf] }
  0x5e   :  { %2072 = vmatpush.bf16.msra.mxu0 %v3867_v59  ;;  %v4810_v16 = vld [vmem:[#allocation8 + $0x58c] sm:$0xf0]  ;;  %v3835_v20 = vor.u32 %v4778_v14, %v3834_v13  ;;  %v3930_v40 = vld [vmem:[#allocation8 + $0x540] sm:$0xf] }
  0x5f   :  { %v4698_v21 = vld [vmem:[#allocation8 + $0x20c] sm:$0xf0]  ;;  %v3963_v24 = vor.u32 %v4810_v16, %v3962_v15  ;;  %v4122_v43 = vld [vmem:[#allocation8 + $0x6c0] sm:$0xf] }
  0x60   :  { %2048 = vmatpush.bf16.msrb.mxu2 %v3579_v45  ;;  %2061 = vmatpush.bf16.msrb.mxu3 %v3707_v47  ;;  %v4730_v23 = vld [vmem:[#allocation8 + $0x30c] sm:$0xf0]  ;;  %v3515_v31 = vor.u32 %v4698_v21, %v3514_v18  ;;  %v4250_v45 = vld [vmem:[#allocation8 + $0x7c0] sm:$0xf] }
  0x61   :  { %2086 = vmatpush.bf16.msra.mxu1 %v3979_v11  ;;  %v4774_v26 = vld [vmem:[#allocation8 + $0x46c] sm:$0xf0]  ;;  %v3643_v34 = vor.u32 %v4730_v23, %v3642_v22  ;;  %v3786_v52 = vld [vmem:[#allocation8 + $0x420] sm:$0xf] }
  0x62   :  { %2073 = vmatpush.bf16.msra.mxu0 %v3851_v7  ;;  %v4806_v28 = vld [vmem:[#allocation8 + $0x56c] sm:$0xf0]  ;;  %v3819_v35 = vor.u32 %v4774_v26, %v3818_v25  ;;  %v3914_v55 = vld [vmem:[#allocation8 + $0x520] sm:$0xf] }
  0x63   :  { %v4854_v30 = vld [vmem:[#allocation8 + $0x6ec] sm:$0xf0]  ;;  %v3947_v36 = vor.u32 %v4806_v28, %v3946_v27  ;;  %v4106_v56 = vld [vmem:[#allocation8 + $0x6a0] sm:$0xf] }
  0x64   :  { %2049 = vmatpush.bf16.msrb.mxu2 %v3563_v57  ;;  %2062 = vmatpush.bf16.msrb.mxu3 %v3691_v58  ;;  %v4886_v33 = vld [vmem:[#allocation8 + $0x7ec] sm:$0xf0]  ;;  %v4139_v37 = vor.u32 %v4854_v30, %v4138_v29  ;;  %v4234_v59 = vld [vmem:[#allocation8 + $0x7a0] sm:$0xf] }
  0x65   :  { %2087 = vmatpush.bf16.msra.mxu1 %v3963_v24  ;;  %v4770_v39 = vld [vmem:[#allocation8 + $0x44c] sm:$0xf0]  ;;  %v4267_v41 = vor.u32 %v4886_v33, %v4266_v32  ;;  %v3770_v63 = vld [vmem:[#allocation8 + $0x400] sm:$0xf] }
  0x66   :  { %2074 = vmatpush.bf16.msra.mxu0 %v3835_v20  ;;  %v4802_v42 = vld [vmem:[#allocation8 + $0x54c] sm:$0xf0]  ;;  %v3803_v47 = vor.u32 %v4770_v39, %v3802_v38  ;;  %v3898_v1 = vld [vmem:[#allocation8 + $0x500] sm:$0xf] }
  0x67   :  { %v4850_v44 = vld [vmem:[#allocation8 + $0x6cc] sm:$0xf0]  ;;  %v3931_v49 = vor.u32 %v4802_v42, %v3930_v40  ;;  %v4090_v4 = vld [vmem:[#allocation8 + $0x680] sm:$0xf]  ;;  %v3372_v42 = vld [vmem:[#allocation8 + $0xf0] sm:$0xf0] }
  0x68   :  { %2050 = vmatpush.bf16.msrb.mxu2 %v3547_v5  ;;  %2063 = vmatpush.bf16.msrb.mxu3 %v3675_v6  ;;  %v4882_v46 = vld [vmem:[#allocation8 + $0x7cc] sm:$0xf0]  ;;  %v4123_v50 = vor.u32 %v4850_v44, %v4122_v43  ;;  %v4218_v8 = vld [vmem:[#allocation8 + $0x780] sm:$0xf]  ;;  %v4692_v44 = vld [vmem:[#allocation8 + $0x1e4] sm:$0xf] }
  0x69   :  { %2088 = vmatpush.bf16.msra.mxu1 %v3947_v36  ;;  %v4251_v51 = vor.u32 %v4882_v46, %v4250_v45  ;;  %v4766_v53 = vld [vmem:[#allocation8 + $0x42c] sm:$0xf0]  ;;  %v4074_v11 = vld [vmem:[#allocation8 + $0x660] sm:$0xf]  ;;  %v3500_v45 = vld [vmem:[#allocation8 + $0x1f0] sm:$0xf0] }
  0x6a   :  { %2075 = vmatpush.bf16.msra.mxu0 %v3819_v35  ;;  %v3787_v54 = vor.u32 %v4766_v53, %v3786_v52  ;;  %v4798_v48 = vld [vmem:[#allocation8 + $0x52c] sm:$0xf0]  ;;  %v4202_v13 = vld [vmem:[#allocation8 + $0x760] sm:$0xf]  ;;  %v5293_v35 = vld [vmem:[#allocation7] sm:$0xff]  ;;  %v3503_v53 = vor.u32 %v4692_v44, %v3500_v45 }
  0x6b   :  { %v3915_v57 = vor.u32 %v4798_v48, %v3914_v55  ;;  %v4846_v58 = vld [vmem:[#allocation8 + $0x6ac] sm:$0xf0]  ;;  %v4042_v23 = vld [vmem:[#allocation8 + $0x620] sm:$0xf]  ;;  %v173_v36 = vperm.slane %v5293_v35, 0 }
  0x6c   :  { %2051 = vmatpush.bf16.msrb.mxu2 %v3531_v17  ;;  %2064 = vmatpush.bf16.msrb.mxu3 %v3659_v19  ;;  %v4878_v60 = vld [vmem:[#allocation8 + $0x7ac] sm:$0xf0]  ;;  %v4107_v61 = vor.u32 %v4846_v58, %v4106_v56  ;;  %v4058_v17 = vld [vmem:[#allocation8 + $0x640] sm:$0xf]  ;;  %v3356_v55 = vld [vmem:[#allocation8 + $0xd0] sm:$0xf0] }
  0x6d   :  { %2089 = vmatpush.bf16.msra.mxu1 %v3931_v49  ;;  %v4235_v62 = vor.u32 %v4878_v60, %v4234_v59  ;;  %v4762_v0 = vld [vmem:[#allocation8 + $0x40c] sm:$0xf0]  ;;  %v4186_v19 = vld [vmem:[#allocation8 + $0x740] sm:$0xf]  ;;  %v4688_v56 = vld [vmem:[#allocation8 + $0x1c4] sm:$0xf] }
  0x6e   :  { %2076 = vmatpush.bf16.msra.mxu0 %v3803_v47  ;;  %v3771_v2 = vor.u32 %v4762_v0, %v3770_v63  ;;  %v4794_v3 = vld [vmem:[#allocation8 + $0x50c] sm:$0xf0]  ;;  %v4170_v25 = vld [vmem:[#allocation8 + $0x720] sm:$0xf]  ;;  %v177_v58 = vperm.slane %v5293_v35, 4 }
  0x6f   :  { %v4842_v5 = vld [vmem:[#allocation8 + $0x68c] sm:$0xf0]  ;;  %v3899_v6 = vor.u32 %v4794_v3, %v3898_v1  ;;  %v4026_v29 = vld [vmem:[#allocation8 + $0x600] sm:$0xf]  ;;  %v4652_v0 = vld [vmem:[#allocation8 + $0xa4] sm:$0xf] }
  0x70   :  { %2052 = vmatpush.bf16.msrb.mxu2 %v3515_v31  ;;  %2065 = vmatpush.bf16.msrb.mxu3 %v3643_v34  ;;  %v4091_v7 = vor.u32 %v4842_v5, %v4090_v4  ;;  %v4874_v9 = vld [vmem:[#allocation8 + $0x78c] sm:$0xf0]  ;;  %v4154_v31 = vld [vmem:[#allocation8 + $0x700] sm:$0xf]  ;;  %v3340_v1 = vld [vmem:[#allocation8 + $0xb0] sm:$0xf0] }
  0x71   :  { %2090 = vmatpush.bf16.msra.mxu1 %v3915_v57  ;;  %v4219_v10 = vor.u32 %v4874_v9, %v4218_v8  ;;  %v4838_v12 = vld [vmem:[#allocation8 + $0x66c] sm:$0xf0]  ;;  %v3484_v57 = vld [vmem:[#allocation8 + $0x1d0] sm:$0xf0]  ;;  %v4672_v45 = vld [vmem:[#allocation8 + $0x144] sm:$0xf] }
  0x72   :  { %2077 = vmatpush.bf16.msra.mxu0 %v3787_v54  ;;  %v4075_v14 = vor.u32 %v4838_v12, %v4074_v11  ;;  %v4870_v15 = vld [vmem:[#allocation8 + $0x76c] sm:$0xf0]  ;;  %v4656_v54 = vld [vmem:[#allocation8 + $0xc4] sm:$0xf]  ;;  %v3487_v63 = vor.u32 %v4688_v56, %v3484_v57  ;;  %v3468_v3 = vld [vmem:[#allocation8 + $0x1b0] sm:$0xf0] }
  0x73   :  { %v4203_v16 = vor.u32 %v4870_v15, %v4202_v13  ;;  %v4834_v18 = vld [vmem:[#allocation8 + $0x64c] sm:$0xf0]  ;;  %v3359_v60 = vor.u32 %v4656_v54, %v3356_v55  ;;  %v4648_v11 = vld [vmem:[#allocation8 + $0x84] sm:$0xf]  ;;  %v3324_v12 = vld [vmem:[#allocation8 + $0x90] sm:$0xf0] }
  0x74   :  { %2097 = vmatpush.bf16.msra.mxu2 %v4139_v37  ;;  %2110 = vmatpush.bf16.msra.mxu3 %v4267_v41  ;;  %v4059_v20 = vor.u32 %v4834_v18, %v4058_v17  ;;  %v4866_v21 = vld [vmem:[#allocation8 + $0x74c] sm:$0xf0]  ;;  %v174_v37 = vperm.slane %v5293_v35, 1  ;;  %v4660_v41 = vld [vmem:[#allocation8 + $0xe4] sm:$0xf]  ;;  %v176_v13 = vperm.slane %v5293_v35, 3 }
  0x75   :  { %2091 = vmatpush.bf16.msra.mxu1 %v3899_v6  ;;  %v4187_v22 = vor.u32 %v4866_v21, %v4186_v19  ;;  %v4830_v24 = vld [vmem:[#allocation8 + $0x62c] sm:$0xf0]  ;;  %v3343_v6 = vor.u32 %v4652_v0, %v3340_v1  ;;  %v3452_v15 = vld [vmem:[#allocation8 + $0x190] sm:$0xf0]  ;;  %v3327_v19 = vor.u32 %v4648_v11, %v3324_v12  ;;  %v4636_v57 = vld [vmem:[#allocation8 + $0x24] sm:$0xf] }
  0x76   :  { %2078 = vmatpush.bf16.msra.mxu0 %v3771_v2  ;;  %v4862_v26 = vld [vmem:[#allocation8 + $0x72c] sm:$0xf0]  ;;  %v4043_v27 = vor.u32 %v4830_v24, %v4042_v23  ;;  %v4684_v2 = vld [vmem:[#allocation8 + $0x1a4] sm:$0xf]  ;;  %v3308_v24 = vld [vmem:[#allocation8 + $0x70] sm:$0xf0] }
  0x77   :  { %v4171_v28 = vor.u32 %v4862_v26, %v4170_v25  ;;  %v4826_v30 = vld [vmem:[#allocation8 + $0x60c] sm:$0xf0]  ;;  %v3471_v9 = vor.u32 %v4684_v2, %v3468_v3  ;;  %v4644_v23 = vld [vmem:[#allocation8 + $0x64] sm:$0xf]  ;;  %v3596_v0 = vld [vmem:[#allocation8 + $0x2b0] sm:$0xf0] }
  0x78   :  { %2098 = vmatpush.bf16.msra.mxu2 %v4123_v50  ;;  %2111 = vmatpush.bf16.msra.mxu3 %v4251_v51  ;;  %v4027_v32 = vor.u32 %v4826_v30, %v4026_v29  ;;  %v4858_v33 = vld [vmem:[#allocation8 + $0x70c] sm:$0xf0]  ;;  %v3375_v50 = vor.u32 %v4660_v41, %v3372_v42  ;;  %v4676_v25 = vld [vmem:[#allocation8 + $0x164] sm:$0xf]  ;;  %v3628_v29 = vld [vmem:[#allocation8 + $0x2f0] sm:$0xf0] }
  0x79   :  { %v4155_v34 = vor.u32 %v4858_v33, %v4154_v31  ;;  %v3756_v33 = vld [vmem:[#allocation8 + $0x3f0] sm:$0xf0]  ;;  %v4748_v1 = vld [vmem:[#allocation8 + $0x3a4] sm:$0xf]  ;;  %v179_v3 = vperm.slane %v5293_v35, 6 }
  0x7a   :  { %v3292_v41 = vld [vmem:[#allocation8 + $0x50] sm:$0xf0] }
  0x7b   :  { %v3724_v2 = vld [vmem:[#allocation8 + $0x3b0] sm:$0xf0] }
  0x7c   :  { %2099 = vmatpush.bf16.msra.mxu2 %v4107_v61  ;;  %2112 = vmatpush.bf16.msra.mxu3 %v4235_v62  ;;  %v178_v61 = vperm.slane %v5293_v35, 5  ;;  %v3727_v11 = vor.u32 %v4748_v1, %v3724_v2  ;;  %v3388_v12 = vld [vmem:[#allocation8 + $0x110] sm:$0xf0]  ;;  %v4700_v1 = vld [vmem:[#allocation8 + $0x224] sm:$0xf] }
  0x7d   :  { %v3532_v2 = vld [vmem:[#allocation8 + $0x230] sm:$0xf0] }
  0x80   :  { %2100 = vmatpush.bf16.msra.mxu2 %v4091_v7  ;;  %2113 = vmatpush.bf16.msra.mxu3 %v4219_v10  ;;  %v175_v10 = vperm.slane %v5293_v35, 2 }
  0x84   :  { %2101 = vmatpush.bf16.msra.mxu2 %v4075_v14  ;;  %2114 = vmatpush.bf16.msra.mxu3 %v4203_v16  ;;  %v4680_v14 = vld [vmem:[#allocation8 + $0x184] sm:$0xf] }
  0x88   :  { %2102 = vmatpush.bf16.msra.mxu2 %v4059_v20  ;;  %2115 = vmatpush.bf16.msra.mxu3 %v4187_v22  ;;  %v3455_v22 = vor.u32 %v4680_v14, %v3452_v15  ;;  %v3580_v14 = vld [vmem:[#allocation8 + $0x290] sm:$0xf0]  ;;  %v4744_v15 = vld [vmem:[#allocation8 + $0x384] sm:$0xf] }
  0x8c   :  { %2103 = vmatpush.bf16.msra.mxu2 %v4043_v27  ;;  %2116 = vmatpush.bf16.msra.mxu3 %v4171_v28  ;;  %v3436_v27 = vld [vmem:[#allocation8 + $0x170] sm:$0xf0]  ;;  %v4724_v28 = vld [vmem:[#allocation8 + $0x2e4] sm:$0xf] }
  0x90   :  { %2104 = vmatpush.bf16.msra.mxu2 %v4027_v32  ;;  %2117 = vmatpush.bf16.msra.mxu3 %v4155_v34  ;;  %v4756_v32 = vld [vmem:[#allocation8 + $0x3e4] sm:$0xf] }
  0x91   :  { %v3759_v44 = vor.u32 %v4756_v32, %v3756_v33  ;;  %v3692_v32 = vld [vmem:[#allocation8 + $0x370] sm:$0xf0] }
  0xb6   :  { %v362_v38 = vpop.f32.mrf.mxu2  ;;  %v375_v40 = vpop.f32.mrf.mxu3 }
  0xb7   :  { %v363_v39 = vadd.f32 %v362_v38, %v173_v36  ;;  %v376_v43 = vadd.f32 %v375_v40, %v174_v37  ;;  %v414_v46 = vpop.f32.mrf.mxu0  ;;  %v427_v51 = vpop.f32.mrf.mxu1  ;;  %v3311_v38 = vor.u32 %v4644_v23, %v3308_v24  ;;  %v4640_v40 = vld [vmem:[#allocation8 + $0x44] sm:$0xf] }
  0xb8   :  { %v415_v5 = vadd.f32 %v414_v46, %v177_v58  ;;  %v428_v7 = vadd.f32 %v427_v51, %v178_v61  ;;  %v3420_v46 = vld [vmem:[#allocation8 + $0x150] sm:$0xf0]  ;;  %v3295_v55 = vor.u32 %v4640_v40, %v3292_v41  ;;  %v4668_v61 = vld [vmem:[#allocation8 + $0x124] sm:$0xf] }
  0xb9   :  { %v457_v47 = vmax.f32 %v363_v39, 0.0  ;;  %v458_v49 = vmax.f32 %v376_v43, 0.0  ;;  %v3439_v39 = vor.u32 %v4676_v25, %v3436_v27  ;;  %v3631_v43 = vor.u32 %v4724_v28, %v3628_v29  ;;  %v3740_v51 = vld [vmem:[#allocation8 + $0x3d0] sm:$0xf0]  ;;  %v4708_v25 = vld [vmem:[#allocation8 + $0x264] sm:$0xf] }
  0xba   :  { %v461_v16 = vmax.f32 %v415_v5, 0.0  ;;  %v462_v18 = vmax.f32 %v428_v7, 0.0  ;;  %v3423_v56 = vor.u32 %v4672_v45, %v3420_v46  ;;  %v3276_v58 = vld [vmem:[#allocation8 + $0x30] sm:$0xf0]  ;;  %v4632_v7 = vld [vmem:[#allocation8 + $0x4] sm:$0xf] }
  0xbb   :  { %v5297_v52 = vpack.c.bf16 %v457_v47, %v457_v47  ;;  %v5299_v48 = vpack.c.bf16 %v458_v49, %v458_v49  ;;  %v4720_v47 = vld [vmem:[#allocation8 + $0x2c4] sm:$0xf]  ;;  %v3612_v49 = vld [vmem:[#allocation8 + $0x2d0] sm:$0xf0]  ;;  %v3279_v5 = vor.u32 %v4636_v57, %v3276_v58 }
  0xbc   :  { %v5307_v31 = vpack.c.bf16 %v461_v16, %v461_v16  ;;  %v5309_v36 = vpack.c.bf16 %v462_v18, %v462_v18  ;;  %v3708_v16 = vld [vmem:[#allocation8 + $0x390] sm:$0xf0]  ;;  %v4780_v57 = vld [vmem:[#allocation8 + $0x4a4] sm:$0xf] }
  0xbd   :  { %2027 = vmatmul.bf16.vlgmr.msrb.gmra.mxu0 %v5297_v52  ;;  %2040 = vmatmul.bf16.vlgmr.msrb.gmra.mxu1 %v5299_v48  ;;  %v3711_v28 = vor.u32 %v4744_v15, %v3708_v16  ;;  %v3564_v29 = vld [vmem:[#allocation8 + $0x270] sm:$0xf0]  ;;  %v4728_v15 = vld [vmem:[#allocation8 + $0x304] sm:$0xf] }
  0xbe   :  { %2123 = vmatpush.bf16.msrb.mxu0 %v3375_v50  ;;  %v364_v59 = vpop.f32.mrf.mxu2  ;;  %2136 = vmatpush.bf16.msrb.mxu1 %v3503_v53  ;;  %v377_v62 = vpop.f32.mrf.mxu3  ;;  %v4752_v50 = vld [vmem:[#allocation8 + $0x3c4] sm:$0xf]  ;;  %v3868_v40 = vld [vmem:[#allocation8 + $0x4d0] sm:$0xf0] }
  0xbf   :  { %v416_v4 = vpop.f32.mrf.mxu0  ;;  %v429_v8 = vpop.f32.mrf.mxu1  ;;  %v3615_v59 = vor.u32 %v4720_v47, %v3612_v49  ;;  %v3404_v62 = vld [vmem:[#allocation8 + $0x130] sm:$0xf0]  ;;  %v3567_v47 = vor.u32 %v4708_v25, %v3564_v29 }
  0xc0   :  { %v180_v4 = vperm.slane %v5293_v35, 7  ;;  %v3260_v8 = vld [vmem:[#allocation8 + $0x10] sm:$0xf0]  ;;  %v4820_v35 = vld [vmem:[#allocation8 + $0x5e4] sm:$0xf] }
  0xc1   :  { %v3263_v23 = vor.u32 %v4632_v7, %v3260_v8  ;;  %v3852_v58 = vld [vmem:[#allocation8 + $0x4b0] sm:$0xf0]  ;;  %v4776_v7 = vld [vmem:[#allocation8 + $0x484] sm:$0xf] }
  0xc2   :  { %2124 = vmatpush.bf16.msrb.mxu0 %v3359_v60  ;;  %2137 = vmatpush.bf16.msrb.mxu1 %v3487_v63  ;;  %v3743_v60 = vor.u32 %v4752_v50, %v3740_v51  ;;  %v4716_v63 = vld [vmem:[#allocation8 + $0x2a4] sm:$0xf]  ;;  %v3548_v51 = vld [vmem:[#allocation8 + $0x250] sm:$0xf0] }
  0xc3   :  { %v4704_v50 = vld [vmem:[#allocation8 + $0x244] sm:$0xf]  ;;  %v3836_v8 = vld [vmem:[#allocation8 + $0x490] sm:$0xf0] }
  0xc4   :  { %v3839_v16 = vor.u32 %v4776_v7, %v3836_v8  ;;  %v4268_v25 = vld [vmem:[#allocation8 + $0x7f0] sm:$0xf0]  ;;  %v4872_v7 = vld [vmem:[#allocation8 + $0x784] sm:$0xf] }
  0xc5   :  { %v4220_v8 = vld [vmem:[#allocation8 + $0x790] sm:$0xf0] }
  0xc6   :  { %2125 = vmatpush.bf16.msrb.mxu0 %v3343_v6  ;;  %v388_v17 = vpop.f32.mrf.mxu2  ;;  %2138 = vmatpush.bf16.msrb.mxu1 %v3471_v9  ;;  %v401_v21 = vpop.f32.mrf.mxu3  ;;  %v3407_v6 = vor.u32 %v4668_v61, %v3404_v62  ;;  %v4664_v9 = vld [vmem:[#allocation8 + $0x104] sm:$0xf] }
  0xc7   :  { %v389_v20 = vadd.f32 %v388_v17, %v175_v10  ;;  %v402_v26 = vadd.f32 %v401_v21, %v176_v13  ;;  %v3599_v10 = vor.u32 %v4716_v63, %v3596_v0  ;;  %v4712_v13 = vld [vmem:[#allocation8 + $0x284] sm:$0xf]  ;;  %v3391_v24 = vor.u32 %v4664_v9, %v3388_v12 }
  0xc8   :  { %v4788_v17 = vld [vmem:[#allocation8 + $0x4e4] sm:$0xf]  ;;  %v3583_v27 = vor.u32 %v4712_v13, %v3580_v14  ;;  %v3551_v63 = vor.u32 %v4704_v50, %v3548_v51  ;;  %v3516_v14 = vld [vmem:[#allocation8 + $0x210] sm:$0xf0] }
  0xc9   :  { %v459_v30 = vmax.f32 %v389_v20, 0.0  ;;  %v460_v34 = vmax.f32 %v402_v26, 0.0  ;;  %v4012_v20 = vld [vmem:[#allocation8 + $0x5f0] sm:$0xf0]  ;;  %v4808_v9 = vld [vmem:[#allocation8 + $0x584] sm:$0xf] }
  0xca   :  { %2126 = vmatpush.bf16.msrb.mxu0 %v3327_v19  ;;  %2139 = vmatpush.bf16.msrb.mxu1 %v3455_v22  ;;  %v3884_v19 = vld [vmem:[#allocation8 + $0x4f0] sm:$0xf0]  ;;  %v4696_v13 = vld [vmem:[#allocation8 + $0x204] sm:$0xf] }
  0xcb   :  { %v5311_v37 = vpack.c.bf16 %v459_v30, %v459_v30  ;;  %v5313_v42 = vpack.c.bf16 %v460_v34, %v460_v34  ;;  %v4740_v30 = vld [vmem:[#allocation8 + $0x364] sm:$0xf]  ;;  %v3887_v34 = vor.u32 %v4788_v17, %v3884_v19  ;;  %v3788_v51 = vld [vmem:[#allocation8 + $0x430] sm:$0xf0] }
  0xcc   :  { %v3695_v49 = vor.u32 %v4740_v30, %v3692_v32  ;;  %v4772_v19 = vld [vmem:[#allocation8 + $0x464] sm:$0xf]  ;;  %v3804_v32 = vld [vmem:[#allocation8 + $0x450] sm:$0xf0] }
  0xcd   :  { %2053 = vmatmul.bf16.vlgmr.msrb.gmra.mxu2 %v5311_v37  ;;  %2079 = vmatmul.bf16.vlgmr.msra.gmra.mxu0 %v5307_v31  ;;  %v4768_v30 = vld [vmem:[#allocation8 + $0x444] sm:$0xf] }
  0xce   :  { %2066 = vmatmul.bf16.vlgmr.msrb.gmra.mxu3 %v5313_v42  ;;  %2092 = vmatmul.bf16.vlgmr.msra.gmra.mxu1 %v5309_v36  ;;  %v390_v53 = vpop.f32.mrf.mxu2  ;;  %v403_v54 = vpop.f32.mrf.mxu3  ;;  %v4764_v50 = vld [vmem:[#allocation8 + $0x424] sm:$0xf] }
  0xcf   :  { %2127 = vmatpush.bf16.msrb.mxu0 %v3311_v38  ;;  %2140 = vmatpush.bf16.msrb.mxu1 %v3439_v39  ;;  %v4015_v38 = vor.u32 %v4820_v35, %v4012_v20  ;;  %v4784_v39 = vld [vmem:[#allocation8 + $0x4c4] sm:$0xf]  ;;  %v3820_v35 = vld [vmem:[#allocation8 + $0x470] sm:$0xf0] }
  0xd0   :  { %2149 = vmatpush.bf16.msrb.mxu2 %v3631_v43  ;;  %2162 = vmatpush.bf16.msrb.mxu3 %v3759_v44  ;;  %v4816_v43 = vld [vmem:[#allocation8 + $0x5c4] sm:$0xf]  ;;  %v3996_v44 = vld [vmem:[#allocation8 + $0x5d0] sm:$0xf0]  ;;  %v3871_v53 = vor.u32 %v4784_v39, %v3868_v40 }
  0xd1   :  { %v3999_v54 = vor.u32 %v4816_v43, %v3996_v44  ;;  %v4804_v20 = vld [vmem:[#allocation8 + $0x564] sm:$0xf]  ;;  %v3932_v39 = vld [vmem:[#allocation8 + $0x550] sm:$0xf0] }
  0xd2   :  { %v4848_v40 = vld [vmem:[#allocation8 + $0x6c4] sm:$0xf]  ;;  %v4252_v44 = vld [vmem:[#allocation8 + $0x7d0] sm:$0xf0] }
  0xd3   :  { %2128 = vmatpush.bf16.msrb.mxu0 %v3295_v55  ;;  %2141 = vmatpush.bf16.msrb.mxu1 %v3423_v56  ;;  %v4736_v55 = vld [vmem:[#allocation8 + $0x344] sm:$0xf]  ;;  %v3676_v56 = vld [vmem:[#allocation8 + $0x350] sm:$0xf0] }
  0xd4   :  { %2150 = vmatpush.bf16.msrb.mxu2 %v3615_v59  ;;  %2163 = vmatpush.bf16.msrb.mxu3 %v3743_v60  ;;  %v4812_v59 = vld [vmem:[#allocation8 + $0x5a4] sm:$0xf]  ;;  %v3980_v60 = vld [vmem:[#allocation8 + $0x5b0] sm:$0xf0]  ;;  %v3679_v0 = vor.u32 %v4736_v55, %v3676_v56 }
  0xd5   :  { %v4880_v43 = vld [vmem:[#allocation8 + $0x7c4] sm:$0xf]  ;;  %v3916_v56 = vld [vmem:[#allocation8 + $0x530] sm:$0xf0] }
  0xd6   :  { %v440_v18 = vpop.f32.mrf.mxu2  ;;  %v453_v22 = vpop.f32.mrf.mxu3  ;;  %v4796_v55 = vld [vmem:[#allocation8 + $0x524] sm:$0xf] }
  0xd7   :  { %2129 = vmatpush.bf16.msrb.mxu0 %v3279_v5  ;;  %2142 = vmatpush.bf16.msrb.mxu1 %v3407_v6  ;;  %v441_v21 = vadd.f32 %v440_v18, %v179_v3  ;;  %v454_v26 = vadd.f32 %v453_v22, %v180_v4  ;;  %v3855_v3 = vor.u32 %v4780_v57, %v3852_v58  ;;  %v4732_v5 = vld [vmem:[#allocation8 + $0x324] sm:$0xf]  ;;  %v3660_v6 = vld [vmem:[#allocation8 + $0x330] sm:$0xf0] }
  0xd8   :  { %2151 = vmatpush.bf16.msrb.mxu2 %v3599_v10  ;;  %2164 = vmatpush.bf16.msrb.mxu3 %v3727_v11  ;;  %v3983_v4 = vor.u32 %v4812_v59, %v3980_v60  ;;  %v3964_v10 = vld [vmem:[#allocation8 + $0x590] sm:$0xf0]  ;;  %v3535_v11 = vor.u32 %v4700_v1, %v3532_v2  ;;  %v3663_v12 = vor.u32 %v4732_v5, %v3660_v6  ;;  %v4852_v22 = vld [vmem:[#allocation8 + $0x6e4] sm:$0xf] }
  0xd9   :  { %v463_v33 = vmax.f32 %v441_v21, 0.0  ;;  %v464_v41 = vmax.f32 %v454_v26, 0.0  ;;  %v3967_v17 = vor.u32 %v4808_v9, %v3964_v10  ;;  %v3644_v18 = vld [vmem:[#allocation8 + $0x310] sm:$0xf0]  ;;  %v3519_v26 = vor.u32 %v4696_v13, %v3516_v14  ;;  %v4844_v57 = vld [vmem:[#allocation8 + $0x6a4] sm:$0xf] }
  0xda   :  { %v3948_v21 = vld [vmem:[#allocation8 + $0x570] sm:$0xf0]  ;;  %v4876_v59 = vld [vmem:[#allocation8 + $0x7a4] sm:$0xf]  ;;  %v3378_v9 = vld [vmem:[#allocation8 + $0xe8] sm:$0xf] }
  0xdb   :  { %v5321_v45 = vpack.c.bf16 %v463_v33, %v463_v33  ;;  %2130 = vmatpush.bf16.msrb.mxu0 %v3263_v23  ;;  %2143 = vmatpush.bf16.msrb.mxu1 %v3391_v24  ;;  %v5323_v46 = vpack.c.bf16 %v464_v41, %v464_v41  ;;  %v4140_v23 = vld [vmem:[#allocation8 + $0x6f0] sm:$0xf0]  ;;  %v4884_v24 = vld [vmem:[#allocation8 + $0x7e4] sm:$0xf]  ;;  %v3951_v29 = vor.u32 %v4804_v20, %v3948_v21  ;;  %v4663_v10 = vld [vmem:[#allocation8 + $0xf4] sm:$0xf0] }
  0xdc   :  { %2152 = vmatpush.bf16.msrb.mxu2 %v3583_v27  ;;  %2165 = vmatpush.bf16.msrb.mxu3 %v3711_v28  ;;  %v3647_v27 = vor.u32 %v4728_v15, %v3644_v18  ;;  %v3823_v28 = vor.u32 %v4772_v19, %v3820_v35  ;;  %v4143_v33 = vor.u32 %v4852_v22, %v4140_v23  ;;  %v4124_v41 = vld [vmem:[#allocation8 + $0x6d0] sm:$0xf0]  ;;  %v4792_v1 = vld [vmem:[#allocation8 + $0x504] sm:$0xf]  ;;  %v3362_v22 = vld [vmem:[#allocation8 + $0xc8] sm:$0xf] }
  0xdd   :  { %2105 = vmatmul.bf16.vlgmr.msra.gmra.mxu2 %v5321_v45  ;;  %v4108_v58 = vld [vmem:[#allocation8 + $0x6b0] sm:$0xf0]  ;;  %v4840_v5 = vld [vmem:[#allocation8 + $0x684] sm:$0xf]  ;;  %v3379_v19 = vor.u32 %v4663_v10, %v3378_v9  ;;  %v4659_v23 = vld [vmem:[#allocation8 + $0xd4] sm:$0xf0] }
  0xde   :  { %2118 = vmatmul.bf16.vlgmr.msra.gmra.mxu3 %v5323_v46  ;;  %v442_v61 = vpop.f32.mrf.mxu2  ;;  %2131 = vmatmul.bf16.vlgmr.msrb.gmra.mxu0 %v5297_v52  ;;  %v455_v62 = vpop.f32.mrf.mxu3  ;;  %v4236_v60 = vld [vmem:[#allocation8 + $0x7b0] sm:$0xf0]  ;;  %v4111_v2 = vor.u32 %v4844_v57, %v4108_v58  ;;  %v4868_v20 = vld [vmem:[#allocation8 + $0x764] sm:$0xf]  ;;  %v3458_v57 = vld [vmem:[#allocation8 + $0x188] sm:$0xf] }
  0xdf   :  { %2175 = vmatpush.bf16.msra.mxu0 %v3887_v34  ;;  %2188 = vmatpush.bf16.msra.mxu1 %v4015_v38  ;;  %v4271_v34 = vor.u32 %v4884_v24, %v4268_v25  ;;  %v4800_v38 = vld [vmem:[#allocation8 + $0x544] sm:$0xf]  ;;  %v3791_v61 = vor.u32 %v4764_v50, %v3788_v51  ;;  %v3919_v62 = vor.u32 %v4796_v55, %v3916_v56  ;;  %v4092_v6 = vld [vmem:[#allocation8 + $0x690] sm:$0xf0]  ;;  %v3490_v24 = vld [vmem:[#allocation8 + $0x1c8] sm:$0xf] }
  0xe0   :  { %2144 = vmatmul.bf16.vlgmr.msrb.gmra.mxu1 %v5299_v48  ;;  %2153 = vmatpush.bf16.msrb.mxu2 %v3567_v47  ;;  %v3807_v47 = vor.u32 %v4768_v30, %v3804_v32  ;;  %v4095_v15 = vor.u32 %v4840_v5, %v4092_v6  ;;  %v4076_v18 = vld [vmem:[#allocation8 + $0x670] sm:$0xf0]  ;;  %v4691_v25 = vld [vmem:[#allocation8 + $0x1d4] sm:$0xf0]  ;;  %v3363_v30 = vor.u32 %v4659_v23, %v3362_v22  ;;  %v3330_v55 = vld [vmem:[#allocation8 + $0x88] sm:$0xf] }
  0xe1   :  { %2166 = vmatpush.bf16.msrb.mxu3 %v3695_v49  ;;  %v3935_v49 = vor.u32 %v4800_v38, %v3932_v39  ;;  %v4204_v21 = vld [vmem:[#allocation8 + $0x770] sm:$0xf0]  ;;  %v3491_v32 = vor.u32 %v4691_v25, %v3490_v24  ;;  %v3346_v38 = vld [vmem:[#allocation8 + $0xa8] sm:$0xf]  ;;  %v4655_v39 = vld [vmem:[#allocation8 + $0xb4] sm:$0xf0] }
  0xe2   :  { %v3347_v50 = vor.u32 %v4655_v39, %v3346_v38  ;;  %v4651_v56 = vld [vmem:[#allocation8 + $0x94] sm:$0xf0]  ;;  %v3442_v5 = vld [vmem:[#allocation8 + $0x168] sm:$0xf] }
  0xe3   :  { %2176 = vmatpush.bf16.msra.mxu0 %v3871_v53  ;;  %2189 = vmatpush.bf16.msra.mxu1 %v3999_v54  ;;  %v4127_v53 = vor.u32 %v4848_v40, %v4124_v41  ;;  %v4255_v54 = vor.u32 %v4880_v43, %v4252_v44  ;;  %v3474_v40 = vld [vmem:[#allocation8 + $0x1a8] sm:$0xf]  ;;  %v4687_v41 = vld [vmem:[#allocation8 + $0x1b4] sm:$0xf0] }
  0xe4   :  { %2154 = vmatpush.bf16.msrb.mxu2 %v3551_v63  ;;  %v4760_v63 = vld [vmem:[#allocation8 + $0x404] sm:$0xf]  ;;  %v3475_v51 = vor.u32 %v4687_v41, %v3474_v40  ;;  %v4683_v58 = vld [vmem:[#allocation8 + $0x194] sm:$0xf0]  ;;  %v3762_v9 = vld [vmem:[#allocation8 + $0x3e8] sm:$0xf] }
  0xe5   :  { %2167 = vmatpush.bf16.msrb.mxu3 %v3679_v0  ;;  %v3772_v0 = vld [vmem:[#allocation8 + $0x410] sm:$0xf0]  ;;  %v4679_v6 = vld [vmem:[#allocation8 + $0x174] sm:$0xf0]  ;;  %v3746_v22 = vld [vmem:[#allocation8 + $0x3c8] sm:$0xf] }
  0xe6   :  { %v3775_v13 = vor.u32 %v4760_v63, %v3772_v0  ;;  %v4856_v63 = vld [vmem:[#allocation8 + $0x704] sm:$0xf]  ;;  %v3331_v0 = vor.u32 %v4651_v56, %v3330_v55  ;;  %v4759_v10 = vld [vmem:[#allocation8 + $0x3f4] sm:$0xf0]  ;;  %v3730_v38 = vld [vmem:[#allocation8 + $0x3a8] sm:$0xf] }
  0xe7   :  { %2177 = vmatpush.bf16.msra.mxu0 %v3855_v3  ;;  %2190 = vmatpush.bf16.msra.mxu1 %v3983_v4  ;;  %v4239_v3 = vor.u32 %v4876_v59, %v4236_v60  ;;  %v3900_v4 = vld [vmem:[#allocation8 + $0x510] sm:$0xf0]  ;;  %v4755_v23 = vld [vmem:[#allocation8 + $0x3d4] sm:$0xf0]  ;;  %v3714_v55 = vld [vmem:[#allocation8 + $0x388] sm:$0xf] }
  0xe8   :  { %2155 = vmatpush.bf16.msrb.mxu2 %v3535_v11  ;;  %v3506_v11 = vld [vmem:[#allocation8 + $0x1e8] sm:$0xf]  ;;  %v3903_v14 = vor.u32 %v4792_v1, %v3900_v4  ;;  %v3459_v1 = vor.u32 %v4683_v58, %v3458_v57  ;;  %v4647_v4 = vld [vmem:[#allocation8 + $0x74] sm:$0xf0] }
  0xe9   :  { %2168 = vmatpush.bf16.msrb.mxu3 %v3663_v12  ;;  %v4695_v12 = vld [vmem:[#allocation8 + $0x1f4] sm:$0xf0]  ;;  %v3890_v57 = vld [vmem:[#allocation8 + $0x4e8] sm:$0xf] }
  0xea   :  { %v3507_v35 = vor.u32 %v4695_v12, %v3506_v11  ;;  %v4751_v39 = vld [vmem:[#allocation8 + $0x3b4] sm:$0xf0] }
  0xeb   :  { %2178 = vmatpush.bf16.msra.mxu0 %v3839_v16  ;;  %2191 = vmatpush.bf16.msra.mxu1 %v3967_v17  ;;  %v4223_v16 = vor.u32 %v4872_v7, %v4220_v8  ;;  %v4836_v17 = vld [vmem:[#allocation8 + $0x664] sm:$0xf]  ;;  %v3634_v7 = vld [vmem:[#allocation8 + $0x2e8] sm:$0xf]  ;;  %v4727_v8 = vld [vmem:[#allocation8 + $0x2f4] sm:$0xf0] }
  0xec   :  { %2156 = vmatpush.bf16.msrb.mxu2 %v3519_v26  ;;  %v4079_v26 = vor.u32 %v4836_v17, %v4076_v18  ;;  %v3635_v17 = vor.u32 %v4727_v8, %v3634_v7  ;;  %v3763_v18 = vor.u32 %v4759_v10, %v3762_v9  ;;  %v4747_v56 = vld [vmem:[#allocation8 + $0x394] sm:$0xf0]  ;;  %v3874_v7 = vld [vmem:[#allocation8 + $0x4c8] sm:$0xf] }
  0xed   :  { %2169 = vmatpush.bf16.msrb.mxu3 %v3647_v27  ;;  %v4207_v27 = vor.u32 %v4868_v20, %v4204_v21  ;;  %v3618_v20 = vld [vmem:[#allocation8 + $0x2c8] sm:$0xf]  ;;  %v4723_v21 = vld [vmem:[#allocation8 + $0x2d4] sm:$0xf0] }
  0xee   :  { %v4791_v58 = vld [vmem:[#allocation8 + $0x4f4] sm:$0xf0]  ;;  %v4002_v9 = vld [vmem:[#allocation8 + $0x5c8] sm:$0xf] }
  0xef   :  { %2179 = vmatpush.bf16.msra.mxu0 %v3823_v28  ;;  %2192 = vmatpush.bf16.msra.mxu1 %v3951_v29  ;;  %v4832_v28 = vld [vmem:[#allocation8 + $0x644] sm:$0xf]  ;;  %v4060_v29 = vld [vmem:[#allocation8 + $0x650] sm:$0xf0]  ;;  %v4787_v8 = vld [vmem:[#allocation8 + $0x4d4] sm:$0xf0] }
  0xf0   :  { %2201 = vmatpush.bf16.msra.mxu2 %v4143_v33  ;;  %2170 = vmatmul.bf16.vlgmr.msrb.gmra.mxu3 %v5313_v42  ;;  %v4864_v33 = vld [vmem:[#allocation8 + $0x744] sm:$0xf]  ;;  %v4063_v43 = vor.u32 %v4832_v28, %v4060_v29  ;;  %v3619_v28 = vor.u32 %v4723_v21, %v3618_v20  ;;  %v3747_v29 = vor.u32 %v4755_v23, %v3746_v22  ;;  %v4819_v10 = vld [vmem:[#allocation8 + $0x5d4] sm:$0xf0]  ;;  %v3986_v20 = vld [vmem:[#allocation8 + $0x5a8] sm:$0xf] }
  0xf1   :  { %2214 = vmatpush.bf16.msra.mxu3 %v4271_v34  ;;  %2157 = vmatmul.bf16.vlgmr.msrb.gmra.mxu2 %v5311_v37  ;;  %v4188_v34 = vld [vmem:[#allocation8 + $0x750] sm:$0xf0]  ;;  %v4815_v21 = vld [vmem:[#allocation8 + $0x5b4] sm:$0xf0] }
  0xf2   :  { %v4191_v44 = vor.u32 %v4864_v33, %v4188_v34  ;;  %v3602_v33 = vld [vmem:[#allocation8 + $0x2a8] sm:$0xf]  ;;  %v4719_v34 = vld [vmem:[#allocation8 + $0x2b4] sm:$0xf0] }
  0xf3   :  { %2180 = vmatpush.bf16.msra.mxu0 %v3807_v47  ;;  %2193 = vmatpush.bf16.msra.mxu1 %v3935_v49  ;;  %v4828_v47 = vld [vmem:[#allocation8 + $0x624] sm:$0xf]  ;;  %v4044_v49 = vld [vmem:[#allocation8 + $0x630] sm:$0xf0] }
  0xf4   :  { %2202 = vmatpush.bf16.msra.mxu2 %v4127_v53  ;;  %v4860_v53 = vld [vmem:[#allocation8 + $0x724] sm:$0xf]  ;;  %v4047_v59 = vor.u32 %v4828_v47, %v4044_v49  ;;  %v3394_v47 = vld [vmem:[#allocation8 + $0x108] sm:$0xf]  ;;  %v3603_v49 = vor.u32 %v4719_v34, %v3602_v33  ;;  %v4811_v34 = vld [vmem:[#allocation8 + $0x594] sm:$0xf0] }
  0xf5   :  { %2215 = vmatpush.bf16.msra.mxu3 %v4255_v54  ;;  %v4172_v54 = vld [vmem:[#allocation8 + $0x730] sm:$0xf0]  ;;  %v3970_v33 = vld [vmem:[#allocation8 + $0x588] sm:$0xf] }
  0xf6   :  { %v4175_v60 = vor.u32 %v4860_v53, %v4172_v54  ;;  %v3586_v53 = vld [vmem:[#allocation8 + $0x288] sm:$0xf]  ;;  %v4715_v54 = vld [vmem:[#allocation8 + $0x294] sm:$0xf0] }
  0xf7   :  { %2181 = vmatpush.bf16.msra.mxu0 %v3791_v61  ;;  %2194 = vmatpush.bf16.msra.mxu1 %v3919_v62  ;;  %v4824_v61 = vld [vmem:[#allocation8 + $0x604] sm:$0xf]  ;;  %v4028_v62 = vld [vmem:[#allocation8 + $0x610] sm:$0xf0] }
  0xf8   :  { %2203 = vmatpush.bf16.msra.mxu2 %v4111_v2  ;;  %v4156_v2 = vld [vmem:[#allocation8 + $0x710] sm:$0xf0]  ;;  %v4031_v11 = vor.u32 %v4824_v61, %v4028_v62 }
  0xf9   :  { %2216 = vmatpush.bf16.msra.mxu3 %v4239_v3  ;;  %v3314_v3 = vld [vmem:[#allocation8 + $0x68] sm:$0xf]  ;;  %v4159_v12 = vor.u32 %v4856_v63, %v4156_v2  ;;  %v3587_v63 = vor.u32 %v4715_v54, %v3586_v53  ;;  %v4711_v2 = vld [vmem:[#allocation8 + $0x274] sm:$0xf0] }
  0xfa   :  { %v3954_v53 = vld [vmem:[#allocation8 + $0x568] sm:$0xf]  ;;  %v4807_v54 = vld [vmem:[#allocation8 + $0x574] sm:$0xf0] }
  0xfb   :  { %2182 = vmatpush.bf16.msra.mxu0 %v3775_v13  ;;  %2195 = vmatpush.bf16.msra.mxu1 %v3903_v14  ;;  %v3315_v13 = vor.u32 %v4647_v4, %v3314_v3  ;;  %v3443_v14 = vor.u32 %v4679_v6, %v3442_v5  ;;  %v3891_v3 = vor.u32 %v4791_v58, %v3890_v57  ;;  %v3698_v5 = vld [vmem:[#allocation8 + $0x368] sm:$0xf]  ;;  %v4743_v6 = vld [vmem:[#allocation8 + $0x374] sm:$0xf0] }
  0xfc   :  { %2204 = vmatpush.bf16.msra.mxu2 %v4095_v15  ;;  %v3298_v15 = vld [vmem:[#allocation8 + $0x48] sm:$0xf]  ;;  %v4887_v58 = vld [vmem:[#allocation8 + $0x7f4] sm:$0xf0] }
  0xfd   :  { %2217 = vmatpush.bf16.msra.mxu3 %v4223_v16  ;;  %v4643_v16 = vld [vmem:[#allocation8 + $0x54] sm:$0xf0]  ;;  %v4274_v57 = vld [vmem:[#allocation8 + $0x7e8] sm:$0xf] }
  0xfe   :  { %2183 = vmatmul.bf16.vlgmr.msra.gmra.mxu0 %v5307_v31  ;;  %2196 = vmatmul.bf16.vlgmr.msra.gmra.mxu1 %v5309_v36  ;;  %v3299_v24 = vor.u32 %v4643_v16, %v3298_v15  ;;  %v3875_v15 = vor.u32 %v4787_v8, %v3874_v7  ;;  %v4003_v16 = vor.u32 %v4819_v10, %v4002_v9  ;;  %v4258_v7 = vld [vmem:[#allocation8 + $0x7c8] sm:$0xf]  ;;  %v4883_v8 = vld [vmem:[#allocation8 + $0x7d4] sm:$0xf0] }
  0xff   :  { %2227 = vmatpush.bf16.msrb.mxu0 %v3379_v19  ;;  %2240 = vmatpush.bf16.msrb.mxu1 %v3507_v35  ;;  %v3426_v19 = vld [vmem:[#allocation8 + $0x148] sm:$0xf]  ;;  %v4675_v35 = vld [vmem:[#allocation8 + $0x154] sm:$0xf0] }
 0x100   :  { %2205 = vmatpush.bf16.msra.mxu2 %v4079_v26  ;;  %v3427_v25 = vor.u32 %v4675_v35, %v3426_v19  ;;  %v3282_v26 = vld [vmem:[#allocation8 + $0x28] sm:$0xf]  ;;  %v4783_v35 = vld [vmem:[#allocation8 + $0x4b4] sm:$0xf0] }
 0x101   :  { %2218 = vmatpush.bf16.msra.mxu3 %v4207_v27  ;;  %v4639_v27 = vld [vmem:[#allocation8 + $0x34] sm:$0xf0]  ;;  %v3858_v19 = vld [vmem:[#allocation8 + $0x4a8] sm:$0xf] }
 0x102   :  { %v3283_v40 = vor.u32 %v4639_v27, %v3282_v26  ;;  %v3859_v26 = vor.u32 %v4783_v35, %v3858_v19  ;;  %v3987_v27 = vor.u32 %v4815_v21, %v3986_v20  ;;  %v4242_v19 = vld [vmem:[#allocation8 + $0x7a8] sm:$0xf]  ;;  %v4879_v35 = vld [vmem:[#allocation8 + $0x7b4] sm:$0xf0] }
 0x103   :  { %2228 = vmatpush.bf16.msrb.mxu0 %v3363_v30  ;;  %2241 = vmatpush.bf16.msrb.mxu1 %v3491_v32  ;;  %v3410_v30 = vld [vmem:[#allocation8 + $0x128] sm:$0xf]  ;;  %v4671_v32 = vld [vmem:[#allocation8 + $0x134] sm:$0xf0] }
 0x104   :  { %2206 = vmatpush.bf16.msra.mxu2 %v4063_v43  ;;  %v3411_v41 = vor.u32 %v4671_v32, %v3410_v30  ;;  %v3266_v43 = vld [vmem:[#allocation8 + $0x8] sm:$0xf]  ;;  %v4779_v32 = vld [vmem:[#allocation8 + $0x494] sm:$0xf0] }
 0x105   :  { %2219 = vmatpush.bf16.msra.mxu3 %v4191_v44  ;;  %v4635_v44 = vld [vmem:[#allocation8 + $0x14] sm:$0xf0]  ;;  %v3842_v30 = vld [vmem:[#allocation8 + $0x488] sm:$0xf] }
 0x106   :  { %v3267_v61 = vor.u32 %v4635_v44, %v3266_v43  ;;  %v3650_v43 = vld [vmem:[#allocation8 + $0x308] sm:$0xf]  ;;  %v3843_v44 = vor.u32 %v4779_v32, %v3842_v30  ;;  %v4875_v32 = vld [vmem:[#allocation8 + $0x794] sm:$0xf0] }
 0x107   :  { %2229 = vmatpush.bf16.msrb.mxu0 %v3347_v50  ;;  %2242 = vmatpush.bf16.msrb.mxu1 %v3475_v51  ;;  %v3731_v50 = vor.u32 %v4751_v39, %v3730_v38  ;;  %v4667_v51 = vld [vmem:[#allocation8 + $0x114] sm:$0xf0]  ;;  %v4226_v30 = vld [vmem:[#allocation8 + $0x788] sm:$0xf] }
 0x108   :  { %2207 = vmatpush.bf16.msra.mxu2 %v4047_v59  ;;  %v4018_v59 = vld [vmem:[#allocation8 + $0x5e8] sm:$0xf]  ;;  %v3395_v62 = vor.u32 %v4667_v51, %v3394_v47  ;;  %v3971_v47 = vor.u32 %v4811_v34, %v3970_v33  ;;  %v4775_v51 = vld [vmem:[#allocation8 + $0x474] sm:$0xf0]  ;;  %v4661_v33 = vld [vmem:[#allocation8 + $0xec] sm:$0xf] }
 0x109   :  { %2220 = vmatpush.bf16.msra.mxu3 %v4175_v60  ;;  %v4823_v60 = vld [vmem:[#allocation8 + $0x5f4] sm:$0xf0]  ;;  %v3380_v34 = vld [vmem:[#allocation8 + $0xf8] sm:$0xf0] }
 0x10a   :  { %v4019_v4 = vor.u32 %v4823_v60, %v4018_v59 }
 0x10b   :  { %2230 = vmatpush.bf16.msrb.mxu0 %v3331_v0  ;;  %2243 = vmatpush.bf16.msrb.mxu1 %v3459_v1  ;;  %v3715_v0 = vor.u32 %v4747_v56, %v3714_v55  ;;  %v3570_v1 = vld [vmem:[#allocation8 + $0x268] sm:$0xf]  ;;  %v4855_v56 = vld [vmem:[#allocation8 + $0x6f4] sm:$0xf0] }
 0x10c   :  { %2208 = vmatpush.bf16.msra.mxu2 %v4031_v11  ;;  %v3571_v11 = vor.u32 %v4711_v2, %v3570_v1  ;;  %v4146_v55 = vld [vmem:[#allocation8 + $0x6e8] sm:$0xf]  ;;  %v4275_v2 = vor.u32 %v4887_v58, %v4274_v57  ;;  %v4689_v57 = vld [vmem:[#allocation8 + $0x1cc] sm:$0xf]  ;;  %v3492_v58 = vld [vmem:[#allocation8 + $0x1d8] sm:$0xf0] }
 0x10d   :  { %2221 = vmatpush.bf16.msra.mxu3 %v4159_v12  ;;  %v3699_v12 = vor.u32 %v4743_v6, %v3698_v5  ;;  %v4147_v1 = vor.u32 %v4855_v56, %v4146_v55  ;;  %v4130_v5 = vld [vmem:[#allocation8 + $0x6c8] sm:$0xf]  ;;  %v4851_v6 = vld [vmem:[#allocation8 + $0x6d4] sm:$0xf0]  ;;  %v4657_v55 = vld [vmem:[#allocation8 + $0xcc] sm:$0xf] }
 0x10e   :  { %v3364_v56 = vld [vmem:[#allocation8 + $0xd8] sm:$0xf0] }
 0x10f   :  { %2231 = vmatpush.bf16.msrb.mxu0 %v3315_v13  ;;  %2244 = vmatpush.bf16.msrb.mxu1 %v3443_v14  ;;  %v3554_v13 = vld [vmem:[#allocation8 + $0x248] sm:$0xf]  ;;  %v4707_v14 = vld [vmem:[#allocation8 + $0x254] sm:$0xf0] }
 0x110   :  { %2253 = vmatpush.bf16.msrb.mxu2 %v3635_v17  ;;  %2222 = vmatmul.bf16.vlgmr.msra.gmra.mxu3 %v5323_v46  ;;  %v3682_v17 = vld [vmem:[#allocation8 + $0x348] sm:$0xf]  ;;  %v3555_v22 = vor.u32 %v4707_v14, %v3554_v13  ;;  %v4131_v13 = vor.u32 %v4851_v6, %v4130_v5  ;;  %v4259_v14 = vor.u32 %v4883_v8, %v4258_v7  ;;  %v3348_v6 = vld [vmem:[#allocation8 + $0xb8] sm:$0xf0]  ;;  %v4685_v7 = vld [vmem:[#allocation8 + $0x1ac] sm:$0xf] }
 0x111   :  { %2266 = vmatpush.bf16.msrb.mxu3 %v3763_v18  ;;  %2209 = vmatmul.bf16.vlgmr.msra.gmra.mxu2 %v5321_v45  ;;  %v4739_v18 = vld [vmem:[#allocation8 + $0x354] sm:$0xf0]  ;;  %v3476_v8 = vld [vmem:[#allocation8 + $0x1b8] sm:$0xf0] }
 0x112   :  { %v3683_v23 = vor.u32 %v4739_v18, %v3682_v17  ;;  %v4114_v17 = vld [vmem:[#allocation8 + $0x6a8] sm:$0xf]  ;;  %v4847_v18 = vld [vmem:[#allocation8 + $0x6b4] sm:$0xf0] }
 0x113   :  { %2232 = vmatpush.bf16.msrb.mxu0 %v3299_v24  ;;  %2245 = vmatpush.bf16.msrb.mxu1 %v3427_v25  ;;  %v3538_v24 = vld [vmem:[#allocation8 + $0x228] sm:$0xf]  ;;  %v4703_v25 = vld [vmem:[#allocation8 + $0x234] sm:$0xf0] }
 0x114   :  { %2254 = vmatpush.bf16.msrb.mxu2 %v3619_v28  ;;  %v3666_v28 = vld [vmem:[#allocation8 + $0x328] sm:$0xf]  ;;  %v3539_v38 = vor.u32 %v4703_v25, %v3538_v24  ;;  %v4115_v25 = vor.u32 %v4847_v18, %v4114_v17 }
 0x115   :  { %2267 = vmatpush.bf16.msrb.mxu3 %v3747_v29  ;;  %v4735_v29 = vld [vmem:[#allocation8 + $0x334] sm:$0xf0]  ;;  %v3906_v24 = vld [vmem:[#allocation8 + $0x508] sm:$0xf] }
 0x116   :  { %v3667_v39 = vor.u32 %v4735_v29, %v3666_v28  ;;  %v4098_v28 = vld [vmem:[#allocation8 + $0x688] sm:$0xf]  ;;  %v4843_v29 = vld [vmem:[#allocation8 + $0x694] sm:$0xf0] }
 0x117   :  { %2233 = vmatpush.bf16.msrb.mxu0 %v3283_v40  ;;  %2246 = vmatpush.bf16.msrb.mxu1 %v3411_v41  ;;  %v3522_v40 = vld [vmem:[#allocation8 + $0x208] sm:$0xf]  ;;  %v4699_v41 = vld [vmem:[#allocation8 + $0x214] sm:$0xf0] }
 0x118   :  { %2255 = vmatpush.bf16.msrb.mxu2 %v3603_v49  ;;  %v4731_v49 = vld [vmem:[#allocation8 + $0x314] sm:$0xf0]  ;;  %v3523_v59 = vor.u32 %v4699_v41, %v3522_v40  ;;  %v4178_v18 = vld [vmem:[#allocation8 + $0x728] sm:$0xf] }
 0x119   :  { %2268 = vmatpush.bf16.msrb.mxu3 %v3731_v50  ;;  %v3826_v50 = vld [vmem:[#allocation8 + $0x468] sm:$0xf]  ;;  %v3651_v60 = vor.u32 %v4731_v49, %v3650_v43  ;;  %v4099_v43 = vor.u32 %v4843_v29, %v4098_v28  ;;  %v4839_v49 = vld [vmem:[#allocation8 + $0x674] sm:$0xf0] }
 0x11a   :  { %v4162_v28 = vld [vmem:[#allocation8 + $0x708] sm:$0xf] }
 0x11b   :  { %2234 = vmatpush.bf16.msrb.mxu0 %v3267_v61  ;;  %2247 = vmatpush.bf16.msrb.mxu1 %v3395_v62  ;;  %v3827_v61 = vor.u32 %v4775_v51, %v3826_v50  ;;  %v3955_v62 = vor.u32 %v4807_v54, %v3954_v53  ;;  %v4210_v50 = vld [vmem:[#allocation8 + $0x768] sm:$0xf]  ;;  %v3383_v51 = vor.u32 %v4661_v33, %v3380_v34  ;;  %v4871_v54 = vld [vmem:[#allocation8 + $0x774] sm:$0xf0]  ;;  %v4645_v33 = vld [vmem:[#allocation8 + $0x6c] sm:$0xf] }
 0x11c   :  { %2256 = vmatpush.bf16.msrb.mxu2 %v3587_v63  ;;  %v3810_v63 = vld [vmem:[#allocation8 + $0x448] sm:$0xf]  ;;  %v3316_v34 = vld [vmem:[#allocation8 + $0x78] sm:$0xf0] }
 0x11d   :  { %2269 = vmatpush.bf16.msrb.mxu3 %v3715_v0  ;;  %v4771_v0 = vld [vmem:[#allocation8 + $0x454] sm:$0xf0] }
 0x11e   :  { %2235 = vmatmul.bf16.vlgmr.msrb.gmra.mxu0 %v5297_v52  ;;  %2248 = vmatmul.bf16.vlgmr.msrb.gmra.mxu1 %v5299_v48  ;;  %v3811_v9 = vor.u32 %v4771_v0, %v3810_v63  ;;  %v4835_v63 = vld [vmem:[#allocation8 + $0x654] sm:$0xf0]  ;;  %v4194_v0 = vld [vmem:[#allocation8 + $0x748] sm:$0xf] }
 0x11f   :  { %2279 = vmatpush.bf16.msra.mxu0 %v3891_v3  ;;  %2292 = vmatpush.bf16.msra.mxu1 %v4019_v4  ;;  %v3938_v3 = vld [vmem:[#allocation8 + $0x548] sm:$0xf]  ;;  %v4803_v4 = vld [vmem:[#allocation8 + $0x554] sm:$0xf0] }
 0x120   :  { %2257 = vmatpush.bf16.msrb.mxu2 %v3571_v11  ;;  %v3939_v10 = vor.u32 %v4803_v4, %v3938_v3  ;;  %v3794_v11 = vld [vmem:[#allocation8 + $0x428] sm:$0xf]  ;;  %v4867_v3 = vld [vmem:[#allocation8 + $0x754] sm:$0xf0]  ;;  %v4653_v4 = vld [vmem:[#allocation8 + $0xac] sm:$0xf] }
 0x121   :  { %2270 = vmatpush.bf16.msrb.mxu3 %v3699_v12  ;;  %v4767_v12 = vld [vmem:[#allocation8 + $0x434] sm:$0xf0] }
 0x122   :  { %v3795_v20 = vor.u32 %v4767_v12, %v3794_v11  ;;  %v4050_v12 = vld [vmem:[#allocation8 + $0x628] sm:$0xf] }
 0x123   :  { %2280 = vmatpush.bf16.msra.mxu0 %v3875_v15  ;;  %2293 = vmatpush.bf16.msra.mxu1 %v4003_v16  ;;  %v3922_v15 = vld [vmem:[#allocation8 + $0x528] sm:$0xf]  ;;  %v4799_v16 = vld [vmem:[#allocation8 + $0x534] sm:$0xf0] }
 0x124   :  { %2258 = vmatpush.bf16.msrb.mxu2 %v3555_v22  ;;  %v3923_v21 = vor.u32 %v4799_v16, %v3922_v15  ;;  %v3778_v22 = vld [vmem:[#allocation8 + $0x408] sm:$0xf]  ;;  %v3479_v15 = vor.u32 %v4685_v7, %v3476_v8  ;;  %v4669_v8 = vld [vmem:[#allocation8 + $0x12c] sm:$0xf] }
 0x125   :  { %2271 = vmatpush.bf16.msrb.mxu3 %v3683_v23  ;;  %v4763_v23 = vld [vmem:[#allocation8 + $0x414] sm:$0xf0] }
 0x126   :  { %v3779_v40 = vor.u32 %v4763_v23, %v3778_v22  ;;  %v3460_v22 = vld [vmem:[#allocation8 + $0x198] sm:$0xf0] }
 0x127   :  { %2281 = vmatpush.bf16.msra.mxu0 %v3859_v26  ;;  %2294 = vmatpush.bf16.msra.mxu1 %v3987_v27  ;;  %v4243_v26 = vor.u32 %v4879_v35, %v4242_v19  ;;  %v4795_v27 = vld [vmem:[#allocation8 + $0x514] sm:$0xf0]  ;;  %v4649_v35 = vld [vmem:[#allocation8 + $0x8c] sm:$0xf] }
 0x128   :  { %2259 = vmatpush.bf16.msrb.mxu2 %v3539_v38  ;;  %v4693_v38 = vld [vmem:[#allocation8 + $0x1ec] sm:$0xf]  ;;  %v3907_v41 = vor.u32 %v4795_v27, %v3906_v24  ;;  %v4863_v19 = vld [vmem:[#allocation8 + $0x734] sm:$0xf0] }
 0x129   :  { %2272 = vmatpush.bf16.msrb.mxu3 %v3667_v39  ;;  %v3508_v39 = vld [vmem:[#allocation8 + $0x1f8] sm:$0xf0]  ;;  %v4827_v27 = vld [vmem:[#allocation8 + $0x614] sm:$0xf0] }
 0x12a   :  { %v3511_v53 = vor.u32 %v4693_v38, %v3508_v39  ;;  %v4677_v38 = vld [vmem:[#allocation8 + $0x16c] sm:$0xf]  ;;  %v3444_v39 = vld [vmem:[#allocation8 + $0x178] sm:$0xf0] }
 0x12b   :  { %2282 = vmatpush.bf16.msra.mxu0 %v3843_v44  ;;  %2295 = vmatpush.bf16.msra.mxu1 %v3971_v47  ;;  %v4227_v44 = vor.u32 %v4875_v32, %v4226_v30  ;;  %v4082_v47 = vld [vmem:[#allocation8 + $0x668] sm:$0xf]  ;;  %v4859_v32 = vld [vmem:[#allocation8 + $0x714] sm:$0xf0] }
 0x12c   :  { %2260 = vmatpush.bf16.msrb.mxu2 %v3523_v59  ;;  %v5339_v59 = vld [vmem:[#allocation10] sm:$0xf] }
 0x12d   :  { %2273 = vmatpush.bf16.msrb.mxu3 %v3651_v60  ;;  %v4083_v60 = vor.u32 %v4839_v49, %v4082_v47  ;;  %v731_v5 = vperm.slane %v5339_v59, 0  ;;  %v4163_v49 = vor.u32 %v4859_v32, %v4162_v28  ;;  %v4789_v28 = vld [vmem:[#allocation8 + $0x4ec] sm:$0xf]  ;;  %v4020_v32 = vld [vmem:[#allocation8 + $0x5f8] sm:$0xf0] }
 0x12f   :  { %2283 = vmatpush.bf16.msra.mxu0 %v3827_v61  ;;  %2296 = vmatpush.bf16.msra.mxu1 %v3955_v62  ;;  %v4211_v61 = vor.u32 %v4871_v54, %v4210_v50  ;;  %v4066_v62 = vld [vmem:[#allocation8 + $0x648] sm:$0xf] }
 0x130   :  { %2305 = vmatpush.bf16.msra.mxu2 %v4147_v1  ;;  %2274 = vmatmul.bf16.vlgmr.msrb.gmra.mxu3 %v5313_v42  ;;  %v3367_v1 = vor.u32 %v4657_v55, %v3364_v56  ;;  %v4641_v55 = vld [vmem:[#allocation8 + $0x4c] sm:$0xf]  ;;  %v3300_v56 = vld [vmem:[#allocation8 + $0x58] sm:$0xf0] }
 0x131   :  { %2318 = vmatpush.bf16.msra.mxu3 %v4275_v2  ;;  %2261 = vmatmul.bf16.vlgmr.msrb.gmra.mxu2 %v5311_v37  ;;  %v3495_v2 = vor.u32 %v4689_v57, %v3492_v58 }
 0x133   :  { %2284 = vmatpush.bf16.msra.mxu0 %v3811_v9  ;;  %2297 = vmatpush.bf16.msra.mxu1 %v3939_v10  ;;  %v4067_v9 = vor.u32 %v4835_v63, %v4066_v62  ;;  %v4195_v10 = vor.u32 %v4867_v3, %v4194_v0  ;;  %v4721_v62 = vld [vmem:[#allocation8 + $0x2cc] sm:$0xf]  ;;  %v3620_v63 = vld [vmem:[#allocation8 + $0x2d8] sm:$0xf0] }
 0x134   :  { %2306 = vmatpush.bf16.msra.mxu2 %v4131_v13  ;;  %v4831_v13 = vld [vmem:[#allocation8 + $0x634] sm:$0xf0]  ;;  %v4753_v0 = vld [vmem:[#allocation8 + $0x3cc] sm:$0xf] }
 0x135   :  { %2319 = vmatpush.bf16.msra.mxu3 %v4259_v14  ;;  %v3351_v14 = vor.u32 %v4653_v4, %v3348_v6  ;;  %v4051_v24 = vor.u32 %v4831_v13, %v4050_v12  ;;  %v4637_v4 = vld [vmem:[#allocation8 + $0x2c] sm:$0xf]  ;;  %v3623_v6 = vor.u32 %v4721_v62, %v3620_v63  ;;  %v3732_v13 = vld [vmem:[#allocation8 + $0x3b8] sm:$0xf0] }
 0x136   :  { %v4749_v12 = vld [vmem:[#allocation8 + $0x3ac] sm:$0xf]  ;;  %v3556_v63 = vld [vmem:[#allocation8 + $0x258] sm:$0xf0] }
 0x137   :  { %2285 = vmatpush.bf16.msra.mxu0 %v3795_v20  ;;  %2298 = vmatpush.bf16.msra.mxu1 %v3923_v21  ;;  %v3332_v20 = vld [vmem:[#allocation8 + $0x98] sm:$0xf0]  ;;  %v4681_v21 = vld [vmem:[#allocation8 + $0x18c] sm:$0xf] }
 0x138   :  { %2307 = vmatpush.bf16.msra.mxu2 %v4115_v25  ;;  %v4179_v25 = vor.u32 %v4863_v19, %v4178_v18  ;;  %v3335_v29 = vor.u32 %v4649_v35, %v3332_v20  ;;  %v3463_v30 = vor.u32 %v4681_v21, %v3460_v22  ;;  %v4633_v18 = vld [vmem:[#allocation8 + $0xc] sm:$0xf]  ;;  %v3268_v19 = vld [vmem:[#allocation8 + $0x18] sm:$0xf0]  ;;  %v3735_v21 = vor.u32 %v4749_v12, %v3732_v13 }
 0x139   :  { %2320 = vmatpush.bf16.msra.mxu3 %v4243_v26  ;;  %v4034_v26 = vld [vmem:[#allocation8 + $0x608] sm:$0xf]  ;;  %v4665_v35 = vld [vmem:[#allocation8 + $0x10c] sm:$0xf]  ;;  %v3396_v22 = vld [vmem:[#allocation8 + $0x118] sm:$0xf0] }
 0x13a   :  { %v2028_v11 = vpop.f32.mrf.mxu0  ;;  %v2041_v17 = vpop.f32.mrf.mxu1  ;;  %v4035_v47 = vor.u32 %v4827_v27, %v4034_v26  ;;  %v4745_v26 = vld [vmem:[#allocation8 + $0x38c] sm:$0xf]  ;;  %v3716_v27 = vld [vmem:[#allocation8 + $0x398] sm:$0xf0] }
 0x13b   :  { %2286 = vmatpush.bf16.msra.mxu0 %v3779_v40  ;;  %2299 = vmatpush.bf16.msra.mxu1 %v3907_v41  ;;  %v2029_v16 = vadd.f32 %v2028_v11, %v731_v5  ;;  %v4725_v40 = vld [vmem:[#allocation8 + $0x2ec] sm:$0xf]  ;;  %v3636_v41 = vld [vmem:[#allocation8 + $0x2f8] sm:$0xf0] }
 0x13c   :  { %2308 = vmatpush.bf16.msra.mxu2 %v4099_v43  ;;  %v4757_v43 = vld [vmem:[#allocation8 + $0x3ec] sm:$0xf]  ;;  %v3639_v57 = vor.u32 %v4725_v40, %v3636_v41  ;;  %v3284_v5 = vld [vmem:[#allocation8 + $0x38] sm:$0xf0] }
 0x13d   :  { %2321 = vmatpush.bf16.msra.mxu3 %v4227_v44  ;;  %v5344_v23 = vadd.f32 %v2041_v17, %v2029_v16  ;;  %v3764_v44 = vld [vmem:[#allocation8 + $0x3f8] sm:$0xf0]  ;;  %v4709_v41 = vld [vmem:[#allocation8 + $0x26c] sm:$0xf] }
 0x13e   :  { %2287 = vmatmul.bf16.vlgmr.msra.gmra.mxu0 %v5307_v31  ;;  %2300 = vmatmul.bf16.vlgmr.msra.gmra.mxu1 %v5309_v36  ;;  %v3767_v58 = vor.u32 %v4757_v43, %v3764_v44  ;;  %v3604_v11 = vld [vmem:[#allocation8 + $0x2b8] sm:$0xf0]  ;;  %v4705_v62 = vld [vmem:[#allocation8 + $0x24c] sm:$0xf] }
 0x13f   :  { %2331 = vmatpush.bf16.msrb.mxu0 %v3383_v51  ;;  %2344 = vmatpush.bf16.msrb.mxu1 %v3511_v53  ;;  %v3319_v51 = vor.u32 %v4645_v33, %v3316_v34  ;;  %v3447_v53 = vor.u32 %v4677_v38, %v3444_v39  ;;  %v3271_v33 = vor.u32 %v4633_v18, %v3268_v19  ;;  %v3572_v43 = vld [vmem:[#allocation8 + $0x278] sm:$0xf0]  ;;  %v4733_v18 = vld [vmem:[#allocation8 + $0x32c] sm:$0xf] }
 0x140   :  { %2309 = vmatpush.bf16.msra.mxu2 %v4083_v60  ;;  %v4673_v60 = vld [vmem:[#allocation8 + $0x14c] sm:$0xf]  ;;  %v3399_v34 = vor.u32 %v4665_v35, %v3396_v22  ;;  %v3719_v39 = vor.u32 %v4745_v26, %v3716_v27  ;;  %v3540_v12 = vld [vmem:[#allocation8 + $0x238] sm:$0xf0] }
 0x141   :  { %2322 = vmatpush.bf16.msra.mxu3 %v4211_v61  ;;  %v3428_v61 = vld [vmem:[#allocation8 + $0x158] sm:$0xf0]  ;;  %v4697_v26 = vld [vmem:[#allocation8 + $0x20c] sm:$0xf] }
 0x142   :  { %v2030_v50 = vpop.f32.mrf.mxu0  ;;  %v2043_v54 = vpop.f32.mrf.mxu1  ;;  %v3431_v3 = vor.u32 %v4673_v60, %v3428_v61  ;;  %v3575_v60 = vor.u32 %v4709_v41, %v3572_v43  ;;  %v3668_v19 = vld [vmem:[#allocation8 + $0x338] sm:$0xf0]  ;;  %v4853_v41 = vld [vmem:[#allocation8 + $0x6ec] sm:$0xf] }
 0x143   :  { %2332 = vmatpush.bf16.msrb.mxu0 %v3367_v1  ;;  %2345 = vmatpush.bf16.msrb.mxu1 %v3495_v2  ;;  %v3748_v1 = vld [vmem:[#allocation8 + $0x3d8] sm:$0xf0]  ;;  %v3303_v2 = vor.u32 %v4641_v55, %v3300_v56  ;;  %v4741_v50 = vld [vmem:[#allocation8 + $0x36c] sm:$0xf]  ;;  %v3671_v22 = vor.u32 %v4733_v18, %v3668_v19 }
 0x144   :  { %2310 = vmatpush.bf16.msra.mxu2 %v4067_v9  ;;  %v3751_v7 = vor.u32 %v4753_v0, %v3748_v1  ;;  %v3412_v9 = vld [vmem:[#allocation8 + $0x138] sm:$0xf0]  ;;  %v4817_v56 = vld [vmem:[#allocation8 + $0x5cc] sm:$0xf] }
 0x145   :  { %2323 = vmatpush.bf16.msra.mxu3 %v4195_v10  ;;  %v4717_v10 = vld [vmem:[#allocation8 + $0x2ac] sm:$0xf]  ;;  %v3415_v16 = vor.u32 %v4669_v8, %v3412_v9  ;;  %v3876_v55 = vld [vmem:[#allocation8 + $0x4d8] sm:$0xf0]  ;;  %v3559_v8 = vor.u32 %v4705_v62, %v3556_v63 }
 0x146   :  { %v3607_v20 = vor.u32 %v4717_v10, %v3604_v11  ;;  %v4701_v11 = vld [vmem:[#allocation8 + $0x22c] sm:$0xf]  ;;  %v3844_v35 = vld [vmem:[#allocation8 + $0x498] sm:$0xf0] }
 0x147   :  { %2333 = vmatpush.bf16.msrb.mxu0 %v3351_v14  ;;  %2346 = vmatpush.bf16.msrb.mxu1 %v3479_v15  ;;  %v3287_v15 = vor.u32 %v4637_v4, %v3284_v5  ;;  %v4781_v4 = vld [vmem:[#allocation8 + $0x4ac] sm:$0xf]  ;;  %v3860_v5 = vld [vmem:[#allocation8 + $0x4b8] sm:$0xf0] }
 0x148   :  { %2311 = vmatpush.bf16.msra.mxu2 %v4051_v24  ;;  %v4713_v24 = vld [vmem:[#allocation8 + $0x28c] sm:$0xf]  ;;  %v3863_v13 = vor.u32 %v4781_v4, %v3860_v5  ;;  %v3524_v27 = vld [vmem:[#allocation8 + $0x218] sm:$0xf0] }
 0x149   :  { %2324 = vmatpush.bf16.msra.mxu3 %v4179_v25  ;;  %v3588_v25 = vld [vmem:[#allocation8 + $0x298] sm:$0xf0]  ;;  %v4801_v62 = vld [vmem:[#allocation8 + $0x54c] sm:$0xf] }
 0x14a   :  { %v5348_v14 = vpop.f32.mrf.mxu0  ;;  %v3591_v38 = vor.u32 %v4713_v24, %v3588_v25  ;;  %v4148_v43 = vld [vmem:[#allocation8 + $0x6f8] sm:$0xf0]  ;;  %v4877_v18 = vld [vmem:[#allocation8 + $0x7ac] sm:$0xf] }
 0x14b   :  { %2334 = vmatpush.bf16.msrb.mxu0 %v3335_v29  ;;  %2347 = vmatpush.bf16.msrb.mxu1 %v3463_v30  ;;  %v5350_v17 = vpop.f32.mrf.mxu1  ;;  %v3892_v29 = vld [vmem:[#allocation8 + $0x4f8] sm:$0xf0]  ;;  %v4821_v30 = vld [vmem:[#allocation8 + $0x5ec] sm:$0xf] }
 0x14c   :  { %2312 = vmatpush.bf16.msra.mxu2 %v4035_v47  ;;  %v3895_v44 = vor.u32 %v4789_v28, %v3892_v29  ;;  %v4023_v47 = vor.u32 %v4821_v30, %v4020_v32  ;;  %v4729_v28 = vld [vmem:[#allocation8 + $0x30c] sm:$0xf]  ;;  %v3652_v32 = vld [vmem:[#allocation8 + $0x318] sm:$0xf0] }
 0x14d   :  { %2325 = vmatpush.bf16.msra.mxu3 %v4163_v49  ;;  %v3940_v63 = vld [vmem:[#allocation8 + $0x558] sm:$0xf0] }
 0x14e   :  { %v4244_v19 = vld [vmem:[#allocation8 + $0x7b8] sm:$0xf0] }
 0x14f   :  { %2335 = vmatpush.bf16.msrb.mxu0 %v3319_v51  ;;  %2348 = vmatpush.bf16.msrb.mxu1 %v3447_v53  ;;  %v3700_v51 = vld [vmem:[#allocation8 + $0x378] sm:$0xf0]  ;;  %v4785_v53 = vld [vmem:[#allocation8 + $0x4cc] sm:$0xf] }
 0x150   :  { %2357 = vmatpush.bf16.msrb.mxu2 %v3639_v57  ;;  %2326 = vmatmul.bf16.vlgmr.msra.gmra.mxu3 %v5323_v46  ;;  %v5352_v40 = vpop.f32.mrf.mxu2  ;;  %v4004_v57 = vld [vmem:[#allocation8 + $0x5d8] sm:$0xf0]  ;;  %v3703_v61 = vor.u32 %v4741_v50, %v3700_v51  ;;  %v3879_v0 = vor.u32 %v4785_v53, %v3876_v55  ;;  %v3527_v50 = vor.u32 %v4697_v26, %v3524_v27  ;;  %v4793_v26 = vld [vmem:[#allocation8 + $0x50c] sm:$0xf] }
 0x151   :  { %2370 = vmatpush.bf16.msrb.mxu3 %v3767_v58  ;;  %2313 = vmatmul.bf16.vlgmr.msra.gmra.mxu2 %v5321_v45  ;;  %v5354_v49 = vpop.f32.mrf.mxu3  ;;  %v4007_v1 = vor.u32 %v4817_v56, %v4004_v57  ;;  %v3655_v51 = vor.u32 %v4729_v28, %v3652_v32  ;;  %v4769_v57 = vld [vmem:[#allocation8 + $0x44c] sm:$0xf]  ;;  %v4247_v28 = vor.u32 %v4877_v18, %v4244_v19  ;;  %v4228_v32 = vld [vmem:[#allocation8 + $0x798] sm:$0xf0] }
 0x152   :  { %v2082_v54 = vpop.f32.mrf.mxu0  ;;  %v4829_v19 = vld [vmem:[#allocation8 + $0x62c] sm:$0xf] }
 0x153   :  { %2336 = vmatpush.bf16.msrb.mxu0 %v3303_v2  ;;  %2349 = vmatpush.bf16.msrb.mxu1 %v3431_v3  ;;  %v2095_v58 = vpop.f32.mrf.mxu1  ;;  %v4737_v2 = vld [vmem:[#allocation8 + $0x34c] sm:$0xf]  ;;  %v3684_v3 = vld [vmem:[#allocation8 + $0x358] sm:$0xf0] }
 0x154   :  { %2358 = vmatpush.bf16.msrb.mxu2 %v3623_v6  ;;  %v4813_v6 = vld [vmem:[#allocation8 + $0x5ac] sm:$0xf]  ;;  %v3687_v9 = vor.u32 %v4737_v2, %v3684_v3  ;;  %v3812_v58 = vld [vmem:[#allocation8 + $0x458] sm:$0xf0] }
 0x155   :  { %2371 = vmatpush.bf16.msrb.mxu3 %v3751_v7  ;;  %v3988_v7 = vld [vmem:[#allocation8 + $0x5b8] sm:$0xf0]  ;;  %v4881_v2 = vld [vmem:[#allocation8 + $0x7cc] sm:$0xf] }
 0x156   :  { %v4260_v3 = vld [vmem:[#allocation8 + $0x7d8] sm:$0xf0] }
 0x157   :  { %2337 = vmatpush.bf16.msrb.mxu0 %v3287_v15  ;;  %2350 = vmatpush.bf16.msrb.mxu1 %v3415_v16  ;;  %v3991_v15 = vor.u32 %v4813_v6, %v3988_v7  ;;  %v3815_v6 = vor.u32 %v4769_v57, %v3812_v58  ;;  %v3943_v7 = vor.u32 %v4801_v62, %v3940_v63  ;;  %v4869_v57 = vld [vmem:[#allocation8 + $0x76c] sm:$0xf]  ;;  %v4212_v58 = vld [vmem:[#allocation8 + $0x778] sm:$0xf0]  ;;  %v4394_v62 = vld [vmem:[#allocation11 + $0xe0] sm:$0xf] }
 0x158   :  { %2359 = vmatpush.bf16.msrb.mxu2 %v3607_v20  ;;  %v2056_v10 = vpop.f32.mrf.mxu2  ;;  %v3972_v20 = vld [vmem:[#allocation8 + $0x598] sm:$0xf0]  ;;  %v4917_v63 = vld [vmem:[#allocation11 + $0xe4] sm:$0xf0] }
 0x159   :  { %2372 = vmatpush.bf16.msrb.mxu3 %v3735_v21  ;;  %v2069_v16 = vpop.f32.mrf.mxu3  ;;  %v3543_v21 = vor.u32 %v4701_v11, %v3540_v12  ;;  %v4263_v11 = vor.u32 %v4881_v2, %v4260_v3  ;;  %v4797_v12 = vld [vmem:[#allocation8 + $0x52c] sm:$0xf] }
 0x15a   :  { %v4116_v16 = vld [vmem:[#allocation8 + $0x6b8] sm:$0xf0] }
 0x15b   :  { %2338 = vmatpush.bf16.msrb.mxu0 %v3271_v33  ;;  %2351 = vmatpush.bf16.msrb.mxu1 %v3399_v34  ;;  %v5358_v24 = vpop.f32.mrf.mxu0  ;;  %v4773_v33 = vld [vmem:[#allocation8 + $0x46c] sm:$0xf]  ;;  %v3828_v34 = vld [vmem:[#allocation8 + $0x478] sm:$0xf0] }
 0x15c   :  { %2360 = vmatpush.bf16.msrb.mxu2 %v3591_v38  ;;  %v4805_v38 = vld [vmem:[#allocation8 + $0x56c] sm:$0xf]  ;;  %v3831_v53 = vor.u32 %v4773_v33, %v3828_v34  ;;  %v4338_v33 = vld [vmem:[#allocation11 + $0x70] sm:$0xf]  ;;  %v4903_v34 = vld [vmem:[#allocation11 + $0x74] sm:$0xf0] }
 0x15d   :  { %2373 = vmatpush.bf16.msrb.mxu3 %v3719_v39  ;;  %v5360_v25 = vpop.f32.mrf.mxu1  ;;  %v3956_v39 = vld [vmem:[#allocation8 + $0x578] sm:$0xf0] }
 0x15e   :  { %2339 = vmatmul.bf16.vlgmr.msrb.gmra.mxu0 %v5297_v52  ;;  %2352 = vmatmul.bf16.vlgmr.msrb.gmra.mxu1 %v5299_v48  ;;  %v4777_v52 = vld [vmem:[#allocation8 + $0x48c] sm:$0xf]  ;;  %v3959_v54 = vor.u32 %v4805_v38, %v3956_v39  ;;  %v4402_v38 = vld [vmem:[#allocation11 + $0xf0] sm:$0xf]  ;;  %v4919_v39 = vld [vmem:[#allocation11 + $0xf4] sm:$0xf0] }
 0x15f   :  { %2383 = vmatpush.bf16.msra.mxu0 %v3895_v44  ;;  %2396 = vmatpush.bf16.msra.mxu1 %v4023_v47  ;;  %v4809_v48 = vld [vmem:[#allocation8 + $0x58c] sm:$0xf]  ;;  %v3847_v29 = vor.u32 %v4777_v52, %v3844_v35  ;;  %v4276_v47 = vld [vmem:[#allocation8 + $0x7f8] sm:$0xf0] }
 0x160   :  { %2361 = vmatpush.bf16.msrb.mxu2 %v3575_v60  ;;  %v3975_v30 = vor.u32 %v4809_v48, %v3972_v20  ;;  %v4885_v44 = vld [vmem:[#allocation8 + $0x7ec] sm:$0xf]  ;;  %v5362_v55 = vpop.f32.mrf.mxu2  ;;  %v4151_v60 = vor.u32 %v4853_v41, %v4148_v43 }
 0x161   :  { %2374 = vmatpush.bf16.msrb.mxu3 %v3703_v61  ;;  %v5364_v56 = vpop.f32.mrf.mxu3  ;;  %v4279_v61 = vor.u32 %v4885_v44, %v4276_v47 }
 0x163   :  { %2384 = vmatpush.bf16.msra.mxu0 %v3879_v0  ;;  %2397 = vmatpush.bf16.msra.mxu1 %v4007_v1  ;;  %v4849_v0 = vld [vmem:[#allocation8 + $0x6cc] sm:$0xf]  ;;  %v4132_v1 = vld [vmem:[#allocation8 + $0x6d8] sm:$0xf0]  ;;  %v2134_v4 = vpop.f32.mrf.mxu0 }
 0x164   :  { %2362 = vmatpush.bf16.msrb.mxu2 %v3559_v8  ;;  %v4765_v8 = vld [vmem:[#allocation8 + $0x42c] sm:$0xf]  ;;  %v4135_v10 = vor.u32 %v4849_v0, %v4132_v1  ;;  %v4215_v1 = vor.u32 %v4869_v57, %v4212_v58  ;;  %v4298_v58 = vld [vmem:[#allocation11 + $0x20] sm:$0xf] }
 0x165   :  { %2375 = vmatpush.bf16.msrb.mxu3 %v3687_v9  ;;  %v2147_v5 = vpop.f32.mrf.mxu1  ;;  %v3796_v9 = vld [vmem:[#allocation8 + $0x438] sm:$0xf0]  ;;  %v4833_v4 = vld [vmem:[#allocation8 + $0x64c] sm:$0xf] }
 0x166   :  { %v3799_v52 = vor.u32 %v4765_v8, %v3796_v9  ;;  %v4068_v5 = vld [vmem:[#allocation8 + $0x658] sm:$0xf0]  ;;  %v4865_v8 = vld [vmem:[#allocation8 + $0x74c] sm:$0xf] }
 0x167   :  { %2385 = vmatpush.bf16.msra.mxu0 %v3863_v13  ;;  %2398 = vmatpush.bf16.msra.mxu1 %v3991_v15  ;;  %v3924_v13 = vld [vmem:[#allocation8 + $0x538] sm:$0xf0]  ;;  %v4845_v15 = vld [vmem:[#allocation8 + $0x6ac] sm:$0xf] }
 0x168   :  { %2363 = vmatpush.bf16.msrb.mxu2 %v3543_v21  ;;  %v3927_v35 = vor.u32 %v4797_v12, %v3924_v13  ;;  %v2108_v48 = vpop.f32.mrf.mxu2  ;;  %v4761_v21 = vld [vmem:[#allocation8 + $0x40c] sm:$0xf]  ;;  %v4119_v27 = vor.u32 %v4845_v15, %v4116_v16  ;;  %v4196_v9 = vld [vmem:[#allocation8 + $0x758] sm:$0xf0]  ;;  %v4386_v12 = vld [vmem:[#allocation11 + $0xd0] sm:$0xf]  ;;  %v2055_v15 = vadd.f32 %v5352_v40, %v5344_v23  ;;  %v4071_v16 = vor.u32 %v4833_v4, %v4068_v5 }
 0x169   :  { %2376 = vmatpush.bf16.msrb.mxu3 %v3671_v22  ;;  %v2121_v20 = vpop.f32.mrf.mxu3  ;;  %v3780_v22 = vld [vmem:[#allocation8 + $0x418] sm:$0xf0]  ;;  %v4199_v18 = vor.u32 %v4865_v8, %v4196_v9  ;;  %v732_v40 = vperm.slane %v5339_v59, 1  ;;  %v4354_v8 = vld [vmem:[#allocation11 + $0x90] sm:$0xf] }
 0x16a   :  { %v3783_v41 = vor.u32 %v4761_v21, %v3780_v22  ;;  %v4915_v13 = vld [vmem:[#allocation11 + $0xd4] sm:$0xf0]  ;;  %v4861_v20 = vld [vmem:[#allocation8 + $0x72c] sm:$0xf]  ;;  %v4314_v21 = vld [vmem:[#allocation11 + $0x40] sm:$0xf] }
 0x16b   :  { %2386 = vmatpush.bf16.msra.mxu0 %v3847_v29  ;;  %2399 = vmatpush.bf16.msra.mxu1 %v3975_v30  ;;  %v3908_v29 = vld [vmem:[#allocation8 + $0x518] sm:$0xf0]  ;;  %v4387_v48 = vor.u32 %v4915_v13, %v4386_v12  ;;  %v4378_v22 = vld [vmem:[#allocation11 + $0xc0] sm:$0xf]  ;;  %v4889_v12 = vld [vmem:[#allocation11 + $0x4] sm:$0xf0] }
 0x16c   :  { %2364 = vmatpush.bf16.msrb.mxu2 %v3527_v50  ;;  %v4100_v30 = vld [vmem:[#allocation8 + $0x698] sm:$0xf0]  ;;  %v3911_v43 = vor.u32 %v4793_v26, %v3908_v29  ;;  %v4837_v50 = vld [vmem:[#allocation8 + $0x66c] sm:$0xf]  ;;  %v4346_v13 = vld [vmem:[#allocation11 + $0x80] sm:$0xf] }
 0x16d   :  { %2377 = vmatpush.bf16.msrb.mxu3 %v3655_v51  ;;  %v4084_v51 = vld [vmem:[#allocation8 + $0x678] sm:$0xf0]  ;;  %v4913_v26 = vld [vmem:[#allocation11 + $0xc4] sm:$0xf0] }
 0x16e   :  { %v4087_v0 = vor.u32 %v4837_v50, %v4084_v51  ;;  %v2133_v50 = vadd.f32 %v5358_v24, %v732_v40  ;;  %v4907_v9 = vld [vmem:[#allocation11 + $0x94] sm:$0xf0]  ;;  %v4332_v40 = vld [vmem:[#allocation11 + $0x68] sm:$0xf0] }
 0x16f   :  { %2387 = vmatpush.bf16.msra.mxu0 %v3831_v53  ;;  %2400 = vmatpush.bf16.msra.mxu1 %v3959_v54  ;;  %v4339_v53 = vor.u32 %v4903_v34, %v4338_v33  ;;  %v4403_v54 = vor.u32 %v4919_v39, %v4402_v38  ;;  %v4036_v33 = vld [vmem:[#allocation8 + $0x618] sm:$0xf0]  ;;  %v4379_v38 = vor.u32 %v4913_v26, %v4378_v22  ;;  %v4857_v39 = vld [vmem:[#allocation8 + $0x70c] sm:$0xf]  ;;  %v4900_v22 = vld [vmem:[#allocation11 + $0x64] sm:$0xf] }
 0x170   :  { %2409 = vmatpush.bf16.msra.mxu2 %v4151_v60  ;;  %2378 = vmatmul.bf16.vlgmr.msrb.gmra.mxu3 %v5313_v42  ;;  %v4873_v42 = vld [vmem:[#allocation8 + $0x78c] sm:$0xf]  ;;  %v4330_v60 = vld [vmem:[#allocation11 + $0x60] sm:$0xf] }
 0x171   :  { %2422 = vmatpush.bf16.msra.mxu3 %v4279_v61  ;;  %2365 = vmatmul.bf16.vlgmr.msrb.gmra.mxu2 %v5311_v37  ;;  %v4841_v37 = vld [vmem:[#allocation8 + $0x68c] sm:$0xf]  ;;  %v4231_v47 = vor.u32 %v4873_v42, %v4228_v32  ;;  %v4458_v26 = vld [vmem:[#allocation11 + $0x160] sm:$0xf] }
 0x172   :  { %v4103_v44 = vor.u32 %v4841_v37, %v4100_v30  ;;  %v4901_v61 = vld [vmem:[#allocation11 + $0x64] sm:$0xf0] }
 0x173   :  { %2388 = vmatpush.bf16.msra.mxu0 %v3815_v6  ;;  %2401 = vmatpush.bf16.msra.mxu1 %v3943_v7  ;;  %v5370_v3 = vpop.f32.mrf.mxu3  ;;  %v4331_v6 = vor.u32 %v4901_v61, %v4330_v60  ;;  %v4395_v7 = vor.u32 %v4917_v63, %v4394_v62  ;;  %v4825_v32 = vld [vmem:[#allocation8 + $0x60c] sm:$0xf]  ;;  %v4362_v61 = vld [vmem:[#allocation11 + $0xa0] sm:$0xf] }
 0x174   :  { %2410 = vmatpush.bf16.msra.mxu2 %v4135_v10  ;;  %v5368_v2 = vpop.f32.mrf.mxu2  ;;  %v4322_v10 = vld [vmem:[#allocation11 + $0x50] sm:$0xf]  ;;  %v4039_v51 = vor.u32 %v4825_v32, %v4036_v33  ;;  %v4893_v60 = vld [vmem:[#allocation11 + $0x24] sm:$0xf0]  ;;  %v4335_v33 = vor.u32 %v4900_v22, %v4332_v40  ;;  %v4356_v22 = vld [vmem:[#allocation11 + $0x98] sm:$0xf0] }
 0x175   :  { %2423 = vmatpush.bf16.msra.mxu3 %v4263_v11  ;;  %v4899_v11 = vld [vmem:[#allocation11 + $0x54] sm:$0xf0]  ;;  %v4909_v62 = vld [vmem:[#allocation11 + $0xa4] sm:$0xf0]  ;;  %v4299_v4 = vor.u32 %v4893_v60, %v4298_v58  ;;  %v4316_v58 = vld [vmem:[#allocation11 + $0x48] sm:$0xf0] }
 0x176   :  { %v4363_v5 = vor.u32 %v4909_v62, %v4362_v61  ;;  %v4912_v61 = vld [vmem:[#allocation11 + $0xc4] sm:$0xf]  ;;  %v4380_v62 = vld [vmem:[#allocation11 + $0xc8] sm:$0xf0]  ;;  %v4921_v40 = vld [vmem:[#allocation11 + $0x104] sm:$0xf0] }
 0x177   :  { %2389 = vmatpush.bf16.msra.mxu0 %v3799_v52  ;;  %2402 = vmatpush.bf16.msra.mxu1 %v3927_v35  ;;  %v4052_v52 = vld [vmem:[#allocation8 + $0x638] sm:$0xf0]  ;;  %v4323_v35 = vor.u32 %v4899_v11, %v4322_v10  ;;  %v4355_v11 = vor.u32 %v4907_v9, %v4354_v8  ;;  %v4434_v8 = vld [vmem:[#allocation11 + $0x130] sm:$0xf] }
 0x178   :  { %2411 = vmatpush.bf16.msra.mxu2 %v4119_v27  ;;  %v2068_v27 = vadd.f32 %v5354_v49, %v2055_v15  ;;  %v4055_v29 = vor.u32 %v4829_v19, %v4052_v52  ;;  %v4164_v49 = vld [vmem:[#allocation8 + $0x718] sm:$0xf0]  ;;  %v4905_v15 = vld [vmem:[#allocation11 + $0x84] sm:$0xf0] }
 0x179   :  { %2424 = vmatpush.bf16.msra.mxu3 %v4247_v28  ;;  %v4935_v19 = vld [vmem:[#allocation11 + $0x174] sm:$0xf0] }
 0x17a   :  { %v2081_v59 = vadd.f32 %v5348_v14, %v2068_v27  ;;  %v2146_v14 = vadd.f32 %v5360_v25, %v2133_v50  ;;  %v4933_v27 = vld [vmem:[#allocation11 + $0x164] sm:$0xf0]  ;;  %v4927_v9 = vld [vmem:[#allocation11 + $0x134] sm:$0xf0] }
 0x17b   :  { %2390 = vmatpush.bf16.msra.mxu0 %v3783_v41  ;;  %2403 = vmatpush.bf16.msra.mxu1 %v3911_v43  ;;  %v5377_v28 = vpop.f32.mrf.mxu0  ;;  %v5379_v23 = vpop.f32.mrf.mxu1  ;;  %v4306_v41 = vld [vmem:[#allocation11 + $0x30] sm:$0xf]  ;;  %v4895_v43 = vld [vmem:[#allocation11 + $0x34] sm:$0xf0]  ;;  %v4929_v50 = vld [vmem:[#allocation11 + $0x144] sm:$0xf0] }
 0x17c   :  { %2412 = vmatpush.bf16.msra.mxu2 %v4103_v44  ;;  %v2160_v30 = vpop.f32.mrf.mxu2  ;;  %v2173_v42 = vpop.f32.mrf.mxu3  ;;  %v4370_v44 = vld [vmem:[#allocation11 + $0xb0] sm:$0xf]  ;;  %v2094_v63 = vadd.f32 %v5350_v17, %v2081_v59  ;;  %v2159_v10 = vadd.f32 %v5368_v2, %v2146_v14  ;;  %v4282_v17 = vld [vmem:[#allocation11] sm:$0xf]  ;;  %v4340_v2 = vld [vmem:[#allocation11 + $0x78] sm:$0xf0] }
 0x17d   :  { %2425 = vmatpush.bf16.msra.mxu3 %v4231_v47  ;;  %v4911_v47 = vld [vmem:[#allocation11 + $0xb4] sm:$0xf0] }
 0x17e   :  { %2391 = vmatmul.bf16.vlgmr.msra.gmra.mxu0 %v5307_v31  ;;  %2404 = vmatmul.bf16.vlgmr.msra.gmra.mxu1 %v5309_v36  ;;  %v4180_v31 = vld [vmem:[#allocation8 + $0x738] sm:$0xf0]  ;;  %v4897_v36 = vld [vmem:[#allocation11 + $0x44] sm:$0xf0]  ;;  %v4371_v57 = vor.u32 %v4911_v47, %v4370_v44  ;;  %v2107_v24 = vadd.f32 %v5362_v55, %v2094_v63  ;;  %v2172_v52 = vadd.f32 %v5370_v3, %v2159_v10  ;;  %v4396_v3 = vld [vmem:[#allocation11 + $0xe8] sm:$0xf0] }
 0x17f   :  { %2833 = vmatpush.bf16.msrb.mxu0 %v4339_v53  ;;  %2846 = vmatpush.bf16.msrb.mxu1 %v4403_v54  ;;  %v4183_v37 = vor.u32 %v4861_v20, %v4180_v31  ;;  %v4315_v34 = vor.u32 %v4897_v36, %v4314_v21  ;;  %v4167_v53 = vor.u32 %v4857_v39, %v4164_v49  ;;  %v4450_v39 = vld [vmem:[#allocation11 + $0x150] sm:$0xf]  ;;  %v4931_v49 = vld [vmem:[#allocation11 + $0x154] sm:$0xf0]  ;;  %v4914_v44 = vld [vmem:[#allocation11 + $0xd4] sm:$0xf] }
 0x180   :  { %2413 = vmatpush.bf16.msra.mxu2 %v4087_v0  ;;  %v4307_v54 = vor.u32 %v4895_v43, %v4306_v41  ;;  %v2120_v25 = vadd.f32 %v5364_v56, %v2107_v24  ;;  %v2185_v20 = vadd.f32 %v5377_v28, %v2172_v52  ;;  %v4283_v56 = vor.u32 %v4889_v12, %v4282_v17  ;;  %v4324_v43 = vld [vmem:[#allocation11 + $0x58] sm:$0xf0]  ;;  %v4910_v17 = vld [vmem:[#allocation11 + $0xb4] sm:$0xf]  ;;  %v4925_v12 = vld [vmem:[#allocation11 + $0x124] sm:$0xf0] }
 0x181   :  { %2426 = vmatpush.bf16.msra.mxu3 %v4215_v1  ;;  %v4347_v31 = vor.u32 %v4905_v15, %v4346_v13  ;;  %v4388_v47 = vld [vmem:[#allocation11 + $0xd8] sm:$0xf0]  ;;  %v4451_v59 = vor.u32 %v4931_v49, %v4450_v39  ;;  %v4364_v52 = vld [vmem:[#allocation11 + $0xa8] sm:$0xf0]  ;;  %v4932_v49 = vld [vmem:[#allocation11 + $0x164] sm:$0xf] }
 0x182   :  { %v2198_v30 = vadd.f32 %v5379_v23, %v2185_v20  ;;  %v4442_v23 = vld [vmem:[#allocation11 + $0x140] sm:$0xf]  ;;  %v4308_v10 = vld [vmem:[#allocation11 + $0x38] sm:$0xf0] }
 0x183   :  { %2834 = vmatpush.bf16.msrb.mxu0 %v4331_v6  ;;  %2847 = vmatpush.bf16.msrb.mxu1 %v4395_v7  ;;  %v2186_v0 = vpop.f32.mrf.mxu0  ;;  %v2199_v1 = vpop.f32.mrf.mxu1  ;;  %v4290_v6 = vld [vmem:[#allocation11 + $0x10] sm:$0xf]  ;;  %v4891_v7 = vld [vmem:[#allocation11 + $0x14] sm:$0xf0]  ;;  %v4443_v63 = vor.u32 %v4929_v50, %v4442_v23  ;;  %v4452_v23 = vld [vmem:[#allocation11 + $0x158] sm:$0xf0] }
 0x184   :  { %2414 = vmatpush.bf16.msra.mxu2 %v4071_v16  ;;  %v4291_v55 = vor.u32 %v4891_v7, %v4290_v6  ;;  %v4902_v16 = vld [vmem:[#allocation11 + $0x74] sm:$0xf]  ;;  %v4383_v6 = vor.u32 %v4912_v61, %v4380_v62 }
 0x185   :  { %2427 = vmatpush.bf16.msra.mxu3 %v4199_v18  ;;  %v4466_v18 = vld [vmem:[#allocation11 + $0x170] sm:$0xf]  ;;  %v4343_v21 = vor.u32 %v4902_v16, %v4340_v2  ;;  %v4894_v7 = vld [vmem:[#allocation11 + $0x34] sm:$0xf]  ;;  %v4892_v16 = vld [vmem:[#allocation11 + $0x24] sm:$0xf] }
 0x186   :  { %v4311_v13 = vor.u32 %v4894_v7, %v4308_v10  ;;  %v4926_v62 = vld [vmem:[#allocation11 + $0x134] sm:$0xf] }
 0x187   :  { %2835 = vmatpush.bf16.msrb.mxu0 %v4323_v35  ;;  %2848 = vmatpush.bf16.msrb.mxu1 %v4387_v48  ;;  %v4918_v35 = vld [vmem:[#allocation11 + $0xf4] sm:$0xf]  ;;  %v4467_v48 = vor.u32 %v4935_v19, %v4466_v18  ;;  %v4300_v18 = vld [vmem:[#allocation11 + $0x28] sm:$0xf0]  ;;  %v4908_v19 = vld [vmem:[#allocation11 + $0xa4] sm:$0xf] }
 0x188   :  { %2415 = vmatpush.bf16.msra.mxu2 %v4055_v29  ;;  %v4916_v29 = vld [vmem:[#allocation11 + $0xe4] sm:$0xf]  ;;  %v4303_v20 = vor.u32 %v4892_v16, %v4300_v18  ;;  %v4922_v10 = vld [vmem:[#allocation11 + $0x114] sm:$0xf] }
 0x189   :  { %2428 = vmatpush.bf16.msra.mxu3 %v4183_v37  ;;  %v4459_v37 = vor.u32 %v4933_v27, %v4458_v26  ;;  %v4410_v27 = vld [vmem:[#allocation11 + $0x100] sm:$0xf]  ;;  %v4920_v18 = vld [vmem:[#allocation11 + $0x104] sm:$0xf] }
 0x18b   :  { %2836 = vmatpush.bf16.msrb.mxu0 %v4315_v34  ;;  %2849 = vmatpush.bf16.msrb.mxu1 %v4379_v38  ;;  %v4399_v34 = vor.u32 %v4916_v29, %v4396_v3  ;;  %v4898_v38 = vld [vmem:[#allocation11 + $0x54] sm:$0xf]  ;;  %v4468_v3 = vld [vmem:[#allocation11 + $0x178] sm:$0xf0] }
 0x18c   :  { %2416 = vmatpush.bf16.msra.mxu2 %v4039_v51  ;;  %v4934_v29 = vld [vmem:[#allocation11 + $0x174] sm:$0xf] }
 0x18d   :  { %2429 = vmatpush.bf16.msra.mxu3 %v4167_v53  ;;  %v4327_v53 = vor.u32 %v4898_v38, %v4324_v43  ;;  %v4411_v38 = vor.u32 %v4921_v40, %v4410_v27  ;;  %v4471_v39 = vor.u32 %v4934_v29, %v4468_v3  ;;  %v4945_v27 = vld [vmem:[#allocation11 + $0x1c4] sm:$0xf0] }
 0x18f   :  { %2837 = vmatpush.bf16.msrb.mxu0 %v4307_v54  ;;  %2850 = vmatpush.bf16.msrb.mxu1 %v4371_v57  ;;  %v4391_v54 = vor.u32 %v4914_v44, %v4388_v47  ;;  %v4896_v57 = vld [vmem:[#allocation11 + $0x44] sm:$0xf] }
 0x190   :  { %2417 = vmatmul.bf16.vlgmr.msra.gmra.mxu2 %v5321_v45  ;;  %2430 = vmatmul.bf16.vlgmr.msra.gmra.mxu3 %v5323_v46  ;;  %v4404_v45 = vld [vmem:[#allocation11 + $0xf8] sm:$0xf0]  ;;  %v2435_v46 = vmax.f32 %v2120_v25, 0.0 }
 0x191   :  { %v4407_v36 = vor.u32 %v4918_v35, %v4404_v45  ;;  %2859 = vmatpush.bf16.msrb.mxu2 %v4467_v48  ;;  %v4372_v25 = vld [vmem:[#allocation11 + $0xb8] sm:$0xf0]  ;;  %v4418_v35 = vld [vmem:[#allocation11 + $0x110] sm:$0xf]  ;;  %v4923_v45 = vld [vmem:[#allocation11 + $0x114] sm:$0xf0] }
 0x192   :  { %v5394_v42 = vpack.c.bf16 %v2435_v46, %v2435_v46  ;;  %v4375_v15 = vor.u32 %v4910_v17, %v4372_v25  ;;  %v4419_v26 = vor.u32 %v4923_v45, %v4418_v35  ;;  %v4420_v17 = vld [vmem:[#allocation11 + $0x118] sm:$0xf0]  ;;  %v4530_v25 = vld [vmem:[#allocation11 + $0x1f0] sm:$0xf]  ;;  %v4522_v45 = vld [vmem:[#allocation11 + $0x1e0] sm:$0xf] }
 0x193   :  { %2838 = vmatpush.bf16.msrb.mxu0 %v4299_v4  ;;  %2851 = vmatpush.bf16.msrb.mxu1 %v4363_v5  ;;  %v2223_v32 = vpop.f32.mrf.mxu3  ;;  %v4319_v5 = vor.u32 %v4896_v57, %v4316_v58  ;;  %v4444_v57 = vld [vmem:[#allocation11 + $0x148] sm:$0xf0] }
 0x194   :  { %v2210_v28 = vpop.f32.mrf.mxu2 }
 0x195   :  { %v2211_v41 = vadd.f32 %v2210_v28, %v2198_v30  ;;  %2860 = vmatpush.bf16.msrb.mxu2 %v4459_v37  ;;  %v4888_v28 = vld [vmem:[#allocation11 + $0x4] sm:$0xf] }
 0x197   :  { %2839 = vmatpush.bf16.msrb.mxu0 %v4291_v55  ;;  %2852 = vmatpush.bf16.msrb.mxu1 %v4355_v11  ;;  %v2224_v51 = vadd.f32 %v2223_v32, %v2211_v41  ;;  %v4435_v55 = vor.u32 %v4927_v9, %v4434_v8  ;;  %v4426_v11 = vld [vmem:[#allocation11 + $0x120] sm:$0xf]  ;;  %v4284_v32 = vld [vmem:[#allocation11 + $0x8] sm:$0xf0]  ;;  %v4924_v8 = vld [vmem:[#allocation11 + $0x124] sm:$0xf] }
 0x198   :  { %v4427_v2 = vor.u32 %v4925_v12, %v4426_v11  ;;  %v4460_v41 = vld [vmem:[#allocation11 + $0x168] sm:$0xf0]  ;;  %v4287_v43 = vor.u32 %v4888_v28, %v4284_v32 }
 0x199   :  { %v2436_v60 = vmax.f32 %v2224_v51, 0.0  ;;  %2861 = vmatpush.bf16.msrb.mxu2 %v4451_v59  ;;  %v4463_v47 = vor.u32 %v4932_v49, %v4460_v41  ;;  %v4930_v59 = vld [vmem:[#allocation11 + $0x154] sm:$0xf]  ;;  %v4490_v49 = vld [vmem:[#allocation11 + $0x1a0] sm:$0xf] }
 0x19a   :  { %v4941_v41 = vld [vmem:[#allocation11 + $0x1a4] sm:$0xf0] }
 0x19b   :  { %2840 = vmatpush.bf16.msrb.mxu0 %v4283_v56  ;;  %2853 = vmatpush.bf16.msrb.mxu1 %v4347_v31  ;;  %v5397_v0 = vpack.c.bf16 %v2436_v60, %v2436_v60  ;;  %v5399_v1 = vpop.f32.mrf.mxu0  ;;  %v5401_v14 = vpop.f32.mrf.mxu1  ;;  %v4367_v56 = vor.u32 %v4908_v19, %v4364_v52  ;;  %v4890_v31 = vld [vmem:[#allocation11 + $0x14] sm:$0xf]  ;;  %v4412_v19 = vld [vmem:[#allocation11 + $0x108] sm:$0xf0] }
 0x19c   :  { %v2212_v24 = vpop.f32.mrf.mxu2  ;;  %v2225_v4 = vpop.f32.mrf.mxu3 }
 0x19d   :  { %2862 = vmatpush.bf16.msrb.mxu2 %v4443_v63  ;;  %v4436_v63 = vld [vmem:[#allocation11 + $0x138] sm:$0xf0] }
 0x19e   :  { %2841 = vmatmul.bf16.vlgmr.msrb.gmra.mxu0 %v5394_v42  ;;  %2854 = vmatmul.bf16.vlgmr.msrb.gmra.mxu1 %v5397_v0 }
 0x19f   :  { %2885 = vmatpush.bf16.msra.mxu0 %v4343_v21  ;;  %2898 = vmatpush.bf16.msra.mxu1 %v4407_v36  ;;  %v4292_v21 = vld [vmem:[#allocation11 + $0x18] sm:$0xf0]  ;;  %v4906_v36 = vld [vmem:[#allocation11 + $0x94] sm:$0xf] }
 0x1a0   :  { %v4295_v37 = vor.u32 %v4890_v31, %v4292_v21  ;;  %v4359_v30 = vor.u32 %v4906_v36, %v4356_v22 }
 0x1a1   :  { %2863 = vmatpush.bf16.msrb.mxu2 %v4435_v55  ;;  %v4951_v55 = vld [vmem:[#allocation11 + $0x1f4] sm:$0xf0] }
 0x1a3   :  { %2886 = vmatpush.bf16.msra.mxu0 %v4335_v33  ;;  %2899 = vmatpush.bf16.msra.mxu1 %v4399_v34  ;;  %v2238_v48 = vpop.f32.mrf.mxu0  ;;  %v2251_v46 = vpop.f32.mrf.mxu1  ;;  %v4904_v33 = vld [vmem:[#allocation11 + $0x84] sm:$0xf]  ;;  %v4348_v34 = vld [vmem:[#allocation11 + $0x88] sm:$0xf0] }
 0x1a4   :  { %v4351_v44 = vor.u32 %v4904_v33, %v4348_v34 }
 0x1a5   :  { %2864 = vmatpush.bf16.msrb.mxu2 %v4427_v2  ;;  %v4415_v2 = vor.u32 %v4920_v18, %v4412_v19 }
 0x1a7   :  { %2887 = vmatpush.bf16.msra.mxu0 %v4327_v53  ;;  %2900 = vmatpush.bf16.msra.mxu1 %v4391_v54  ;;  %v4455_v53 = vor.u32 %v4930_v59, %v4452_v23  ;;  %v4928_v54 = vld [vmem:[#allocation11 + $0x144] sm:$0xf]  ;;  %v4474_v23 = vld [vmem:[#allocation11 + $0x180] sm:$0xf] }
 0x1a8   :  { %v4447_v58 = vor.u32 %v4928_v54, %v4444_v57  ;;  %v4950_v54 = vld [vmem:[#allocation11 + $0x1f4] sm:$0xf]  ;;  %v4532_v57 = vld [vmem:[#allocation11 + $0x1f8] sm:$0xf0] }
 0x1a9   :  { %2865 = vmatpush.bf16.msrb.mxu2 %v4419_v26  ;;  %v4506_v26 = vld [vmem:[#allocation11 + $0x1c0] sm:$0xf] }
 0x1aa   :  { %v4507_v40 = vor.u32 %v4945_v27, %v4506_v26 }
 0x1ab   :  { %2888 = vmatpush.bf16.msra.mxu0 %v4319_v5  ;;  %2901 = vmatpush.bf16.msra.mxu1 %v4383_v6  ;;  %v4439_v5 = vor.u32 %v4926_v62, %v4436_v63  ;;  %v5406_v6 = vld [vmem:[#allocation10] sm:$0xf]  ;;  %v4524_v62 = vld [vmem:[#allocation11 + $0x1e8] sm:$0xf0] }
 0x1ac   :  { %v733_v7 = vperm.slane %v5406_v6, 2  ;;  %v734_v19 = vperm.slane %v5406_v6, 3 }
 0x1ad   :  { %2866 = vmatpush.bf16.msrb.mxu2 %v4411_v38 }
 0x1ae   :  { %v2237_v9 = vadd.f32 %v5399_v1, %v733_v7  ;;  %v4949_v1 = vld [vmem:[#allocation11 + $0x1e4] sm:$0xf0] }
 0x1af   :  { %2889 = vmatpush.bf16.msra.mxu0 %v4311_v13  ;;  %2902 = vmatpush.bf16.msra.mxu1 %v4375_v15  ;;  %v4531_v13 = vor.u32 %v4951_v55, %v4530_v25  ;;  %v4423_v15 = vor.u32 %v4922_v10, %v4420_v17  ;;  %v4523_v48 = vor.u32 %v4949_v1, %v4522_v45  ;;  %v4942_v10 = vld [vmem:[#allocation11 + $0x1b4] sm:$0xf]  ;;  %v4500_v17 = vld [vmem:[#allocation11 + $0x1b8] sm:$0xf0]  ;;  %v4936_v45 = vld [vmem:[#allocation11 + $0x184] sm:$0xf] }
 0x1b0   :  { %v2250_v16 = vadd.f32 %v5401_v14, %v2237_v9  ;;  %v4503_v25 = vor.u32 %v4942_v10, %v4500_v17  ;;  %v4963_v10 = vld [vmem:[#allocation13 + $0x58] sm:$0xff]  ;;  %v4962_v17 = vld [vmem:[#allocation13 + $0x50] sm:$0xff] }
 0x1b1   :  { %2911 = vmatpush.bf16.msra.mxu2 %v4471_v39  ;;  %2872 = vmatpush.bf16.msrb.mxu3 %v4531_v13  ;;  %v4492_v13 = vld [vmem:[#allocation11 + $0x1a8] sm:$0xf0] }
 0x1b3   :  { %2890 = vmatpush.bf16.msra.mxu0 %v4303_v20  ;;  %2903 = vmatpush.bf16.msra.mxu1 %v4367_v56  ;;  %v2275_v51 = vpop.f32.mrf.mxu3  ;;  %v4514_v20 = vld [vmem:[#allocation11 + $0x1d0] sm:$0xf]  ;;  %v4947_v56 = vld [vmem:[#allocation11 + $0x1d4] sm:$0xf0] }
 0x1b4   :  { %v2262_v50 = vpop.f32.mrf.mxu2  ;;  %v4515_v21 = vor.u32 %v4947_v56, %v4514_v20 }
 0x1b5   :  { %2912 = vmatpush.bf16.msra.mxu2 %v4463_v47  ;;  %v2263_v52 = vadd.f32 %v2262_v50, %v2250_v16  ;;  %2873 = vmatpush.bf16.msrb.mxu3 %v4523_v48  ;;  %v4939_v47 = vld [vmem:[#allocation11 + $0x194] sm:$0xf0]  ;;  %v4937_v50 = vld [vmem:[#allocation11 + $0x184] sm:$0xf0]  ;;  %v4476_v48 = vld [vmem:[#allocation11 + $0x188] sm:$0xf0] }
 0x1b6   :  { %v4479_v56 = vor.u32 %v4936_v45, %v4476_v48 }
 0x1b7   :  { %2891 = vmatpush.bf16.msra.mxu0 %v4295_v37  ;;  %2904 = vmatpush.bf16.msra.mxu1 %v4359_v30  ;;  %v2276_v35 = vadd.f32 %v2275_v51, %v2263_v52  ;;  %v4498_v37 = vld [vmem:[#allocation11 + $0x1b0] sm:$0xf]  ;;  %v4943_v30 = vld [vmem:[#allocation11 + $0x1b4] sm:$0xf0] }
 0x1b8   :  { %v4499_v34 = vor.u32 %v4943_v30, %v4498_v37 }
 0x1b9   :  { %2913 = vmatpush.bf16.msra.mxu2 %v4455_v53  ;;  %2874 = vmatpush.bf16.msrb.mxu3 %v4515_v21 }
 0x1bb   :  { %2892 = vmatpush.bf16.msra.mxu0 %v4287_v43  ;;  %2905 = vmatpush.bf16.msra.mxu1 %v4351_v44  ;;  %v2288_v60 = vpop.f32.mrf.mxu0  ;;  %v2301_v61 = vpop.f32.mrf.mxu1  ;;  %v4491_v43 = vor.u32 %v4941_v41, %v4490_v49  ;;  %v4482_v44 = vld [vmem:[#allocation11 + $0x190] sm:$0xf] }
 0x1bc   :  { %v2264_v24 = vpop.f32.mrf.mxu2  ;;  %v2277_v4 = vpop.f32.mrf.mxu3  ;;  %v2289_v46 = vadd.f32 %v2288_v60, %v2276_v35  ;;  %v4483_v59 = vor.u32 %v4939_v47, %v4482_v44  ;;  %v4535_v60 = vor.u32 %v4950_v54, %v4532_v57  ;;  %v4484_v35 = vld [vmem:[#allocation11 + $0x198] sm:$0xf0]  ;;  %v4958_v57 = vld [vmem:[#allocation13 + $0x30] sm:$0xff] }
 0x1bd   :  { %2914 = vmatpush.bf16.msra.mxu2 %v4447_v58  ;;  %2875 = vmatpush.bf16.msrb.mxu3 %v4507_v40  ;;  %v4475_v58 = vor.u32 %v4937_v50, %v4474_v23  ;;  %v4946_v24 = vld [vmem:[#allocation11 + $0x1d4] sm:$0xf]  ;;  %v4516_v4 = vld [vmem:[#allocation11 + $0x1d8] sm:$0xf0] }
 0x1be   :  { %2893 = vmatmul.bf16.vlgmr.msra.gmra.mxu0 %v5394_v42  ;;  %2906 = vmatmul.bf16.vlgmr.msra.gmra.mxu1 %v5397_v0  ;;  %v4428_v42 = vld [vmem:[#allocation11 + $0x128] sm:$0xf0]  ;;  %v2302_v31 = vadd.f32 %v2301_v61, %v2289_v46  ;;  %v4948_v61 = vld [vmem:[#allocation11 + $0x1e4] sm:$0xf]  ;;  %v4967_v54 = vld [vmem:[#allocation13 + $0x78] sm:$0xff] }
 0x1bf   :  { %v4431_v0 = vor.u32 %v4924_v8, %v4428_v42  ;;  %v4527_v63 = vor.u32 %v4948_v61, %v4524_v62  ;;  %v4944_v42 = vld [vmem:[#allocation11 + $0x1c4] sm:$0xf]  ;;  %3086 = vmatpush.bf16.msrb.mxu1 %v4967_v54 }
 0x1c0   :  { %v4956_v62 = vld [vmem:[#allocation13 + $0x20] sm:$0xff] }
 0x1c1   :  { %2915 = vmatpush.bf16.msra.mxu2 %v4439_v5  ;;  %2876 = vmatpush.bf16.msrb.mxu3 %v4499_v34  ;;  %v4519_v5 = vor.u32 %v4946_v24, %v4516_v4  ;;  %v4954_v4 = vld [vmem:[#allocation13 + $0x10] sm:$0xff] }
 0x1c3   :  { %v2290_v11 = vpop.f32.mrf.mxu0  ;;  %v2303_v12 = vpop.f32.mrf.mxu1 }
 0x1c4   :  { %v4940_v12 = vld [vmem:[#allocation11 + $0x1a4] sm:$0xf] }
 0x1c5   :  { %2916 = vmatpush.bf16.msra.mxu2 %v4431_v0  ;;  %2877 = vmatpush.bf16.msrb.mxu3 %v4491_v43  ;;  %v4508_v0 = vld [vmem:[#allocation11 + $0x1c8] sm:$0xf0]  ;;  %v4495_v18 = vor.u32 %v4940_v12, %v4492_v13 }
 0x1c6   :  { %v4511_v9 = vor.u32 %v4944_v42, %v4508_v0  ;;  %v4965_v42 = vld [vmem:[#allocation13 + $0x68] sm:$0xff]  ;;  %v4952_v0 = vld [vmem:[#allocation13] sm:$0xff] }
 0x1c9   :  { %2917 = vmatpush.bf16.msra.mxu2 %v4423_v15  ;;  %2878 = vmatpush.bf16.msrb.mxu3 %v4483_v59 }
 0x1cd   :  { %2918 = vmatpush.bf16.msra.mxu2 %v4415_v2  ;;  %2879 = vmatpush.bf16.msrb.mxu3 %v4475_v58  ;;  %v4938_v2 = vld [vmem:[#allocation11 + $0x194] sm:$0xf] }
 0x1ce   :  { %v4487_v1 = vor.u32 %v4938_v2, %v4484_v35  ;;  %v4966_v58 = vld [vmem:[#allocation13 + $0x70] sm:$0xff] }
 0x1cf   :  { %3087 = vmatpush.bf16.msrb.mxu1 %v4966_v58 }
 0x1d1   :  { %2924 = vmatpush.bf16.msra.mxu3 %v4535_v60  ;;  %v4957_v60 = vld [vmem:[#allocation13 + $0x28] sm:$0xff] }
 0x1d3   :  { %v2327_v22 = vpop.f32.mrf.mxu3  ;;  %3088 = vmatpush.bf16.msrb.mxu1 %v4965_v42 }
 0x1d4   :  { %v2314_v36 = vpop.f32.mrf.mxu2 }
 0x1d5   :  { %v2315_v14 = vadd.f32 %v2314_v36, %v2302_v31  ;;  %2925 = vmatpush.bf16.msra.mxu3 %v4527_v63  ;;  %v4955_v63 = vld [vmem:[#allocation13 + $0x18] sm:$0xff] }
 0x1d7   :  { %v2328_v29 = vadd.f32 %v2327_v22, %v2315_v14 }
 0x1d9   :  { %v2437_v3 = vmax.f32 %v2328_v29, 0.0  ;;  %2926 = vmatpush.bf16.msra.mxu3 %v4519_v5 }
 0x1db   :  { %v2441_v28 = vpack.c.bf16 %v2437_v3, %v2437_v3  ;;  %v2340_v32 = vpop.f32.mrf.mxu0  ;;  %v2353_v33 = vpop.f32.mrf.mxu1  ;;  %v2507_v3 = vld [vmem:[%s5427_s6] sm:$0x3] }
 0x1dc   :  { %v2316_v38 = vpop.f32.mrf.mxu2  ;;  %v2329_v39 = vpop.f32.mrf.mxu3  ;;  %v2341_v52 = vadd.f32 %v2340_v32, %v734_v19  ;;  %v2509_v34 = vperm.slane %v2507_v3, 0  ;;  %v2510_v43 = vperm.slane %v2507_v3, 1 }
 0x1dd   :  { %2867 = vmatmul.bf16.vlgmr.msrb.gmra.mxu2 %v2441_v28  ;;  %2927 = vmatpush.bf16.msra.mxu3 %v4511_v9  ;;  %v4964_v9 = vld [vmem:[#allocation13 + $0x60] sm:$0xff] }
 0x1de   :  { %v2354_v31 = vadd.f32 %v2353_v33, %v2341_v52  ;;  %3089 = vmatpush.bf16.msrb.mxu1 %v4964_v9 }
 0x1e1   :  { %2928 = vmatpush.bf16.msra.mxu3 %v4503_v25  ;;  %v4961_v25 = vld [vmem:[#allocation13 + $0x48] sm:$0xff] }
 0x1e2   :  { %3090 = vmatpush.bf16.msrb.mxu1 %v4963_v10 }
 0x1e3   :  { %v2342_v51 = vpop.f32.mrf.mxu0  ;;  %v2355_v53 = vpop.f32.mrf.mxu1 }
 0x1e4   :  { %v4959_v53 = vld [vmem:[#allocation13 + $0x38] sm:$0xff] }
 0x1e5   :  { %2929 = vmatpush.bf16.msra.mxu3 %v4495_v18  ;;  %3073 = vmatpush.bf16.msrb.mxu0 %v4959_v53 }
 0x1e6   :  { %3091 = vmatpush.bf16.msrb.mxu1 %v4962_v17 }
 0x1e9   :  { %2930 = vmatpush.bf16.msra.mxu3 %v4487_v1  ;;  %3074 = vmatpush.bf16.msrb.mxu0 %v4958_v57 }
 0x1ea   :  { %3092 = vmatpush.bf16.msrb.mxu1 %v4961_v25 }
 0x1ed   :  { %2919 = vmatmul.bf16.vlgmr.msra.gmra.mxu2 %v2441_v28  ;;  %2931 = vmatpush.bf16.msra.mxu3 %v4479_v56 }
 0x1ee   :  { %3075 = vmatpush.bf16.msrb.mxu0 %v4957_v60 }
 0x1f2   :  { %3076 = vmatpush.bf16.msrb.mxu0 %v4956_v62 }
 0x1f3   :  { %v2379_v8 = vpop.f32.mrf.mxu3 }
 0x1f4   :  { %v2366_v7 = vpop.f32.mrf.mxu2 }
 0x1f5   :  { %v2367_v21 = vadd.f32 %v2366_v7, %v2354_v31 }
 0x1f6   :  { %3077 = vmatpush.bf16.msrb.mxu0 %v4955_v63 }
 0x1f7   :  { %v2380_v36 = vadd.f32 %v2379_v8, %v2367_v21  ;;  %v4953_v8 = vld [vmem:[#allocation13 + $0x8] sm:$0xff] }
 0x1fa   :  { %3078 = vmatpush.bf16.msrb.mxu0 %v4954_v4 }
 0x1fb   :  { %v2392_v55 = vpop.f32.mrf.mxu0  ;;  %v2405_v11 = vpop.f32.mrf.mxu1 }
 0x1fc   :  { %v2368_v15 = vpop.f32.mrf.mxu2  ;;  %v2381_v16 = vpop.f32.mrf.mxu3  ;;  %v2393_v22 = vadd.f32 %v2392_v55, %v2380_v36  ;;  %v4960_v55 = vld [vmem:[#allocation13 + $0x40] sm:$0xff] }
 0x1fd   :  { %3093 = vmatpush.bf16.msrb.mxu1 %v4960_v55 }
 0x1fe   :  { %v2406_v14 = vadd.f32 %v2405_v11, %v2393_v22  ;;  %3079 = vmatpush.bf16.msrb.mxu0 %v4953_v8 }
 0x202   :  { %3080 = vmatpush.bf16.msrb.mxu0 %v4952_v0 }
 0x203   :  { %v2394_v46 = vpop.f32.mrf.mxu0  ;;  %v2407_v20 = vpop.f32.mrf.mxu1 }
 0x204   :  { %v4984_v20 = vld [vmem:[%s5429_s8] ss:$0 sm:$0xff] }
 0x213   :  { %v2418_v26 = vpop.f32.mrf.mxu2  ;;  %v2431_v27 = vpop.f32.mrf.mxu3 }
 0x214   :  { %v2419_v6 = vadd.f32 %v2418_v26, %v2406_v14 }
 0x216   :  { %v2432_v40 = vadd.f32 %v2431_v27, %v2419_v6 }
 0x218   :  { %v2438_v29 = vmax.f32 %v2432_v40, 0.0 }
 0x21a   :  { %v2442_v37 = vpack.c.bf16 %v2438_v29, %v2438_v29 }
 0x21b   :  { %v2842_v30 = vpop.f32.mrf.mxu0  ;;  %v2420_v28 = vpop.f32.mrf.mxu2 }
 0x21c   :  { %v2433_v32 = vpop.f32.mrf.mxu3  ;;  %2880 = vmatmul.bf16.vlgmr.msrb.gmra.mxu3 %v2442_v37  ;;  %v2843_v33 = vadd.f32 %v2842_v30, %v2509_v34  ;;  %v2855_v38 = vpop.f32.mrf.mxu1 }
 0x21e   :  { %v2856_v49 = vadd.f32 %v2855_v38, %v2843_v33 }
 0x223   :  { %v2844_v39 = vpop.f32.mrf.mxu0 }
 0x224   :  { %v2857_v41 = vpop.f32.mrf.mxu1 }
 0x22c   :  { %2932 = vmatmul.bf16.vlgmr.msra.gmra.mxu3 %v2442_v37 }
 0x23b   :  { %v2894_v44 = vpop.f32.mrf.mxu0  ;;  %v2907_v47 = vpop.f32.mrf.mxu1 }
 0x23c   :  { %v2895_v59 = vadd.f32 %v2894_v44, %v2510_v43 }
 0x23e   :  { %v2908_v23 = vadd.f32 %v2907_v47, %v2895_v59 }
 0x243   :  { %v2896_v50 = vpop.f32.mrf.mxu0  ;;  %v2909_v51 = vpop.f32.mrf.mxu1 }
 0x260   :  { %v2868_v61 = vpop.f32.mrf.mxu2 }
 0x261   :  { %v2869_v11 = vadd.f32 %v2868_v61, %v2856_v49 }
 0x268   :  { %v2870_v24 = vpop.f32.mrf.mxu2 }
 0x270   :  { %v2920_v5 = vpop.f32.mrf.mxu2 }
 0x271   :  { %v2921_v19 = vadd.f32 %v2920_v5, %v2908_v23 }
 0x278   :  { %v2922_v7 = vpop.f32.mrf.mxu2 }
 0x29f   :  { %v2881_v12 = vpop.f32.mrf.mxu3 }
 0x2a0   :  { %v2882_v13 = vadd.f32 %v2881_v12, %v2869_v11 }
 0x2a2   :  { %v2937_v15 = vmax.f32 %v2882_v13, 0.0 }
 0x2a4   :  { %v2939_v16 = vpack.c.bf16 %v2937_v15, %v2937_v15 }
 0x2a6   :  { %3081 = vmatmul.bf16.vlgmr.msrb.gmra.mxu0 %v2939_v16 }
 0x2a7   :  { %v2883_v18 = vpop.f32.mrf.mxu3 }
 0x2af   :  { %v2933_v52 = vpop.f32.mrf.mxu3 }
 0x2b0   :  { %v2934_v2 = vadd.f32 %v2933_v52, %v2921_v19 }
 0x2b2   :  { %v2938_v35 = vmax.f32 %v2934_v2, 0.0 }
 0x2b4   :  { %v2940_v45 = vpack.c.bf16 %v2938_v35, %v2938_v35 }
 0x2b6   :  { %3094 = vmatmul.bf16.vlgmr.msrb.gmra.mxu1 %v2940_v45 }
 0x2b7   :  { %v2935_v1 = vpop.f32.mrf.mxu3 }
 0x323   :  { %v3082_v48 = vpop.f32.mrf.mxu0 }
 0x324   :  { %v3083_v56 = vadd.f32 %v4984_v20, %v3082_v48 }
 0x32b   :  { %v3084_v46 = vpop.f32.mrf.mxu0 }
 0x333   :  { %v3095_v31 = vpop.f32.mrf.mxu1 }
 0x334   :  { %v3096_v21 = vadd.f32 %v3095_v31, %v3083_v56 }
 0x336   :  { %3099 = vst [vmem:[#allocation14] sm:$0x3] %v3096_v21 }
 0x337   :  { %3110 = dma.vmem_to_hbm [thread:$0]  %s3106_s27, 32, %s3108_s29, [#allocation4]  }
 0x33b   :  { %v3097_v36 = vpop.f32.mrf.mxu1 }
 0x33c   :  { %5186 = dma.done.wait [#allocation4], 32  }
 0x33d   :  { %5187 = vsyncadd [#allocation4], 4294967264 }
 0x33e   :  { %3115 = vsyncpa [#allocation3], 1 }
 0x33f   :  { %3116 = vsyncpa [#allocation6], 1 }
 0x340   :  { %3117 = vsyncpa [#allocation9], 1 }
 0x341   :  { %3118 = vsyncpa [#allocation12], 1 }
 0x342   :  { %3119 = vsyncpa [#allocation4], 1 }

</bundles_post_ra>
